<compile_context>
chip_gen: v5e
topology: v5e:2x2
jax: 0.10.0
libtpu: 0.0.40
codegen_flags: <defaults>
</compile_context>

<pallas_src>
import functools
import math

import numpy as np
import jax
import jax.numpy as jnp
from jax.experimental import pallas as pl
from jax.experimental.pallas import tpu as pltpu

LEAKY_SLOPE = 0.2
VMEM_LIMIT_BYTES = 64 * 1024 * 1024


# -----------------------------------------------------------------------------
# In-kernel helpers
# -----------------------------------------------------------------------------
def _leaky(v, slope):
    return jnp.where(v >= 0.0, v, slope * v)


def _avg_pool_2x2(z, H, W, C):
    """2x2 average pool on (H, W, C) using only minor-dim-preserving reshapes,
    static slices and adds (VPU work, no pool matrix, no middle-axis reduce)."""
    z = z.reshape(H, W // 2, 2, C)
    z = (z[:, :, 0:1, :] + z[:, :, 1:2, :]).reshape(H, W // 2, C)
    z = z.reshape(H // 2, 2, W // 2, C)
    z = (z[:, 0:1, :, :] + z[:, 1:2, :, :]).reshape(H // 2, W // 2, C)
    return z * 0.25


def _conv_im2col(xp, w_flat_ref, KH, KW, Ho, Wo, mm_dtype):
    """Valid conv of padded input xp (Hp, Wp, C) with flattened weights
    (KH*KW*C, Cout): build im2col once, do a single big-K MXU matmul."""
    C = xp.shape[-1]
    cols = []
    for kh in range(KH):
        for kw in range(KW):
            cols.append(xp[kh:kh + Ho, kw:kw + Wo, :].reshape(Ho * Wo, C))
    patches = jnp.concatenate(cols, axis=-1).astype(mm_dtype)      # (Ho*Wo, KH*KW*C)
    return jnp.dot(patches, w_flat_ref[...].astype(mm_dtype),
                   preferred_element_type=jnp.float32)              # f32 accumulate


# -----------------------------------------------------------------------------
# Kernels
# -----------------------------------------------------------------------------
def _conv0_kernel(x_ref, w_ref, b_ref, o_ref):
    """First conv: Cin=1, 3x3, pad already applied.  Broadcast MAC on the VPU
    (K=1 would badly underfill the MXU)."""
    _, Hp, Wp, _ = x_ref.shape
    KH, KW, _, Cout = w_ref.shape
    H, W = Hp - KH + 1, Wp - KW + 1
    x = x_ref[0].astype(jnp.float32)                        # (Hp, Wp, 1)
    acc = jnp.zeros((H, W, Cout), jnp.float32)
    for kh in range(KH):
        for kw in range(KW):
            patch = x[kh:kh + H, kw:kw + W, :]              # (H, W, 1)
            wv = w_ref[kh, kw].astype(jnp.float32)[None]    # (1, 1, Cout)
            acc = acc + patch * wv
    acc = acc + b_ref[...].astype(jnp.float32)              # (1, Cout) broadcast
    o_ref[0] = acc.astype(o_ref.dtype)


def _resblk_kernel(x_ref, w1_ref, b1_ref, w2_ref, b2_ref, *rest,
                   learned_sc, slope, mm_dtype, scale):
    """Fully fused ResBlk (downsample='half', no norm) for one batch element:
       shortcut = avg_pool2x2(x) [-> conv1x1]
       residual = LReLU -> conv1(3x3, same) -> avg_pool2x2 -> LReLU -> conv2(3x3, same)
       out      = (shortcut + residual) / sqrt(2)
    x_ref is the zero-padded (pad=1) input."""
    if learned_sc:
        wsc_ref, o_ref, rpad_ref = rest
    else:
        wsc_ref = None
        o_ref, rpad_ref = rest

    _, Hp, Wp, Cin = x_ref.shape
    H, W = Hp - 2, Wp - 2
    H2, W2 = H // 2, W // 2
    Cout = o_ref.shape[-1]

    x = x_ref[0].astype(jnp.float32)                         # (Hp, Wp, Cin), zero-padded

    # ---- shortcut: pool, then (optional) 1x1 conv (1x1 conv commutes with pool) ----
    sc = _avg_pool_2x2(x[1:1 + H, 1:1 + W, :], H, W, Cin)    # (H2, W2, Cin)
    if learned_sc:
        sc = jnp.dot(sc.reshape(H2 * W2, Cin).astype(mm_dtype),
                     wsc_ref[...].astype(mm_dtype),
                     preferred_element_type=jnp.float32).reshape(H2, W2, Cout)

    # ---- residual: LReLU -> conv1 -> pool -> LReLU -> conv2 ----
    a1 = _leaky(x, slope)                                    # leaky(0)=0: padding stays 0
    c1 = _conv_im2col(a1, w1_ref, 3, 3, H, W, mm_dtype)      # (H*W, Cin)
    c1 = c1 + b1_ref[...].astype(jnp.float32)
    r = _avg_pool_2x2(c1.reshape(H, W, Cin), H, W, Cin)      # (H2, W2, Cin)
    r = _leaky(r, slope)

    # zero-pad r by 1 via VMEM scratch (conv2 uses padding=1)
    rpad_ref[...] = jnp.zeros_like(rpad_ref)
    rpad_ref[1:1 + H2, 1:1 + W2, :] = r
    rp = rpad_ref[...]

    c2 = _conv_im2col(rp, w2_ref, 3, 3, H2, W2, mm_dtype)    # (H2*W2, Cout)
    c2 = c2 + b2_ref[...].astype(jnp.float32)
    res = c2.reshape(H2, W2, Cout)

    o_ref[0] = ((sc + res) * scale).astype(o_ref.dtype)


def _tail_kernel(h_ref, w5_ref, b5_ref, avg_ref, wh_ref, bh_ref, o_ref, *,
                 slope, mm_dtype):
    """Whole-batch fused tail: LReLU -> conv5x5 (valid) -> LReLU ->
    global avg pool (tiny per-batch averaging matmul) -> head 1x1 conv."""
    B, Hf, Wf, C = h_ref.shape
    Ho, Wo = Hf - 4, Wf - 4
    h = _leaky(h_ref[...].astype(jnp.float32), slope)        # (B, Hf, Wf, C)
    cols = []
    for kh in range(5):
        for kw in range(5):
            cols.append(h[:, kh:kh + Ho, kw:kw + Wo, :].reshape(B * Ho * Wo, C))
    patches = jnp.concatenate(cols, axis=-1).astype(mm_dtype)       # (B*Ho*Wo, 25*C)
    c5 = jnp.dot(patches, w5_ref[...].astype(mm_dtype),
                 preferred_element_type=jnp.float32)                # (B*Ho*Wo, C)
    c5 = _leaky(c5 + b5_ref[...].astype(jnp.float32), slope)
    pooled = jnp.dot(avg_ref[...], c5, preferred_element_type=jnp.float32)   # (B, C)
    out = jnp.dot(pooled, wh_ref[...].astype(jnp.float32),
                  preferred_element_type=jnp.float32) + bh_ref[...].astype(jnp.float32)
    o_ref[...] = out.astype(o_ref.dtype)


# -----------------------------------------------------------------------------
# pallas_call wrappers
# -----------------------------------------------------------------------------
def conv0_block(x, w, b, *, compute_dtype):
    B, H, W, Cin = x.shape
    KH, KW, _, Cout = w.shape
    xp = jnp.pad(x, ((0, 0), (1, 1), (1, 1), (0, 0)))
    Hp, Wp = H + 2, W + 2
    b2 = jnp.asarray(b, jnp.float32).reshape(1, Cout)
    return pl.pallas_call(
        _conv0_kernel,
        out_shape=jax.ShapeDtypeStruct((B, H, W, Cout), compute_dtype),
        grid=(B,),
        in_specs=[pl.BlockSpec((1, Hp, Wp, Cin), lambda i: (i, 0, 0, 0)),
                  pl.BlockSpec((KH, KW, Cin, Cout), lambda i: (0, 0, 0, 0)),
                  pl.BlockSpec((1, Cout), lambda i: (0, 0))],
        out_specs=pl.BlockSpec((1, H, W, Cout), lambda i: (i, 0, 0, 0)),
        compiler_params=pltpu.CompilerParams(
            dimension_semantics=("parallel",),
            vmem_limit_bytes=VMEM_LIMIT_BYTES),
    )(xp, w, b2)


def resblk_block(h, blk, *, compute_dtype, slope=LEAKY_SLOPE):
    B, H, W, Cin = h.shape
    w1, b1 = blk['conv1_w'], blk['conv1_b']
    w2, b2 = blk['conv2_w'], blk['conv2_b']
    wsc = blk['conv1x1_w']
    Cout = w2.shape[-1]
    learned = wsc is not None
    H2, W2 = H // 2, W // 2

    hp = jnp.pad(h, ((0, 0), (1, 1), (1, 1), (0, 0)))
    Hp, Wp = H + 2, W + 2

    w1f = w1.reshape(9 * Cin, Cin).astype(compute_dtype)
    w2f = w2.reshape(9 * Cin, Cout).astype(compute_dtype)
    b1r = jnp.asarray(b1, jnp.float32).reshape(1, Cin)
    b2r = jnp.asarray(b2, jnp.float32).reshape(1, Cout)

    inputs = [hp, w1f, b1r, w2f, b2r]
    in_specs = [
        pl.BlockSpec((1, Hp, Wp, Cin), lambda i: (i, 0, 0, 0)),
        pl.BlockSpec((9 * Cin, Cin), lambda i: (0, 0)),
        pl.BlockSpec((1, Cin), lambda i: (0, 0)),
        pl.BlockSpec((9 * Cin, Cout), lambda i: (0, 0)),
        pl.BlockSpec((1, Cout), lambda i: (0, 0)),
    ]
    if learned:
        inputs.append(wsc.reshape(Cin, Cout).astype(compute_dtype))
        in_specs.append(pl.BlockSpec((Cin, Cout), lambda i: (0, 0)))

    kernel = functools.partial(_resblk_kernel, learned_sc=learned, slope=slope,
                               mm_dtype=compute_dtype, scale=1.0 / math.sqrt(2.0))
    return pl.pallas_call(
        kernel,
        out_shape=jax.ShapeDtypeStruct((B, H2, W2, Cout), compute_dtype),
        grid=(B,),
        in_specs=in_specs,
        out_specs=pl.BlockSpec((1, H2, W2, Cout), lambda i: (i, 0, 0, 0)),
        scratch_shapes=[pltpu.VMEM((H2 + 2, W2 + 2, Cin), jnp.float32)],
        compiler_params=pltpu.CompilerParams(
            dimension_semantics=("parallel",),
            vmem_limit_bytes=VMEM_LIMIT_BYTES),
    )(*inputs)


def _batch_avg_matrix(B, n):
    A = np.zeros((B, B * n), np.float32)
    for b in range(B):
        A[b, b * n:(b + 1) * n] = 1.0 / n
    return jnp.asarray(A)


def tail_block(h, w5, b5, wh, bh, *, compute_dtype, slope=LEAKY_SLOPE):
    B, Hf, Wf, C = h.shape
    Ho, Wo = Hf - 4, Wf - 4
    D = wh.shape[-1]
    w5f = w5.reshape(25 * C, C).astype(compute_dtype)
    b5r = jnp.asarray(b5, jnp.float32).reshape(1, C)
    whr = jnp.asarray(wh, jnp.float32).reshape(C, D)
    bhr = jnp.asarray(bh, jnp.float32).reshape(1, D)
    avg = _batch_avg_matrix(B, Ho * Wo)

    kernel = functools.partial(_tail_kernel, slope=slope, mm_dtype=compute_dtype)
    return pl.pallas_call(
        kernel,
        out_shape=jax.ShapeDtypeStruct((B, D), jnp.float32),
        grid=(1,),
        in_specs=[pl.BlockSpec((B, Hf, Wf, C), lambda i: (0, 0, 0, 0)),
                  pl.BlockSpec((25 * C, C), lambda i: (0, 0)),
                  pl.BlockSpec((1, C), lambda i: (0, 0)),
                  pl.BlockSpec((B, B * Ho * Wo), lambda i: (0, 0)),
                  pl.BlockSpec((C, D), lambda i: (0, 0)),
                  pl.BlockSpec((1, D), lambda i: (0, 0))],
        out_specs=pl.BlockSpec((B, D), lambda i: (0, 0)),
        compiler_params=pltpu.CompilerParams(
            dimension_semantics=("arbitrary",),
            vmem_limit_bytes=VMEM_LIMIT_BYTES),
    )(h, w5f, b5r, avg, whr, bhr)


# -----------------------------------------------------------------------------
# Discriminator forward (Pallas path)
# -----------------------------------------------------------------------------
def discriminator2d_features(params, x_nchw, *, compute_dtype=jnp.bfloat16):
    x = jnp.transpose(x_nchw, (0, 2, 3, 1))                # NCHW -> NHWC (glue)
    h = conv0_block(x, params['conv0_w'], params['conv0_b'], compute_dtype=compute_dtype)
    for blk in params['resblks']:
        h = resblk_block(h, blk, compute_dtype=compute_dtype)
    return tail_block(h, params['conv5_w'], params['conv5_b'],
                      params['head_w'], params['head_b'], compute_dtype=compute_dtype)


def discriminator_forward(params_dis, x_nchw, y, *, compute_dtype=jnp.bfloat16):
    feat = discriminator2d_features(params_dis, x_nchw, compute_dtype=compute_dtype)
    return feat[jnp.arange(y.shape[0]), y]                 # out[idx, y] (glue)


def discriminator_classifier(params_cls, x_nchw, *, compute_dtype=jnp.bfloat16):
    return discriminator2d_features(params_cls, x_nchw, compute_dtype=compute_dtype)


# -----------------------------------------------------------------------------
# Deterministic parameter init (PyTorch Conv2d-like uniform(-1/sqrt(fan_in), ..))
# -----------------------------------------------------------------------------
def _conv_init(key, kh, kw, cin, cout, bias=True):
    kw_, kb_ = jax.random.split(key)
    fan_in = kh * kw * cin
    bound = 1.0 / np.sqrt(fan_in)
    w = jax.random.uniform(kw_, (kh, kw, cin, cout), jnp.float32, -bound, bound)
    b = jax.random.uniform(kb_, (cout,), jnp.float32, -bound, bound) if bias else None
    return w, b


def init_discriminator2d_params(key, dim_in, num_domains, max_conv_dim, repeat_num):
    keys = iter(jax.random.split(key, 3 + 3 * repeat_num))
    params = {}
    params['conv0_w'], params['conv0_b'] = _conv_init(next(keys), 3, 3, 1, dim_in)
    resblks = []
    d_in = dim_in
    d_out = d_in
    for _ in range(repeat_num):
        d_out = min(d_in * 2, max_conv_dim)
        blk = {}
        blk['conv1_w'], blk['conv1_b'] = _conv_init(next(keys), 3, 3, d_in, d_in)
        blk['conv2_w'], blk['conv2_b'] = _conv_init(next(keys), 3, 3, d_in, d_out)
        if d_in != d_out:
            blk['conv1x1_w'], _ = _conv_init(next(keys), 1, 1, d_in, d_out, bias=False)
        else:
            _ = next(keys)
            blk['conv1x1_w'] = None
        resblks.append(blk)
        d_in = d_out
    params['resblks'] = resblks
    params['conv5_w'], params['conv5_b'] = _conv_init(next(keys), 5, 5, d_out, d_out)
    hw, hb = _conv_init(next(keys), 1, 1, d_out, num_domains)
    params['head_w'] = hw.reshape(d_out, num_domains)
    params['head_b'] = hb
    return params


# -----------------------------------------------------------------------------
# Pure-JAX reference (correctness check only)
# -----------------------------------------------------------------------------
def _ref_conv(x, w, b, padding):
    out = jax.lax.conv_general_dilated(
        x, w, (1, 1), [(padding, padding), (padding, padding)],
        dimension_numbers=('NHWC', 'HWIO', 'NHWC'))
    if b is not None:
        out = out + b[None, None, None, :]
    return out


def _ref_leaky(x):
    return jnp.where(x >= 0.0, x, LEAKY_SLOPE * x)


def _ref_pool(x):
    B, H, W, C = x.shape
    return x.reshape(B, H // 2, 2, W // 2, 2, C).mean(axis=(2, 4))


def _ref_features(params, x_nchw):
    x = jnp.transpose(x_nchw, (0, 2, 3, 1))
    h = _ref_conv(x, params['conv0_w'], params['conv0_b'], 1)
    for blk in params['resblks']:
        sc = h if blk['conv1x1_w'] is None else _ref_conv(h, blk['conv1x1_w'], None, 0)
        sc = _ref_pool(sc)
        r = _ref_conv(_ref_leaky(h), blk['conv1_w'], blk['conv1_b'], 1)
        r = _ref_pool(r)
        r = _ref_conv(_ref_leaky(r), blk['conv2_w'], blk['conv2_b'], 1)
        h = (sc + r) / math.sqrt(2.0)
    h = _ref_conv(_ref_leaky(h), params['conv5_w'], params['conv5_b'], 0)
    h = _ref_leaky(h)
    pooled = h.mean(axis=(1, 2))
    return pooled @ params['head_w'] + params['head_b']


def discriminator_forward_ref(params, x_nchw, y):
    feat = _ref_features(params, x_nchw)
    return feat[jnp.arange(y.shape[0]), y]


# -----------------------------------------------------------------------------
if __name__ == "__main__":
    # Small config consistent with the module structure; MAX_CONV_DIM=16 exercises
    # both the learned-1x1 and identity-shortcut ResBlk variants.
    DIM_IN, NUM_DOMAINS, MAX_CONV_DIM, REPEAT_NUM = 8, 2, 16, 2
    B, H, W = 2, 20, 20

    key = jax.random.PRNGKey(0)
    k_dis, k_cls, k_x, k_y = jax.random.split(key, 4)
    params_dis = init_discriminator2d_params(k_dis, DIM_IN, NUM_DOMAINS,
                                             MAX_CONV_DIM, REPEAT_NUM)
    params_cls = init_discriminator2d_params(k_cls, DIM_IN, NUM_DOMAINS,
                                             MAX_CONV_DIM, REPEAT_NUM)

    x = jax.random.normal(k_x, (B, 1, H, W), jnp.float32)    # PyTorch NCHW input
    y = jax.random.randint(k_y, (B,), 0, NUM_DOMAINS)

    ref = jax.block_until_ready(discriminator_forward_ref(params_dis, x, y))

    # Exact path (f32 MXU operands) — tight check.
    out_f32 = jax.block_until_ready(
        discriminator_forward(params_dis, x, y, compute_dtype=jnp.float32))
    np.testing.assert_allclose(np.asarray(out_f32), np.asarray(ref),
                               rtol=5e-4, atol=5e-4)

    # Fast path (bf16 MXU operands / activations, f32 accumulation) — loose check.
    out_bf16 = jax.block_until_ready(discriminator_forward(params_dis, x, y))
    a, r = np.asarray(out_bf16), np.asarray(ref)
    rel = np.linalg.norm(a - r) / (np.linalg.norm(r) + 1e-8)
    assert a.shape == (B,) and rel < 5e-2, f"bf16 path rel error {rel}"

    # Discriminator.classifier(x) -> (B, num_domains)
    cls_out = jax.block_until_ready(discriminator_classifier(params_cls, x))
    assert cls_out.shape == (B, NUM_DOMAINS)

    print("KERNEL_OK")
</pallas_src>

<mosaic_0001>
module attributes {stable_mosaic.version = 11 : i64} {
  func.func @_conv0_kernel(%arg0: i32, %arg1: memref<1x22x22x1xf32, #tpu.memory_space<vmem>>, %arg2: memref<3x3x1x8xf32, #tpu.memory_space<vmem>>, %arg3: memref<1x8xf32, #tpu.memory_space<vmem>>, %arg4: memref<1x20x20x8xf32, #tpu.memory_space<vmem>>) attributes {dimension_semantics = [#tpu.dimension_semantics<parallel>], iteration_bounds = array<i64: 2>, scalar_prefetch = 0 : i64, scratch_operands = 0 : i64, tpu.core_type = #tpu.core_type<tc>, window_params = [{transform_indices = @transform_0, window_bounds = array<i64: 1, 22, 22, 1>}, {pipeline_mode = #tpu.pipeline_mode<synchronous>, transform_indices = @transform_1, window_bounds = array<i64: 3, 3, 1, 8>}, {pipeline_mode = #tpu.pipeline_mode<synchronous>, transform_indices = @transform_2, window_bounds = array<i64: 1, 8>}, {transform_indices = @transform_3, window_bounds = array<i64: 1, 20, 20, 8>}]} {
    %c0 = arith.constant 0 : index
    %c0_0 = arith.constant 0 : index
    %c0_1 = arith.constant 0 : index
    %c0_2 = arith.constant 0 : index
    %0 = vector.load %arg1[%c0, %c0_0, %c0_1, %c0_2] : memref<1x22x22x1xf32, #tpu.memory_space<vmem>>, vector<1x22x22x1xf32>
    %1 = vector.shape_cast %0 : vector<1x22x22x1xf32> to vector<22x22x1xf32>
    %cst = arith.constant 0.000000e+00 : f32
    %2 = vector.broadcast %cst : f32 to vector<20x20x8xf32>
    %3 = vector.extract_strided_slice %1 {offsets = [0, 0, 0], sizes = [20, 20, 1], strides = [1, 1, 1]} : vector<22x22x1xf32> to vector<20x20x1xf32>
    %c0_3 = arith.constant 0 : index
    %c0_4 = arith.constant 0 : index
    %c0_5 = arith.constant 0 : index
    %c0_6 = arith.constant 0 : index
    %4 = vector.load %arg2[%c0_3, %c0_4, %c0_5, %c0_6] : memref<3x3x1x8xf32, #tpu.memory_space<vmem>>, vector<1x1x1x8xf32>
    %5 = vector.shape_cast %4 : vector<1x1x1x8xf32> to vector<1x8xf32>
    %6 = vector.shape_cast %5 : vector<1x8xf32> to vector<1x1x8xf32>
    %7 = vector.broadcast %3 : vector<20x20x1xf32> to vector<20x20x8xf32>
    %8 = vector.broadcast %6 : vector<1x1x8xf32> to vector<20x20x8xf32>
    %9 = arith.mulf %7, %8 : vector<20x20x8xf32>
    %10 = arith.addf %2, %9 : vector<20x20x8xf32>
    %11 = vector.extract_strided_slice %1 {offsets = [0, 1, 0], sizes = [20, 20, 1], strides = [1, 1, 1]} : vector<22x22x1xf32> to vector<20x20x1xf32>
    %c0_7 = arith.constant 0 : index
    %c1 = arith.constant 1 : index
    %c0_8 = arith.constant 0 : index
    %c0_9 = arith.constant 0 : index
    %12 = vector.load %arg2[%c0_7, %c1, %c0_8, %c0_9] : memref<3x3x1x8xf32, #tpu.memory_space<vmem>>, vector<1x1x1x8xf32>
    %13 = vector.shape_cast %12 : vector<1x1x1x8xf32> to vector<1x8xf32>
    %14 = vector.shape_cast %13 : vector<1x8xf32> to vector<1x1x8xf32>
    %15 = vector.broadcast %11 : vector<20x20x1xf32> to vector<20x20x8xf32>
    %16 = vector.broadcast %14 : vector<1x1x8xf32> to vector<20x20x8xf32>
    %17 = arith.mulf %15, %16 : vector<20x20x8xf32>
    %18 = arith.addf %10, %17 : vector<20x20x8xf32>
    %19 = vector.extract_strided_slice %1 {offsets = [0, 2, 0], sizes = [20, 20, 1], strides = [1, 1, 1]} : vector<22x22x1xf32> to vector<20x20x1xf32>
    %c0_10 = arith.constant 0 : index
    %c2 = arith.constant 2 : index
    %c0_11 = arith.constant 0 : index
    %c0_12 = arith.constant 0 : index
    %20 = vector.load %arg2[%c0_10, %c2, %c0_11, %c0_12] : memref<3x3x1x8xf32, #tpu.memory_space<vmem>>, vector<1x1x1x8xf32>
    %21 = vector.shape_cast %20 : vector<1x1x1x8xf32> to vector<1x8xf32>
    %22 = vector.shape_cast %21 : vector<1x8xf32> to vector<1x1x8xf32>
    %23 = vector.broadcast %19 : vector<20x20x1xf32> to vector<20x20x8xf32>
    %24 = vector.broadcast %22 : vector<1x1x8xf32> to vector<20x20x8xf32>
    %25 = arith.mulf %23, %24 : vector<20x20x8xf32>
    %26 = arith.addf %18, %25 : vector<20x20x8xf32>
    %27 = vector.extract_strided_slice %1 {offsets = [1, 0, 0], sizes = [20, 20, 1], strides = [1, 1, 1]} : vector<22x22x1xf32> to vector<20x20x1xf32>
    %c1_13 = arith.constant 1 : index
    %c0_14 = arith.constant 0 : index
    %c0_15 = arith.constant 0 : index
    %c0_16 = arith.constant 0 : index
    %28 = vector.load %arg2[%c1_13, %c0_14, %c0_15, %c0_16] : memref<3x3x1x8xf32, #tpu.memory_space<vmem>>, vector<1x1x1x8xf32>
    %29 = vector.shape_cast %28 : vector<1x1x1x8xf32> to vector<1x8xf32>
    %30 = vector.shape_cast %29 : vector<1x8xf32> to vector<1x1x8xf32>
    %31 = vector.broadcast %27 : vector<20x20x1xf32> to vector<20x20x8xf32>
    %32 = vector.broadcast %30 : vector<1x1x8xf32> to vector<20x20x8xf32>
    %33 = arith.mulf %31, %32 : vector<20x20x8xf32>
    %34 = arith.addf %26, %33 : vector<20x20x8xf32>
    %35 = vector.extract_strided_slice %1 {offsets = [1, 1, 0], sizes = [20, 20, 1], strides = [1, 1, 1]} : vector<22x22x1xf32> to vector<20x20x1xf32>
    %c1_17 = arith.constant 1 : index
    %c1_18 = arith.constant 1 : index
    %c0_19 = arith.constant 0 : index
    %c0_20 = arith.constant 0 : index
    %36 = vector.load %arg2[%c1_17, %c1_18, %c0_19, %c0_20] : memref<3x3x1x8xf32, #tpu.memory_space<vmem>>, vector<1x1x1x8xf32>
    %37 = vector.shape_cast %36 : vector<1x1x1x8xf32> to vector<1x8xf32>
    %38 = vector.shape_cast %37 : vector<1x8xf32> to vector<1x1x8xf32>
    %39 = vector.broadcast %35 : vector<20x20x1xf32> to vector<20x20x8xf32>
    %40 = vector.broadcast %38 : vector<1x1x8xf32> to vector<20x20x8xf32>
    %41 = arith.mulf %39, %40 : vector<20x20x8xf32>
    %42 = arith.addf %34, %41 : vector<20x20x8xf32>
    %43 = vector.extract_strided_slice %1 {offsets = [1, 2, 0], sizes = [20, 20, 1], strides = [1, 1, 1]} : vector<22x22x1xf32> to vector<20x20x1xf32>
    %c1_21 = arith.constant 1 : index
    %c2_22 = arith.constant 2 : index
    %c0_23 = arith.constant 0 : index
    %c0_24 = arith.constant 0 : index
    %44 = vector.load %arg2[%c1_21, %c2_22, %c0_23, %c0_24] : memref<3x3x1x8xf32, #tpu.memory_space<vmem>>, vector<1x1x1x8xf32>
    %45 = vector.shape_cast %44 : vector<1x1x1x8xf32> to vector<1x8xf32>
    %46 = vector.shape_cast %45 : vector<1x8xf32> to vector<1x1x8xf32>
    %47 = vector.broadcast %43 : vector<20x20x1xf32> to vector<20x20x8xf32>
    %48 = vector.broadcast %46 : vector<1x1x8xf32> to vector<20x20x8xf32>
    %49 = arith.mulf %47, %48 : vector<20x20x8xf32>
    %50 = arith.addf %42, %49 : vector<20x20x8xf32>
    %51 = vector.extract_strided_slice %1 {offsets = [2, 0, 0], sizes = [20, 20, 1], strides = [1, 1, 1]} : vector<22x22x1xf32> to vector<20x20x1xf32>
    %c2_25 = arith.constant 2 : index
    %c0_26 = arith.constant 0 : index
    %c0_27 = arith.constant 0 : index
    %c0_28 = arith.constant 0 : index
    %52 = vector.load %arg2[%c2_25, %c0_26, %c0_27, %c0_28] : memref<3x3x1x8xf32, #tpu.memory_space<vmem>>, vector<1x1x1x8xf32>
    %53 = vector.shape_cast %52 : vector<1x1x1x8xf32> to vector<1x8xf32>
    %54 = vector.shape_cast %53 : vector<1x8xf32> to vector<1x1x8xf32>
    %55 = vector.broadcast %51 : vector<20x20x1xf32> to vector<20x20x8xf32>
    %56 = vector.broadcast %54 : vector<1x1x8xf32> to vector<20x20x8xf32>
    %57 = arith.mulf %55, %56 : vector<20x20x8xf32>
    %58 = arith.addf %50, %57 : vector<20x20x8xf32>
    %59 = vector.extract_strided_slice %1 {offsets = [2, 1, 0], sizes = [20, 20, 1], strides = [1, 1, 1]} : vector<22x22x1xf32> to vector<20x20x1xf32>
    %c2_29 = arith.constant 2 : index
    %c1_30 = arith.constant 1 : index
    %c0_31 = arith.constant 0 : index
    %c0_32 = arith.constant 0 : index
    %60 = vector.load %arg2[%c2_29, %c1_30, %c0_31, %c0_32] : memref<3x3x1x8xf32, #tpu.memory_space<vmem>>, vector<1x1x1x8xf32>
    %61 = vector.shape_cast %60 : vector<1x1x1x8xf32> to vector<1x8xf32>
    %62 = vector.shape_cast %61 : vector<1x8xf32> to vector<1x1x8xf32>
    %63 = vector.broadcast %59 : vector<20x20x1xf32> to vector<20x20x8xf32>
    %64 = vector.broadcast %62 : vector<1x1x8xf32> to vector<20x20x8xf32>
    %65 = arith.mulf %63, %64 : vector<20x20x8xf32>
    %66 = arith.addf %58, %65 : vector<20x20x8xf32>
    %67 = vector.extract_strided_slice %1 {offsets = [2, 2, 0], sizes = [20, 20, 1], strides = [1, 1, 1]} : vector<22x22x1xf32> to vector<20x20x1xf32>
    %c2_33 = arith.constant 2 : index
    %c2_34 = arith.constant 2 : index
    %c0_35 = arith.constant 0 : index
    %c0_36 = arith.constant 0 : index
    %68 = vector.load %arg2[%c2_33, %c2_34, %c0_35, %c0_36] : memref<3x3x1x8xf32, #tpu.memory_space<vmem>>, vector<1x1x1x8xf32>
    %69 = vector.shape_cast %68 : vector<1x1x1x8xf32> to vector<1x8xf32>
    %70 = vector.shape_cast %69 : vector<1x8xf32> to vector<1x1x8xf32>
    %71 = vector.broadcast %67 : vector<20x20x1xf32> to vector<20x20x8xf32>
    %72 = vector.broadcast %70 : vector<1x1x8xf32> to vector<20x20x8xf32>
    %73 = arith.mulf %71, %72 : vector<20x20x8xf32>
    %74 = arith.addf %66, %73 : vector<20x20x8xf32>
    %c0_37 = arith.constant 0 : index
    %c0_38 = arith.constant 0 : index
    %75 = vector.load %arg3[%c0_37, %c0_38] : memref<1x8xf32, #tpu.memory_space<vmem>>, vector<1x8xf32>
    %76 = vector.shape_cast %75 : vector<1x8xf32> to vector<1x1x8xf32>
    %77 = vector.broadcast %76 : vector<1x1x8xf32> to vector<20x20x8xf32>
    %78 = arith.addf %74, %77 : vector<20x20x8xf32>
    %c0_39 = arith.constant 0 : index
    %c0_40 = arith.constant 0 : index
    %c0_41 = arith.constant 0 : index
    %c0_42 = arith.constant 0 : index
    %79 = vector.load %arg4[%c0_39, %c0_40, %c0_41, %c0_42] : memref<1x20x20x8xf32, #tpu.memory_space<vmem>>, vector<1x20x20x8xf32>
    %80 = vector.shape_cast %79 : vector<1x20x20x8xf32> to vector<20x20x8xf32>
    %81 = vector.shape_cast %78 : vector<20x20x8xf32> to vector<1x20x20x8xf32>
    tpu.vector_store %arg4[%c0_39, %c0_40, %c0_41, %c0_42], %81 {strides = array<i32>} : memref<1x20x20x8xf32, #tpu.memory_space<vmem>>, vector<1x20x20x8xf32>,
    return
  }
  func.func @transform_0(%arg0: i32) -> (i32, i32, i32, i32) {
    %c0_i32 = arith.constant 0 : i32
    %c0_i32_0 = arith.constant 0 : i32
    %c0_i32_1 = arith.constant 0 : i32
    %c0_i32_2 = arith.constant 0 : i32
    return %arg0, %c0_i32, %c0_i32_0, %c0_i32_1 : i32, i32, i32, i32
  }
  func.func @transform_1(%arg0: i32) -> (i32, i32, i32, i32) {
    %c0_i32 = arith.constant 0 : i32
    %c0_i32_0 = arith.constant 0 : i32
    %c0_i32_1 = arith.constant 0 : i32
    %c0_i32_2 = arith.constant 0 : i32
    %c0_i32_3 = arith.constant 0 : i32
    return %c0_i32, %c0_i32_0, %c0_i32_1, %c0_i32_2 : i32, i32, i32, i32
  }
  func.func @transform_2(%arg0: i32) -> (i32, i32) {
    %c0_i32 = arith.constant 0 : i32
    %c0_i32_0 = arith.constant 0 : i32
    %c0_i32_1 = arith.constant 0 : i32
    return %c0_i32, %c0_i32_0 : i32, i32
  }
  func.func @transform_3(%arg0: i32) -> (i32, i32, i32, i32) {
    %c0_i32 = arith.constant 0 : i32
    %c0_i32_0 = arith.constant 0 : i32
    %c0_i32_1 = arith.constant 0 : i32
    %c0_i32_2 = arith.constant 0 : i32
    return %arg0, %c0_i32, %c0_i32_0, %c0_i32_1 : i32, i32, i32, i32
  }
}

</mosaic_0001>

<bundles_post_ra>
// kernel: tpu_custom_call.1
= control target key start
LH: loop header
LB: loop body
LE: loop exit
PB: predicated region body
PF: predicated region fallthrough
CT: control target
= control target key end

     0   :  { %s3294_s12 = smov 0   ;;  %s6087_s0 = inlined_call_operand.vmem [shape: f32[2,22,22,1], index: 0, kind: input, shape index: {}]   ;;  %s6088_s1 = inlined_call_operand.vmem [shape: f32[3,3,1,8], index: 1, kind: input, shape index: {}]   ;;  %s6089_s2 = inlined_call_operand.vmem [shape: f32[1,8], index: 2, kind: input, shape index: {}]   ;;  %s6090_s3 = inlined_call_operand.vmem [shape: f32[2,20,20,8], index: 3, kind: output, shape index: {}]  }
   0x1 LB: > { %s3194_s13 = sadd.s32 4294967295, %s3271_s12   ;;  %p3198_p0 = scmp.ge.s32.totalorder %s3271_s12, 1  ;;  %s3271_s12 = sphi %s3294_s12, %s13_s12  }
   0x2   : > { %p137_p1 = scmp.lt.s32.totalorder %s3271_s12, 3 }
   0x4   : > { %p138_p2 = pnand %p3198_p0, %p137_p1 }
   0x6   : > { %141 = sbr.rel (%p138_p2) target bundleno = 588 (0x24c), region = 32 }
   0xb   : > { %p161_p3 = scmp.lt.s32.totalorder %s3194_s13, 1  ;;  %v3273_v0 = vmov 0   ;;  %v3354_v41 = vld [vmem:[%s6088_s1] ss:$0 sm:$0xff]  ;;  %v3359_v42 = vld [vmem:[%s6088_s1 + $0x1] ss:$0 sm:$0xff] }
   0xc   : > { %3224 = vset.pattern.permute.xlu2 %v3273_v0  ;;  %3223 = vset.pattern.permute.xlu1 %v3273_v0  ;;  %v3364_v43 = vld [vmem:[%s6088_s1 + $0x2] ss:$0 sm:$0xff]  ;;  %v3376_v49 = vld [vmem:[%s6088_s1 + $0x4] ss:$0 sm:$0xff]  ;;  %v3383_v54 = vld [vmem:[%s6088_s1 + $0x5] ss:$0 sm:$0xff] }
   0xd   : > { %3222 = vset.pattern.permute.xlu0 %v3273_v0  ;;  %s6433_s13 = smov (!%p161_p3, %s3194_s13), 1  ;;  %vm786_vm0 = vcmask 1046528   ;;  %v3398_v60 = vld [vmem:[%s6088_s1 + $0x3] ss:$0 sm:$0xff]  ;;  %vm1132_vm1 = vcmask 1045504   ;;  %vm3080_vm2 = vcmask 60416  }
   0xe   : > { %s3211_s14 = smul.u32 528, %s6433_s13  ;;  %vm3077_vm3 = vcmask 64512  }
   0xf   : > { %s3212_s9 = smul.u32 480, %s6433_s13 }
  0x10   : > { %s3308_s17 = scalar_lea.vmem %s6087_s0, %s3211_s14 }
  0x11   : > { %v175_v1 = vld [vmem:[%s3308_s17 + $0x20] sm:$0xff]  ;;  %v173_v2 = vld [vmem:[%s3308_s17 + $0x10] sm:$0x3f]  ;;  %v176_v4 = vld [vmem:[%s3308_s17 + $0x28] sm:$0x3f]  ;;  %s3567_s15 = scalar_lea.vmem %s6090_s3, %s3212_s9 }
  0x12   : > { %v171_v3 = vld [vmem:[%s3308_s17] sm:$0xff]  ;;  %260 = vperm.xlu2 %3224, %v175_v1   ;;  %250 = vperm.xlu1 %3223, %v173_v2   ;;  %v174_v5 = vld [vmem:[%s3308_s17 + $0x18] sm:$0xff]  ;;  %v172_v6 = vld [vmem:[%s3308_s17 + $0x8] sm:$0xff] }
  0x13   : > { %240 = vperm.xlu0 %3222, %v171_v3   ;;  %v179_v7 = vld [vmem:[%s3308_s17 + $0x40] sm:$0x3f]  ;;  %v178_v8 = vld [vmem:[%s3308_s17 + $0x38] sm:$0xff]  ;;  %v177_v9 = vld [vmem:[%s3308_s17 + $0x30] sm:$0xff] }
  0x14   : > { %v182_v10 = vld [vmem:[%s3308_s17 + $0x58] sm:$0x3f]  ;;  %v181_v11 = vld [vmem:[%s3308_s17 + $0x50] sm:$0xff]  ;;  %v180_v12 = vld [vmem:[%s3308_s17 + $0x48] sm:$0xff] }
  0x15   : > { %v185_v13 = vld [vmem:[%s3308_s17 + $0x70] sm:$0x3f]  ;;  %v184_v14 = vld [vmem:[%s3308_s17 + $0x68] sm:$0xff]  ;;  %v183_v15 = vld [vmem:[%s3308_s17 + $0x60] sm:$0xff] }
  0x16   : > { %v188_v16 = vld [vmem:[%s3308_s17 + $0x88] sm:$0x3f]  ;;  %v187_v17 = vld [vmem:[%s3308_s17 + $0x80] sm:$0xff]  ;;  %v186_v18 = vld [vmem:[%s3308_s17 + $0x78] sm:$0xff] }
  0x17   : > { %v191_v19 = vld [vmem:[%s3308_s17 + $0xa0] sm:$0x3f]  ;;  %v190_v20 = vld [vmem:[%s3308_s17 + $0x98] sm:$0xff]  ;;  %v189_v21 = vld [vmem:[%s3308_s17 + $0x90] sm:$0xff] }
  0x18   : > { %v194_v22 = vld [vmem:[%s3308_s17 + $0xb8] sm:$0x3f]  ;;  %v193_v23 = vld [vmem:[%s3308_s17 + $0xb0] sm:$0xff]  ;;  %v192_v24 = vld [vmem:[%s3308_s17 + $0xa8] sm:$0xff] }
  0x19   : > { %v197_v25 = vld [vmem:[%s3308_s17 + $0xd0] sm:$0x3f]  ;;  %v196_v26 = vld [vmem:[%s3308_s17 + $0xc8] sm:$0xff]  ;;  %v195_v27 = vld [vmem:[%s3308_s17 + $0xc0] sm:$0xff] }
  0x1a   : > { %265 = vperm.xlu2 %3224, %v176_v4   ;;  %255 = vperm.xlu1 %3223, %v174_v5   ;;  %v200_v28 = vld [vmem:[%s3308_s17 + $0xe8] sm:$0x3f]  ;;  %v199_v29 = vld [vmem:[%s3308_s17 + $0xe0] sm:$0xff]  ;;  %v198_v30 = vld [vmem:[%s3308_s17 + $0xd8] sm:$0xff] }
  0x1b   : > { %245 = vperm.xlu0 %3222, %v172_v6   ;;  %v203_v31 = vld [vmem:[%s3308_s17 + $0x100] sm:$0x3f]  ;;  %v202_v32 = vld [vmem:[%s3308_s17 + $0xf8] sm:$0xff]  ;;  %v201_v33 = vld [vmem:[%s3308_s17 + $0xf0] sm:$0xff] }
  0x1c   : > { %v206_v34 = vld [vmem:[%s3308_s17 + $0x118] sm:$0x3f]  ;;  %v205_v35 = vld [vmem:[%s3308_s17 + $0x110] sm:$0xff]  ;;  %v204_v36 = vld [vmem:[%s3308_s17 + $0x108] sm:$0xff] }
  0x1d   : > { %v209_v38 = vld [vmem:[%s3308_s17 + $0x130] sm:$0x3f]  ;;  %v208_v39 = vld [vmem:[%s3308_s17 + $0x128] sm:$0xff]  ;;  %v207_v40 = vld [vmem:[%s3308_s17 + $0x120] sm:$0xff] }
  0x1e   : > { %v212_v52 = vld [vmem:[%s3308_s17 + $0x148] sm:$0x3f]  ;;  %v211_v53 = vld [vmem:[%s3308_s17 + $0x140] sm:$0xff]  ;;  %v210_v58 = vld [vmem:[%s3308_s17 + $0x138] sm:$0xff] }
  0x22   : > { %280 = vperm.xlu2 %3224, %v179_v7   ;;  %275 = vperm.xlu1 %3223, %v178_v8  }
  0x23   : > { %270 = vperm.xlu0 %3222, %v177_v9  }
  0x2a   : > { %295 = vperm.xlu2 %3224, %v182_v10   ;;  %290 = vperm.xlu1 %3223, %v181_v11  }
  0x2b   : > { %285 = vperm.xlu0 %3222, %v180_v12  }
  0x32   : > { %310 = vperm.xlu2 %3224, %v185_v13   ;;  %305 = vperm.xlu1 %3223, %v184_v14   ;;  %v215_v13 = vld [vmem:[%s3308_s17 + $0x160] sm:$0x3f] }
  0x33   : > { %300 = vperm.xlu0 %3222, %v183_v15  }
  0x3a   : > { %325 = vperm.xlu2 %3224, %v188_v16   ;;  %320 = vperm.xlu1 %3223, %v187_v17  }
  0x3b   : > { %315 = vperm.xlu0 %3222, %v186_v18  }
  0x42   : > { %340 = vperm.xlu2 %3224, %v191_v19   ;;  %335 = vperm.xlu1 %3223, %v190_v20   ;;  %v214_v19 = vld [vmem:[%s3308_s17 + $0x158] sm:$0xff]  ;;  %v213_v20 = vld [vmem:[%s3308_s17 + $0x150] sm:$0xff] }
  0x43   : > { %330 = vperm.xlu0 %3222, %v189_v21  }
  0x4a   : > { %355 = vperm.xlu2 %3224, %v194_v22   ;;  %350 = vperm.xlu1 %3223, %v193_v23  }
  0x4b   : > { %345 = vperm.xlu0 %3222, %v192_v24   ;;  %v3444_v24 = vld [vmem:[%s6088_s1 + $0x6] ss:$0 sm:$0xff] }
  0x52   : > { %370 = vperm.xlu2 %3224, %v197_v25   ;;  %365 = vperm.xlu1 %3223, %v196_v26   ;;  %v3449_v25 = vld [vmem:[%s6088_s1 + $0x7] ss:$0 sm:$0xff] }
  0x53   : > { %360 = vperm.xlu0 %3222, %v195_v27  }
  0x5a   : > { %385 = vperm.xlu2 %3224, %v200_v28   ;;  %380 = vperm.xlu1 %3223, %v199_v29   ;;  %v3459_v28 = vld [vmem:[%s6088_s1 + $0x8] ss:$0 sm:$0xff] }
  0x5b   : > { %375 = vperm.xlu0 %3222, %v198_v30  }
  0x62   : > { %400 = vperm.xlu2 %3224, %v203_v31   ;;  %395 = vperm.xlu1 %3223, %v202_v32  }
  0x63   : > { %390 = vperm.xlu0 %3222, %v201_v33  }
  0x6a   : > { %415 = vperm.xlu2 %3224, %v206_v34   ;;  %410 = vperm.xlu1 %3223, %v205_v35  }
  0x6b   : > { %405 = vperm.xlu0 %3222, %v204_v36  }
  0x6c   : > { %v3346_v37 = vpop.permute.xlu2 %260 }
  0x6d   : > { %v3368_v44 = vmul.f32 %v3359_v42, %v3346_v37  ;;  %v3388_v56 = vmul.f32 %v3364_v43, %v3346_v37  ;;  %v3392_v57 = vmul.f32 %v3376_v49, %v3346_v37  ;;  %v3402_v61 = vmul.f32 %v3383_v54, %v3346_v37 }
  0x6e   : > { %v545_v1 = vmul.f32 %v3354_v41, %v3346_v37  ;;  %v3465_v30 = vmul.f32 %v3398_v60, %v3346_v37 }
  0x6f   : > { %v6106_v55 = vrot.slane %v3368_v44, 1  ;;  %v6105_v2 = vrot.slane %v3388_v56, 2  ;;  %v6102_v3 = vrot.slane %v3392_v57, 1  ;;  %v6101_v10 = vrot.slane %v3402_v61, 2 }
  0x72   : > { %430 = vperm.xlu2 %3224, %v209_v38   ;;  %425 = vperm.xlu1 %3223, %v208_v39  }
  0x73   : > { %420 = vperm.xlu0 %3222, %v207_v40  }
  0x74   : > { %v266_v45 = vpop.permute.xlu2 %265 }
  0x75   : > { %v546_v46 = vmul.f32 %v3354_v41, %v266_v45  ;;  %v671_v47 = vmul.f32 %v3359_v42, %v266_v45  ;;  %v1017_v48 = vmul.f32 %v3364_v43, %v266_v45  ;;  %v3405_v62 = vmul.f32 %v3376_v49, %v266_v45 }
  0x76   : > { %v3408_v0 = vmul.f32 %v3383_v54, %v266_v45  ;;  %v3470_v32 = vmul.f32 %v3398_v60, %v266_v45 }
  0x77   : > { %v795_v50 = vrot.slane %v671_v47, 1  ;;  %v1141_v51 = vrot.slane %v1017_v48, 2  ;;  %v1621_v14 = vrot.slane %v3405_v62, 1 }
  0x78   : > { %v6107_v15 = vrot.slane %v3408_v0, 2  ;;  %v6231_v62 = vrot.slane %v3408_v0, 2 }
  0x79   : > { %v952_v59 = vadd.f32 %v795_v50, %v546_v46  ;;  %v796_v4 = vsel %vm786_vm0, %v6106_v55, %v795_v50  ;;  %v1142_v26 = vsel %vm1132_vm1, %v6105_v2, %v1141_v51  ;;  %v3477_v33 = vsel %vm786_vm0, %v6102_v3, %v1621_v14  ;;  %v219_v55 = vld [vmem:[%s3308_s17 + $0x180] sm:$0xff] }
  0x7a   : > { %445 = vperm.xlu2 %3224, %v212_v52   ;;  %440 = vperm.xlu1 %3223, %v211_v53   ;;  %v951_v21 = vadd.f32 %v796_v4, %v545_v1  ;;  %v3484_v34 = vsel %vm1132_vm1, %v6101_v10, %v6107_v15  ;;  %v218_v4 = vld [vmem:[%s3308_s17 + $0x178] sm:$0x3f] }
  0x7b   : > { %v1298_v63 = vadd.f32 %v1141_v51, %v952_v59  ;;  %435 = vperm.xlu0 %3222, %v210_v58  }
  0x7c   : > { %v281_v5 = vpop.permute.xlu2 %280  ;;  %v3486_v35 = vadd.f32 %v1142_v26, %v951_v21 }
  0x7d   : > { %v549_v6 = vmul.f32 %v3354_v41, %v281_v5  ;;  %v3419_v7 = vmul.f32 %v3359_v42, %v281_v5  ;;  %v3422_v8 = vmul.f32 %v3364_v43, %v281_v5  ;;  %v1378_v9 = vmul.f32 %v3398_v60, %v281_v5 }
  0x7e   : > { %v3427_v11 = vmul.f32 %v3376_v49, %v281_v5  ;;  %v3430_v12 = vmul.f32 %v3383_v54, %v281_v5  ;;  %v3491_v38 = vmul.f32 %v3444_v24, %v281_v5  ;;  %v3494_v39 = vmul.f32 %v3449_v25, %v281_v5 }
  0x7f   : > { %v6100_v16 = vrot.slane %v3419_v7, 1  ;;  %v6093_v17 = vrot.slane %v3422_v8, 2  ;;  %v1438_v18 = vadd.f32 %v1378_v9, %v1298_v63  ;;  %v3504_v47 = vmul.f32 %v3459_v28, %v281_v5 }
  0x80   : > { %v6099_v22 = vrot.slane %v3427_v11, 1  ;;  %v6092_v23 = vrot.slane %v3430_v12, 2 }
  0x81   : > { %v955_v27 = vadd.f32 %v6100_v16, %v549_v6 }
  0x82   : > { %v1783_v29 = vadd.f32 %v6099_v22, %v1438_v18  ;;  %460 = vperm.xlu2 %3224, %v215_v13   ;;  %455 = vperm.xlu1 %3223, %v214_v19   ;;  %v217_v19 = vld [vmem:[%s3308_s17 + $0x170] sm:$0xff] }
  0x83   : > { %v1301_v31 = vadd.f32 %v6093_v17, %v955_v27  ;;  %450 = vperm.xlu0 %3222, %v213_v20   ;;  %v216_v20 = vld [vmem:[%s3308_s17 + $0x168] sm:$0xff] }
  0x84   : > { %v2128_v36 = vadd.f32 %v6092_v23, %v1783_v29  ;;  %v296_v37 = vpop.permute.xlu2 %295  ;;  %v251_v53 = vpop.permute.xlu1 %250 }
  0x85   : > { %v3497_v40 = vmul.f32 %v3359_v42, %v296_v37  ;;  %v3500_v45 = vmul.f32 %v3364_v43, %v296_v37  ;;  %v1381_v46 = vmul.f32 %v3398_v60, %v296_v37  ;;  %v552_v48 = vmul.f32 %v3354_v41, %v296_v37  ;;  %v241_v18 = vpop.permute.xlu0 %240 }
  0x86   : > { %v3508_v50 = vmul.f32 %v3376_v49, %v296_v37  ;;  %v2208_v51 = vmul.f32 %v3444_v24, %v296_v37  ;;  %v3512_v52 = vmul.f32 %v3449_v25, %v296_v37  ;;  %v3516_v63 = vmul.f32 %v3383_v54, %v296_v37 }
  0x87   : > { %v6091_v58 = vrot.slane %v3497_v40, 1  ;;  %v1441_v59 = vadd.f32 %v1381_v46, %v1301_v31  ;;  %v3519_v1 = vmul.f32 %v3459_v28, %v296_v37  ;;  %v6095_v26 = vrot.slane %v3500_v45, 2  ;;  %v3538_v31 = vld [vmem:[%s6089_s2] ss:$0 sm:$0xff] }
  0x88   : > { %v6097_v5 = vrot.slane %v3508_v50, 1  ;;  %v2268_v6 = vadd.f32 %v2208_v51, %v2128_v36  ;;  %v6094_v9 = vrot.slane %v3512_v52, 1  ;;  %v3533_v29 = vmul.f32 %v3359_v42, %v251_v53 }
  0x89   : > { %v958_v21 = vadd.f32 %v6091_v58, %v552_v48  ;;  %v6096_v46 = vrot.slane %v3519_v1, 2  ;;  %v3546_v48 = vmul.f32 %v3364_v43, %v251_v53  ;;  %v6098_v51 = vrot.slane %v3516_v63, 2 }
  0x8a   : > { %v1786_v36 = vadd.f32 %v6097_v5, %v1441_v59  ;;  %v2613_v37 = vadd.f32 %v6094_v9, %v2268_v6  ;;  %475 = vperm.xlu2 %3224, %v218_v4   ;;  %v543_v58 = vmul.f32 %v3354_v41, %v251_v53  ;;  %v6103_v23 = vrot.slane %v3533_v29, 1  ;;  %470 = vperm.xlu1 %3223, %v217_v19  }
  0x8b   : > { %v3552_v17 = vmul.f32 %v3359_v42, %v241_v18  ;;  %465 = vperm.xlu0 %3222, %v216_v20   ;;  %v1304_v59 = vadd.f32 %v6095_v26, %v958_v21  ;;  %v3559_v9 = vmul.f32 %v3354_v41, %v241_v18  ;;  %v3562_v4 = vmul.f32 %v3364_v43, %v241_v18 }
  0x8c   : > { %v2958_v6 = vadd.f32 %v6096_v46, %v2613_v37  ;;  %v311_v53 = vpop.permute.xlu2 %310  ;;  %v2131_v19 = vadd.f32 %v6098_v51, %v1786_v36  ;;  %v949_v20 = vadd.f32 %v6103_v23, %v543_v58  ;;  %v6104_v21 = vrot.slane %v3546_v48, 2 }
  0x8d   : > { %v3577_v26 = vmul.f32 %v3359_v42, %v311_v53  ;;  %v3580_v46 = vmul.f32 %v3364_v43, %v311_v53  ;;  %v1384_v5 = vmul.f32 %v3398_v60, %v311_v53  ;;  %v555_v58 = vmul.f32 %v3354_v41, %v311_v53 }
  0x8e   : > { %v3022_v18 = vadd.f32 %v3538_v31, %v2958_v6  ;;  %v1295_v36 = vadd.f32 %v6104_v21, %v949_v20  ;;  %v3587_v51 = vmul.f32 %v3376_v49, %v311_v53  ;;  %v2211_v22 = vmul.f32 %v3444_v24, %v311_v53  ;;  %v221_v6 = vld [vmem:[%s3308_s17 + $0x190] sm:$0x3f]  ;;  %v256_v20 = vpop.permute.xlu1 %255  ;;  %v220_v21 = vld [vmem:[%s3308_s17 + $0x188] sm:$0xff] }
  0x8f   : > { %6229 = vst [vmem:[#allocation2_spill] sm:$0xff] %v3580_v46  ;;  %v6108_v16 = vrot.slane %v3577_v26, 1  ;;  %v1444_v10 = vadd.f32 %v1384_v5, %v1304_v59  ;;  %v3595_v3 = vmul.f32 %v3383_v54, %v311_v53  ;;  %v3598_v23 = vmul.f32 %v3449_v25, %v311_v53 }
  0x90   : > { %3084 = vst.msk [vmem:[%s3567_s15 + $0x28] sm:$0xf] %vm3080_vm2, %v3022_v18  ;;  %v1435_v37 = vadd.f32 %v3470_v32, %v1295_v36  ;;  %v1133_v27 = vrot.slane %v3562_v4, 2  ;;  %v6109_v13 = vrot.slane %v3587_v51, 1  ;;  %v2271_v2 = vadd.f32 %v2211_v22, %v2131_v19 }
  0x91   : > { %6230 = vst [vmem:[#allocation3_spill] sm:$0xff] %v3595_v3  ;;  %v961_v18 = vadd.f32 %v6108_v16, %v555_v58  ;;  %v6111_v5 = vrot.slane %v3580_v46, 2  ;;  %v6110_v59 = vrot.slane %v3598_v23, 1  ;;  %v3610_v15 = vmul.f32 %v3459_v28, %v311_v53  ;;  %v246_v16 = vpop.permute.xlu0 %245 }
  0x92   : > { %490 = vperm.xlu2 %3224, %v221_v6   ;;  %v1780_v32 = vadd.f32 %v1621_v14, %v1435_v37  ;;  %v1789_v4 = vadd.f32 %v6109_v13, %v1444_v10  ;;  %v669_v22 = vmul.f32 %v3359_v42, %v256_v20  ;;  %v1015_v19 = vmul.f32 %v3364_v43, %v256_v20 }
  0x93   : > { %485 = vperm.xlu1 %3223, %v220_v21   ;;  %v2616_v58 = vadd.f32 %v6110_v59, %v2271_v2  ;;  %v6112_v53 = vrot.slane %v3610_v15, 2  ;;  %v544_v6 = vmul.f32 %v3354_v41, %v256_v20  ;;  %480 = vperm.xlu0 %3222, %v219_v55   ;;  %v1307_v10 = vadd.f32 %v6111_v5, %v961_v18 }
  0x94   : > { %v2125_v14 = vadd.f32 %v6231_v62, %v1780_v32  ;;  %v792_v37 = vrot.slane %v669_v22, 1  ;;  %v1138_v21 = vrot.slane %v1015_v19, 2  ;;  %v1373_v2 = vmul.f32 %v3398_v60, %v256_v20 }
  0x95   : > { %v2961_v13 = vadd.f32 %v6112_v53, %v2616_v58  ;;  %v1498_v59 = vmul.f32 %v3376_v49, %v256_v20  ;;  %v1843_v36 = vmul.f32 %v3383_v54, %v256_v20  ;;  %v6232_v0 = vrot.slane %v3595_v3, 2  ;;  %v326_v58 = vpop.permute.xlu2 %325  ;;  %v223_v3 = vld [vmem:[%s3308_s17 + $0x1a0] sm:$0xff] }
  0x96   : > { %v2265_v55 = vadd.f32 %v3491_v38, %v2125_v14  ;;  %v6233_v32 = vrot.slane %v3368_v44, 1  ;;  %v667_v19 = vmul.f32 %v3359_v42, %v246_v16  ;;  %v6234_v53 = vrot.slane %v3388_v56, 2  ;;  %v224_v14 = vld [vmem:[%s3308_s17 + $0x1a8] sm:$0x3f] }
  0x97   : > { %v2134_v18 = vadd.f32 %v6232_v0, %v1789_v4  ;;  %v3025_v62 = vadd.f32 %v3538_v31, %v2961_v13  ;;  %v542_v38 = vmul.f32 %v3354_v41, %v246_v16  ;;  %v6235_v4 = vrot.slane %v3494_v39, 1 }
  0x98   : > { %v794_v22 = vsel %vm786_vm0, %v792_v37, %v6233_v32  ;;  %v1140_v20 = vsel %vm1132_vm1, %v1138_v21, %v6234_v53  ;;  %v1618_v44 = vrot.slane %v1498_v59, 1  ;;  %v788_v46 = vrot.slane %v667_v19, 1  ;;  %v222_v32 = vld [vmem:[%s3308_s17 + $0x198] sm:$0xff] }
  0x99   : > { %v950_v5 = vadd.f32 %v794_v22, %v544_v6  ;;  %v2610_v0 = vadd.f32 %v6235_v4, %v2265_v55  ;;  %v1013_v37 = vmul.f32 %v3364_v43, %v246_v16  ;;  %3087 = vst.msk [vmem:[%s3567_s15 + $0x40] sm:$0xf] %vm3080_vm2, %v3025_v62  ;;  %v1963_v6 = vrot.slane %v1843_v36, 2 }
  0x9a   : > { %v558_v56 = vmul.f32 %v3354_v41, %v326_v58  ;;  %v3656_v53 = vmul.f32 %v3359_v42, %v326_v58  ;;  %v6236_v21 = vrot.slane %v3504_v47, 2  ;;  %v6237_v55 = vrot.slane %v3552_v17, 1  ;;  %505 = vperm.xlu2 %3224, %v224_v14  }
  0x9b   : > { %v3652_v13 = vadd.f32 %v1140_v20, %v950_v5  ;;  %v6238_v16 = vrot.slane %v3533_v29, 1  ;;  %v1134_v62 = vrot.slane %v1013_v37, 2  ;;  %500 = vperm.xlu1 %3223, %v223_v3   ;;  %v3669_v4 = vmul.f32 %v3364_v43, %v326_v58  ;;  %495 = vperm.xlu0 %3222, %v222_v32  }
  0x9c   : > { %v2955_v22 = vadd.f32 %v6236_v21, %v2610_v0  ;;  %v789_v59 = vsel %vm786_vm0, %v6237_v55, %v788_v46  ;;  %v6120_v20 = vrot.slane %v3656_v53, 1  ;;  %v6239_v29 = vrot.slane %v3546_v48, 2 }
  0x9d   : > { %v791_v19 = vsel %vm786_vm0, %v788_v46, %v6238_v16  ;;  %v947_v5 = vadd.f32 %v789_v59, %v3559_v9  ;;  %v1135_v0 = vsel %vm1132_vm1, %v1133_v27, %v1134_v62  ;;  %v1387_v14 = vmul.f32 %v3398_v60, %v326_v58 }
  0x9e   : > { %v948_v36 = vadd.f32 %v791_v19, %v542_v38  ;;  %v3019_v17 = vadd.f32 %v3538_v31, %v2955_v22  ;;  %v1137_v46 = vsel %vm1132_vm1, %v1134_v62, %v6239_v29  ;;  %v6240_v3 = vrot.slane %v3392_v57, 1 }
  0x9f   : > { %v1293_v38 = vadd.f32 %v1135_v0, %v947_v5  ;;  %v964_v21 = vadd.f32 %v6120_v20, %v558_v56  ;;  %v1447_v32 = vadd.f32 %v1387_v14, %v1307_v10  ;;  %v3685_v27 = vmul.f32 %v3376_v49, %v326_v58  ;;  %v276_v56 = vpop.permute.xlu1 %275 }
  0xa0   : > { %v1620_v9 = vsel %vm786_vm0, %v1618_v44, %v6240_v3  ;;  %v1294_v37 = vadd.f32 %v1137_v46, %v948_v36  ;;  %3081 = vst.msk [vmem:[%s3567_s15 + $0x10] sm:$0xf] %vm3080_vm2, %v3019_v17  ;;  %v3688_v48 = vmul.f32 %v3383_v54, %v326_v58  ;;  %v2214_v22 = vmul.f32 %v3444_v24, %v326_v58 }
  0xa1   : > { %v1433_v55 = vadd.f32 %v1373_v2, %v1293_v38  ;;  %v6116_v44 = vrot.slane %v3669_v4, 2  ;;  %v3694_v59 = vmul.f32 %v3449_v25, %v326_v58  ;;  %v6241_v16 = vrot.slane %v3402_v61, 2 }
  0xa2   : > { %v1434_v57 = vadd.f32 %v3465_v30, %v1294_v37  ;;  %v6119_v19 = vrot.slane %v3685_v27, 1  ;;  %v2274_v62 = vadd.f32 %v2214_v22, %v2134_v18  ;;  %v3701_v5 = vmul.f32 %v3459_v28, %v326_v58 }
  0xa3   : > { %v1965_v10 = vsel %vm1132_vm1, %v1963_v6, %v6241_v16  ;;  %v1778_v36 = vadd.f32 %v1620_v9, %v1433_v55  ;;  %v3706_v30 = vadd.f32 %v6116_v44, %v964_v21  ;;  %v6118_v17 = vrot.slane %v3694_v59, 1  ;;  %v225_v44 = vld [vmem:[%s3308_s17 + $0x1b0] sm:$0xff] }
  0xa4   : > { %v1779_v2 = vadd.f32 %v3477_v33, %v1434_v57  ;;  %v1792_v61 = vadd.f32 %v6119_v19, %v1447_v32  ;;  %v6115_v6 = vrot.slane %v3688_v48, 2  ;;  %v6117_v0 = vrot.slane %v3701_v5, 2  ;;  %510 = vperm.xlu0 %3222, %v225_v44  }
  0xa5   : > { %v673_v18 = vmul.f32 %v3359_v42, %v276_v56  ;;  %v2619_v33 = vadd.f32 %v6118_v17, %v2274_v62  ;;  %v3718_v29 = vmul.f32 %v3364_v43, %v276_v56  ;;  %v1377_v46 = vmul.f32 %v3398_v60, %v276_v56  ;;  %v271_v62 = vpop.permute.xlu0 %270 }
  0xa6   : > { %v2124_v58 = vadd.f32 %v3484_v34, %v1779_v2  ;;  %v2123_v14 = vadd.f32 %v1965_v10, %v1778_v36  ;;  %v548_v3 = vmul.f32 %v3354_v41, %v276_v56  ;;  %v1502_v38 = vmul.f32 %v3376_v49, %v276_v56 }
  0xa7   : > { %v798_v9 = vrot.slane %v673_v18, 1  ;;  %v3725_v37 = vadd.f32 %v6115_v6, %v1792_v61  ;;  %v2964_v34 = vadd.f32 %v6117_v0, %v2619_v33  ;;  %v3730_v21 = vmul.f32 %v3383_v54, %v276_v56  ;;  %v227_v33 = vld [vmem:[%s3308_s17 + $0x1c0] sm:$0x3f]  ;;  %v226_v6 = vld [vmem:[%s3308_s17 + $0x1b8] sm:$0xff] }
  0xa8   : > { %v2204_v32 = vmul.f32 %v3444_v24, %v276_v56  ;;  %v6242_v22 = vrot.slane %v3419_v7, 1  ;;  %v1624_v57 = vrot.slane %v1502_v38, 1  ;;  %v2329_v16 = vmul.f32 %v3449_v25, %v276_v56  ;;  %520 = vperm.xlu2 %3224, %v227_v33   ;;  %515 = vperm.xlu1 %3223, %v226_v6  }
  0xa9   : > { %v2674_v10 = vmul.f32 %v3459_v28, %v276_v56  ;;  %v3028_v36 = vadd.f32 %v3538_v31, %v2964_v34  ;;  %v1437_v61 = vadd.f32 %v1377_v46, %v3486_v35  ;;  %v672_v34 = vmul.f32 %v3359_v42, %v271_v62 }
  0xaa   : > { %v801_v55 = vsel %vm786_vm0, %v798_v9, %v6242_v22  ;;  %v2264_v18 = vadd.f32 %v2204_v32, %v2124_v58  ;;  %v6243_v22 = vrot.slane %v3427_v11, 1  ;;  %v2449_v0 = vrot.slane %v2329_v16, 1 }
  0xab   : > { %v954_v7 = vadd.f32 %v801_v55, %v548_v3  ;;  %v2794_v17 = vrot.slane %v2674_v10, 2  ;;  %3090 = vst.msk [vmem:[%s3567_s15 + $0x58] sm:$0xf] %vm3080_vm2, %v3028_v36  ;;  %v3752_v35 = vmul.f32 %v3364_v43, %v271_v62  ;;  %v1376_v58 = vmul.f32 %v3398_v60, %v271_v62 }
  0xac   : > { %v1627_v38 = vsel %vm786_vm0, %v1624_v57, %v6243_v22  ;;  %v6244_v46 = vrot.slane %v3494_v39, 1  ;;  %v547_v3 = vmul.f32 %v3354_v41, %v271_v62  ;;  %v1501_v32 = vmul.f32 %v3376_v49, %v271_v62  ;;  %v341_v22 = vpop.permute.xlu2 %340 }
  0xad   : > { %v3761_v6 = vmul.f32 %v3383_v54, %v271_v62  ;;  %v1782_v55 = vadd.f32 %v1627_v38, %v1437_v61  ;;  %v6245_v10 = vrot.slane %v3504_v47, 2  ;;  %v797_v33 = vrot.slane %v672_v34, 1 }
  0xae   : > { %v2452_v11 = vsel %vm786_vm0, %v2449_v0, %v6244_v46  ;;  %v1623_v19 = vrot.slane %v1501_v32, 1  ;;  %v2203_v46 = vmul.f32 %v3444_v24, %v271_v62  ;;  %v2328_v20 = vmul.f32 %v3449_v25, %v271_v62 }
  0xaf   : > { %v2609_v16 = vadd.f32 %v2452_v11, %v2264_v18  ;;  %v2797_v36 = vsel %vm1132_vm1, %v2794_v17, %v6245_v10  ;;  %v1436_v2 = vadd.f32 %v1376_v58, %v3652_v13  ;;  %v2673_v61 = vmul.f32 %v3459_v28, %v271_v62 }
  0xb0   : > { %v799_v47 = vsel %vm786_vm0, %v797_v33, %v798_v9  ;;  %v2263_v18 = vadd.f32 %v2203_v46, %v2123_v14  ;;  %v2448_v38 = vrot.slane %v2328_v20, 1  ;;  %v561_v34 = vmul.f32 %v3354_v41, %v341_v22 }
  0xb1   : > { %v2954_v56 = vadd.f32 %v2797_v36, %v2609_v16  ;;  %v1625_v32 = vsel %vm786_vm0, %v1623_v19, %v1624_v57  ;;  %v2793_v10 = vrot.slane %v2673_v61, 2  ;;  %v3777_v16 = vmul.f32 %v3359_v42, %v341_v22 }
  0xb2   : > { %v2450_v13 = vsel %vm786_vm0, %v2448_v38, %v2449_v0  ;;  %v3781_v58 = vmul.f32 %v3364_v43, %v341_v22  ;;  %v1390_v62 = vmul.f32 %v3398_v60, %v341_v22  ;;  %v3785_v14 = vmul.f32 %v3376_v49, %v341_v22 }
  0xb3   : > { %v3018_v11 = vadd.f32 %v3538_v31, %v2954_v56  ;;  %v953_v20 = vadd.f32 %v799_v47, %v547_v3  ;;  %v2608_v9 = vadd.f32 %v2450_v13, %v2263_v18  ;;  %v2795_v19 = vsel %vm1132_vm1, %v2793_v10, %v2794_v17 }
  0xb4   : > { %v6125_v57 = vrot.slane %v3777_v16, 1  ;;  %v1450_v56 = vadd.f32 %v1390_v62, %v3706_v30  ;;  %v6123_v0 = vrot.slane %v3785_v14, 1  ;;  %v3794_v36 = vmul.f32 %v3383_v54, %v341_v22 }
  0xb5   : > { %3079 = vst.msk [vmem:[%s3567_s15 + $0x8] sm:$0xff] %vm3077_vm3, %v3018_v11  ;;  %v2217_v33 = vmul.f32 %v3444_v24, %v341_v22  ;;  %v1781_v46 = vadd.f32 %v1625_v32, %v1436_v2  ;;  %v2953_v61 = vadd.f32 %v2795_v19, %v2608_v9  ;;  %v3800_v47 = vmul.f32 %v3449_v25, %v341_v22  ;;  %v291_v32 = vpop.permute.xlu1 %290 }
  0xb6   : > { %v967_v3 = vadd.f32 %v6125_v57, %v561_v34  ;;  %v6121_v17 = vrot.slane %v3781_v58, 2  ;;  %v3805_v18 = vmul.f32 %v3459_v28, %v341_v22  ;;  %v6246_v38 = vrot.slane %v3422_v8, 2 }
  0xb7   : > { %v2277_v30 = vadd.f32 %v2217_v33, %v3725_v37  ;;  %v6247_v11 = vrot.slane %v3718_v29, 2  ;;  %v3017_v10 = vadd.f32 %v3538_v31, %v2953_v61  ;;  %v1795_v34 = vadd.f32 %v6123_v0, %v1450_v56 }
  0xb8   : > { %v6122_v13 = vrot.slane %v3800_v47, 1  ;;  %v3818_v37 = vadd.f32 %v6121_v17, %v967_v3  ;;  %v6124_v22 = vrot.slane %v3794_v36, 2  ;;  %v6126_v8 = vrot.slane %v3805_v18, 2 }
  0xb9   : > { %v1147_v2 = vsel %vm1132_vm1, %v6247_v11, %v6246_v38  ;;  %v6248_v9 = vrot.slane %v3430_v12, 2  ;;  %v6249_v19 = vrot.slane %v3730_v21, 2  ;;  %3078 = vst.msk [vmem:[%s3567_s15] sm:$0xff] %vm3077_vm3, %v3017_v10  ;;  %v676_v61 = vmul.f32 %v3359_v42, %v291_v32 }
  0xba   : > { %v1300_v62 = vadd.f32 %v1147_v2, %v954_v7  ;;  %v2622_v56 = vadd.f32 %v6122_v13, %v2277_v30  ;;  %v3833_v3 = vmul.f32 %v3364_v43, %v291_v32  ;;  %v1380_v38 = vmul.f32 %v3398_v60, %v291_v32 }
  0xbb   : > { %v1972_v33 = vsel %vm1132_vm1, %v6249_v19, %v6248_v9  ;;  %v1505_v11 = vmul.f32 %v3376_v49, %v291_v32  ;;  %v3838_v12 = vmul.f32 %v3383_v54, %v291_v32  ;;  %v2207_v2 = vmul.f32 %v3444_v24, %v291_v32 }
  0xbc   : > { %v2127_v7 = vadd.f32 %v1972_v33, %v1782_v55  ;;  %v3843_v10 = vadd.f32 %v6124_v22, %v1795_v34  ;;  %v2967_v55 = vadd.f32 %v6126_v8, %v2622_v56  ;;  %v803_v30 = vrot.slane %v676_v61, 1  ;;  %v286_v56 = vpop.permute.xlu0 %285 }
  0xbd   : > { %v2332_v9 = vmul.f32 %v3449_v25, %v291_v32  ;;  %v551_v19 = vmul.f32 %v3354_v41, %v291_v32  ;;  %v1440_v33 = vadd.f32 %v1380_v38, %v1300_v62  ;;  %v1629_v17 = vrot.slane %v1505_v11, 1 }
  0xbe   : > { %v2267_v13 = vadd.f32 %v2207_v2, %v2127_v7  ;;  %v3031_v0 = vadd.f32 %v3538_v31, %v2967_v55  ;;  %v2677_v57 = vmul.f32 %v3459_v28, %v291_v32  ;;  %v6250_v61 = vrot.slane %v3497_v40, 1  ;;  %v230_v2 = vld [vmem:[%s3308_s17 + $0x1d8] sm:$0x3f]  ;;  %v229_v55 = vld [vmem:[%s3308_s17 + $0x1d0] sm:$0xff]  ;;  %v228_v32 = vld [vmem:[%s3308_s17 + $0x1c8] sm:$0xff] }
  0xbf   : > { %v2454_v22 = vrot.slane %v2332_v9, 1  ;;  %v6251_v44 = vrot.slane %v3508_v50, 1  ;;  %v6252_v7 = vrot.slane %v3718_v29, 2  ;;  %v6253_v38 = vrot.slane %v3752_v35, 2  ;;  %535 = vperm.xlu2 %3224, %v230_v2   ;;  %530 = vperm.xlu1 %3223, %v229_v55   ;;  %v356_v55 = vpop.permute.xlu2 %355 }
  0xc0   : > { %v806_v8 = vsel %vm786_vm0, %v803_v30, %v6250_v61  ;;  %3093 = vst.msk [vmem:[%s3567_s15 + $0x70] sm:$0xf] %vm3080_vm2, %v3031_v0  ;;  %v6254_v9 = vrot.slane %v3512_v52, 1  ;;  %v6255_v61 = vrot.slane %v3730_v21, 2  ;;  %v6256_v29 = vrot.slane %v3761_v6, 2  ;;  %525 = vperm.xlu0 %3222, %v228_v32  }
  0xc1   : > { %v1632_v39 = vsel %vm786_vm0, %v1629_v17, %v6251_v44  ;;  %v1145_v11 = vsel %vm1132_vm1, %v6253_v38, %v6252_v7  ;;  %v2799_v44 = vrot.slane %v2677_v57, 2  ;;  %v675_v34 = vmul.f32 %v3359_v42, %v286_v56 }
  0xc2   : > { %v3869_v40 = vadd.f32 %v1632_v39, %v1440_v33  ;;  %v2457_v50 = vsel %vm786_vm0, %v2454_v22, %v6254_v9  ;;  %v1970_v35 = vsel %vm1132_vm1, %v6256_v29, %v6255_v61  ;;  %v1299_v38 = vadd.f32 %v1145_v11, %v953_v20 }
  0xc3   : > { %v2612_v7 = vadd.f32 %v2457_v50, %v2267_v13  ;;  %v2126_v62 = vadd.f32 %v1970_v35, %v1781_v46  ;;  %v6257_v39 = vrot.slane %v3519_v1, 2  ;;  %v3884_v0 = vmul.f32 %v3364_v43, %v286_v56 }
  0xc4   : > { %v1379_v21 = vmul.f32 %v3398_v60, %v286_v56  ;;  %v1504_v6 = vmul.f32 %v3376_v49, %v286_v56  ;;  %v802_v33 = vrot.slane %v675_v34, 1  ;;  %v3889_v20 = vmul.f32 %v3383_v54, %v286_v56 }
  0xc5   : > { %v2802_v52 = vsel %vm1132_vm1, %v2799_v44, %v6257_v39  ;;  %v2206_v46 = vmul.f32 %v3444_v24, %v286_v56  ;;  %v957_v13 = vadd.f32 %v806_v8, %v551_v19  ;;  %v550_v1 = vmul.f32 %v3354_v41, %v286_v56 }
  0xc6   : > { %v2957_v57 = vadd.f32 %v2802_v52, %v2612_v7  ;;  %v1628_v11 = vrot.slane %v1504_v6, 1  ;;  %v2331_v2 = vmul.f32 %v3449_v25, %v286_v56  ;;  %v804_v50 = vsel %vm786_vm0, %v802_v33, %v803_v30 }
  0xc7   : > { %v2266_v34 = vadd.f32 %v2206_v46, %v2126_v62  ;;  %v1439_v61 = vadd.f32 %v1379_v21, %v1299_v38  ;;  %v2676_v7 = vmul.f32 %v3459_v28, %v286_v56  ;;  %v3901_v8 = vadd.f32 %v804_v50, %v550_v1 }
  0xc8   : > { %v3021_v9 = vadd.f32 %v3538_v31, %v2957_v57  ;;  %v2453_v35 = vrot.slane %v2331_v2, 1  ;;  %v1630_v19 = vsel %vm786_vm0, %v1628_v11, %v1629_v17  ;;  %v3905_v39 = vmul.f32 %v3359_v42, %v356_v55 }
  0xc9   : > { %v3908_v30 = vmul.f32 %v3364_v43, %v356_v55  ;;  %v2798_v38 = vrot.slane %v2676_v7, 2  ;;  %v1393_v52 = vmul.f32 %v3398_v60, %v356_v55  ;;  %v3913_v21 = vmul.f32 %v3376_v49, %v356_v55 }
  0xca   : > { %3083 = vst.msk [vmem:[%s3567_s15 + $0x20] sm:$0xff] %vm3077_vm3, %v3021_v9  ;;  %v2455_v62 = vsel %vm786_vm0, %v2453_v35, %v2454_v22  ;;  %v564_v6 = vmul.f32 %v3354_v41, %v356_v55  ;;  %v6131_v57 = vrot.slane %v3905_v39, 1  ;;  %v3918_v17 = vmul.f32 %v3383_v54, %v356_v55 }
  0xcb   : > { %v2611_v56 = vadd.f32 %v2455_v62, %v2266_v34  ;;  %v2800_v33 = vsel %vm1132_vm1, %v2798_v38, %v2799_v44  ;;  %v1453_v46 = vadd.f32 %v1393_v52, %v3818_v37  ;;  %v6129_v22 = vrot.slane %v3913_v21, 1 }
  0xcc   : > { %v2220_v1 = vmul.f32 %v3444_v24, %v356_v55  ;;  %v1784_v11 = vadd.f32 %v1630_v19, %v1439_v61  ;;  %v970_v9 = vadd.f32 %v6131_v57, %v564_v6  ;;  %v3927_v50 = vmul.f32 %v3449_v25, %v356_v55  ;;  %v306_v19 = vpop.permute.xlu1 %305 }
  0xcd   : > { %v2956_v2 = vadd.f32 %v2800_v33, %v2611_v56  ;;  %v6127_v34 = vrot.slane %v3908_v30, 2  ;;  %v3932_v44 = vmul.f32 %v3459_v28, %v356_v55  ;;  %v6258_v37 = vrot.slane %v3500_v45, 2 }
  0xce   : > { %v2280_v35 = vadd.f32 %v2220_v1, %v3843_v10  ;;  %v6259_v7 = vrot.slane %v3833_v3, 2  ;;  %v1798_v38 = vadd.f32 %v6129_v22, %v1453_v46  ;;  %v6128_v52 = vrot.slane %v3927_v50, 1 }
  0xcf   : > { %v3020_v62 = vadd.f32 %v3538_v31, %v2956_v2  ;;  %v3945_v10 = vadd.f32 %v6127_v34, %v970_v9  ;;  %v6130_v55 = vrot.slane %v3918_v17, 2  ;;  %v6132_v45 = vrot.slane %v3932_v44, 2 }
  0xd0   : > { %v1152_v61 = vsel %vm1132_vm1, %v6259_v7, %v6258_v37  ;;  %v6260_v6 = vrot.slane %v3516_v63, 2  ;;  %v6261_v33 = vrot.slane %v3838_v12, 2  ;;  %v2625_v46 = vadd.f32 %v6128_v52, %v2280_v35 }
  0xd1   : > { %v1303_v56 = vadd.f32 %v1152_v61, %v957_v13  ;;  %3082 = vst.msk [vmem:[%s3567_s15 + $0x18] sm:$0xff] %vm3077_vm3, %v3020_v62  ;;  %v679_v2 = vmul.f32 %v3359_v42, %v306_v19  ;;  %v3961_v9 = vmul.f32 %v3364_v43, %v306_v19  ;;  %v1383_v37 = vmul.f32 %v3398_v60, %v306_v19 }
  0xd2   : > { %v1977_v1 = vsel %vm1132_vm1, %v6261_v33, %v6260_v6  ;;  %v1508_v63 = vmul.f32 %v3376_v49, %v306_v19  ;;  %v3966_v7 = vmul.f32 %v3383_v54, %v306_v19  ;;  %v2210_v61 = vmul.f32 %v3444_v24, %v306_v19 }
  0xd3   : > { %v2130_v13 = vadd.f32 %v1977_v1, %v3869_v40  ;;  %v3971_v62 = vadd.f32 %v6130_v55, %v1798_v38  ;;  %v2970_v40 = vadd.f32 %v6132_v45, %v2625_v46  ;;  %v808_v35 = vrot.slane %v679_v2, 1  ;;  %v301_v46 = vpop.permute.xlu0 %300 }
  0xd4   : > { %v2335_v6 = vmul.f32 %v3449_v25, %v306_v19  ;;  %v554_v33 = vmul.f32 %v3354_v41, %v306_v19  ;;  %v1443_v1 = vadd.f32 %v1383_v37, %v1303_v56  ;;  %v1634_v34 = vrot.slane %v1508_v63, 1 }
  0xd5   : > { %v2270_v52 = vadd.f32 %v2210_v61, %v2130_v13  ;;  %v3034_v22 = vadd.f32 %v3538_v31, %v2970_v40  ;;  %v1154_v38 = vrot.slane %v3961_v9, 2  ;;  %v2680_v57 = vmul.f32 %v3459_v28, %v306_v19  ;;  %v233_v61 = vld [vmem:[%s3308_s17 + $0x1f0] sm:$0x3f]  ;;  %v232_v40 = vld [vmem:[%s3308_s17 + $0x1e8] sm:$0xff]  ;;  %v231_v19 = vld [vmem:[%s3308_s17 + $0x1e0] sm:$0xff] }
  0xd6   : > { %v2459_v55 = vrot.slane %v2335_v6, 1  ;;  %v6262_v2 = vrot.slane %v3577_v26, 1  ;;  %v6263_v29 = vrot.slane %v3587_v51, 1  ;;  %v6264_v13 = vrot.slane %v3833_v3, 2  ;;  %1367 = vperm.xlu2 %3224, %v233_v61   ;;  %1362 = vperm.xlu1 %3223, %v232_v40  }
  0xd7   : > { %v6265_v37 = vrot.slane %v3884_v0, 2  ;;  %3096 = vst.msk [vmem:[%s3567_s15 + $0x88] sm:$0xf] %vm3080_vm2, %v3034_v22  ;;  %v6266_v6 = vrot.slane %v3598_v23, 1  ;;  %v6268_v3 = vrot.slane %v3889_v20, 2  ;;  %v678_v22 = vmul.f32 %v3359_v42, %v301_v46  ;;  %1357 = vperm.xlu0 %3222, %v231_v19  }
  0xd8   : > { %v811_v45 = vsel %vm786_vm0, %v808_v35, %v6262_v2  ;;  %v1637_v32 = vsel %vm786_vm0, %v1634_v34, %v6263_v29  ;;  %v2804_v29 = vrot.slane %v2680_v57, 2  ;;  %v6267_v2 = vrot.slane %v3838_v12, 2 }
  0xd9   : > { %v1150_v63 = vsel %vm1132_vm1, %v6265_v37, %v6264_v13  ;;  %v3997_v26 = vadd.f32 %v1637_v32, %v1443_v1  ;;  %v2462_v51 = vsel %vm786_vm0, %v2459_v55, %v6266_v6  ;;  %v6269_v32 = vrot.slane %v3610_v15, 2  ;;  %v371_v6 = vpop.permute.xlu2 %370 }
  0xda   : > { %v1975_v0 = vsel %vm1132_vm1, %v6268_v3, %v6267_v2  ;;  %v2615_v13 = vadd.f32 %v2462_v51, %v2270_v52  ;;  %v1302_v37 = vadd.f32 %v1150_v63, %v3901_v8  ;;  %v4013_v57 = vmul.f32 %v3364_v43, %v301_v46 }
  0xdb   : > { %v2129_v56 = vadd.f32 %v1975_v0, %v1784_v11  ;;  %v2807_v23 = vsel %vm1132_vm1, %v2804_v29, %v6269_v32  ;;  %v1382_v12 = vmul.f32 %v3398_v60, %v301_v46  ;;  %v1507_v20 = vmul.f32 %v3376_v49, %v301_v46 }
  0xdc   : > { %v2960_v1 = vadd.f32 %v2807_v23, %v2615_v13  ;;  %v807_v52 = vrot.slane %v678_v22, 1  ;;  %v4018_v8 = vmul.f32 %v3383_v54, %v301_v46  ;;  %v2209_v11 = vmul.f32 %v3444_v24, %v301_v46 }
  0xdd   : > { %v960_v63 = vadd.f32 %v811_v45, %v554_v33  ;;  %v553_v15 = vmul.f32 %v3354_v41, %v301_v46  ;;  %v1633_v61 = vrot.slane %v1507_v20, 1  ;;  %v2334_v40 = vmul.f32 %v3449_v25, %v301_v46 }
  0xde   : > { %v3024_v51 = vadd.f32 %v3538_v31, %v2960_v1  ;;  %v809_v2 = vsel %vm786_vm0, %v807_v52, %v808_v35  ;;  %v2269_v3 = vadd.f32 %v2209_v11, %v2129_v56  ;;  %v1442_v0 = vadd.f32 %v1382_v12, %v1302_v37 }
  0xdf   : > { %v2458_v22 = vrot.slane %v2334_v40, 1  ;;  %v2679_v32 = vmul.f32 %v3459_v28, %v301_v46  ;;  %v4030_v45 = vadd.f32 %v809_v2, %v553_v15  ;;  %v1635_v33 = vsel %vm786_vm0, %v1633_v61, %v1634_v34 }
  0xe0   : > { %3086 = vst.msk [vmem:[%s3567_s15 + $0x38] sm:$0xff] %vm3077_vm3, %v3024_v51  ;;  %v4034_v23 = vmul.f32 %v3359_v42, %v371_v6  ;;  %v4037_v35 = vmul.f32 %v3364_v43, %v371_v6  ;;  %v1396_v12 = vmul.f32 %v3398_v60, %v371_v6  ;;  %v4042_v20 = vmul.f32 %v3376_v49, %v371_v6 }
  0xe1   : > { %v2460_v56 = vsel %vm786_vm0, %v2458_v22, %v2459_v55  ;;  %v2803_v37 = vrot.slane %v2679_v32, 2  ;;  %v567_v1 = vmul.f32 %v3354_v41, %v371_v6  ;;  %v4047_v34 = vmul.f32 %v3383_v54, %v371_v6 }
  0xe2   : > { %v2614_v46 = vadd.f32 %v2460_v56, %v2269_v3  ;;  %v6138_v52 = vrot.slane %v4034_v23, 1  ;;  %v1456_v43 = vadd.f32 %v1396_v12, %v3945_v10  ;;  %v6137_v55 = vrot.slane %v4042_v20, 1  ;;  %v321_v3 = vpop.permute.xlu1 %320 }
  0xe3   : > { %v2805_v42 = vsel %vm1132_vm1, %v2803_v37, %v2804_v29  ;;  %v2223_v11 = vmul.f32 %v3444_v24, %v371_v6  ;;  %v1787_v15 = vadd.f32 %v1635_v33, %v1442_v0  ;;  %v4056_v41 = vmul.f32 %v3449_v25, %v371_v6  ;;  %v6270_v33 = vld [vmem:[#allocation2_spill] sm:$0xff] }
  0xe4   : > { %v2959_v61 = vadd.f32 %v2805_v42, %v2614_v46  ;;  %v973_v40 = vadd.f32 %v6138_v52, %v567_v1  ;;  %v6134_v51 = vrot.slane %v4037_v35, 2  ;;  %v6133_v2 = vrot.slane %v4047_v34, 2  ;;  %v6272_v46 = vld [vmem:[#allocation3_spill] sm:$0xff] }
  0xe5   : > { %v2283_v29 = vadd.f32 %v2223_v11, %v3971_v62  ;;  %v4062_v10 = vmul.f32 %v3459_v28, %v371_v6  ;;  %v1801_v22 = vadd.f32 %v6137_v55, %v1456_v43  ;;  %v6136_v32 = vrot.slane %v4056_v41, 1  ;;  %v316_v55 = vpop.permute.xlu0 %315 }
  0xe6   : > { %v3023_v0 = vadd.f32 %v3538_v31, %v2959_v61  ;;  %v6271_v56 = vrot.slane %v6270_v33, 2  ;;  %v4075_v62 = vadd.f32 %v6134_v51, %v973_v40  ;;  %v6273_v1 = vrot.slane %v6272_v46, 2  ;;  %v4091_v40 = vld [vmem:[%s6088_s1 + $0x1] ss:$0 sm:$0xff]  ;;  %v4097_v33 = vld [vmem:[%s6088_s1 + $0x2] ss:$0 sm:$0xff] }
  0xe7   : > { %v6135_v6 = vrot.slane %v4062_v10, 2  ;;  %v6274_v42 = vrot.slane %v3966_v7, 2  ;;  %v2628_v11 = vadd.f32 %v6136_v32, %v2283_v29  ;;  %v4104_v29 = vmul.f32 %v3376_v49, %v321_v3  ;;  %v4120_v49 = vld [vmem:[%s6088_s1] ss:$0 sm:$0xff] }
  0xe8   : > { %v1157_v37 = vsel %vm1132_vm1, %v1154_v38, %v6271_v56  ;;  %3085 = vst.msk [vmem:[%s3567_s15 + $0x30] sm:$0xff] %vm3077_vm3, %v3023_v0  ;;  %v4100_v56 = vmul.f32 %v4097_v33, %v321_v3  ;;  %v1386_v0 = vmul.f32 %v3398_v60, %v321_v3  ;;  %v4112_v46 = vadd.f32 %v6133_v2, %v1801_v22 }
  0xe9   : > { %v1306_v12 = vadd.f32 %v1157_v37, %v960_v63  ;;  %v1982_v43 = vsel %vm1132_vm1, %v6274_v42, %v6273_v1  ;;  %v682_v63 = vmul.f32 %v4091_v40, %v321_v3  ;;  %v2213_v37 = vmul.f32 %v3444_v24, %v321_v3 }
  0xea   : > { %v2133_v61 = vadd.f32 %v1982_v43, %v3997_v26  ;;  %v4107_v26 = vmul.f32 %v3383_v54, %v321_v3  ;;  %v2973_v1 = vadd.f32 %v6135_v6, %v2628_v11  ;;  %v2338_v43 = vmul.f32 %v3449_v25, %v321_v3 }
  0xeb   : > { %v813_v42 = vrot.slane %v682_v63, 1  ;;  %v557_v54 = vmul.f32 %v4120_v49, %v321_v3  ;;  %v1639_v22 = vrot.slane %v4104_v29, 1  ;;  %v6275_v63 = vrot.slane %v3656_v53, 1 }
  0xec   : > { %v2273_v2 = vadd.f32 %v2213_v37, %v2133_v61  ;;  %v3037_v11 = vadd.f32 %v3538_v31, %v2973_v1  ;;  %v2464_v6 = vrot.slane %v2338_v43, 1  ;;  %v2683_v32 = vmul.f32 %v3459_v28, %v321_v3  ;;  %v236_v61 = vld [vmem:[%s3308_s17 + $0x208] sm:$0x3f]  ;;  %v235_v37 = vld [vmem:[%s3308_s17 + $0x200] sm:$0xff]  ;;  %v234_v1 = vld [vmem:[%s3308_s17 + $0x1f8] sm:$0xff] }
  0xed   : > { %v816_v51 = vsel %vm786_vm0, %v813_v42, %v6275_v63  ;;  %v1446_v13 = vadd.f32 %v1386_v0, %v1306_v12  ;;  %v6276_v19 = vrot.slane %v3685_v27, 1  ;;  %v6145_v29 = vrot.slane %v4107_v26, 2  ;;  %2197 = vperm.xlu2 %3224, %v236_v61   ;;  %2192 = vperm.xlu1 %3223, %v235_v37  }
  0xee   : > { %v4130_v52 = vadd.f32 %v816_v51, %v557_v54  ;;  %3099 = vst.msk [vmem:[%s3567_s15 + $0xa0] sm:$0xf] %vm3080_vm2, %v3037_v11  ;;  %v6277_v53 = vrot.slane %v3694_v59, 1  ;;  %v2809_v28 = vrot.slane %v2683_v32, 2  ;;  %v6278_v51 = vrot.slane %v4013_v57, 2  ;;  %2187 = vperm.xlu0 %3222, %v234_v1   ;;  %v386_v1 = vpop.permute.xlu2 %385 }
  0xef   : > { %v1642_v60 = vsel %vm786_vm0, %v1639_v22, %v6276_v19  ;;  %v6279_v19 = vrot.slane %v3966_v7, 2  ;;  %v6280_v3 = vrot.slane %v4018_v8, 2  ;;  %v681_v11 = vmul.f32 %v4091_v40, %v316_v55  ;;  %v4165_v7 = vld [vmem:[%s6088_s1 + $0x3] ss:$0 sm:$0xff]  ;;  %v4177_v32 = vld [vmem:[%s6088_s1 + $0x5] ss:$0 sm:$0xff] }
  0xf0   : > { %v2467_v43 = vsel %vm786_vm0, %v2464_v6, %v6277_v53  ;;  %v1155_v27 = vsel %vm1132_vm1, %v6278_v51, %v1154_v38  ;;  %v6281_v9 = vrot.slane %v3701_v5, 2  ;;  %v4160_v38 = vmul.f32 %v4097_v33, %v316_v55 }
  0xf1   : > { %v1980_v12 = vsel %vm1132_vm1, %v6280_v3, %v6279_v19  ;;  %v2618_v0 = vadd.f32 %v2467_v43, %v2273_v2  ;;  %v1305_v54 = vadd.f32 %v1155_v27, %v4030_v45  ;;  %v1385_v8 = vmul.f32 %v4165_v7, %v316_v55  ;;  %v4171_v45 = vld [vmem:[%s6088_s1 + $0x4] ss:$0 sm:$0xff] }
  0xf2   : > { %v2132_v59 = vadd.f32 %v1980_v12, %v1787_v15  ;;  %v2812_v57 = vsel %vm1132_vm1, %v2809_v28, %v6281_v9  ;;  %v1510_v15 = vmul.f32 %v4171_v45, %v316_v55  ;;  %v812_v2 = vrot.slane %v681_v11, 1  ;;  %v4287_v11 = vld [vmem:[%s6089_s2] ss:$0 sm:$0xff] }
  0xf3   : > { %v2963_v5 = vadd.f32 %v2812_v57, %v2618_v0  ;;  %v4180_v63 = vmul.f32 %v4177_v32, %v316_v55  ;;  %v2212_v61 = vmul.f32 %v3444_v24, %v316_v55  ;;  %v1791_v37 = vadd.f32 %v1642_v60, %v1446_v13  ;;  %v4192_v24 = vld [vmem:[%s6088_s1 + $0x8] ss:$0 sm:$0xff] }
  0xf4   : > { %v556_v53 = vmul.f32 %v4120_v49, %v316_v55  ;;  %v1638_v43 = vrot.slane %v1510_v15, 1  ;;  %v2337_v51 = vmul.f32 %v3449_v25, %v316_v55  ;;  %v814_v19 = vsel %vm786_vm0, %v812_v2, %v813_v42 }
  0xf5   : > { %v3027_v27 = vadd.f32 %v3538_v31, %v2963_v5  ;;  %v2272_v12 = vadd.f32 %v2212_v61, %v2132_v59  ;;  %v1445_v0 = vadd.f32 %v1385_v8, %v1305_v54  ;;  %v2682_v13 = vmul.f32 %v4192_v24, %v316_v55 }
  0xf6   : > { %v2463_v9 = vrot.slane %v2337_v51, 1  ;;  %v4197_v25 = vadd.f32 %v814_v19, %v556_v53  ;;  %v1640_v42 = vsel %vm786_vm0, %v1638_v43, %v1639_v22  ;;  %v4201_v60 = vmul.f32 %v4091_v40, %v386_v1  ;;  %v4222_v43 = vld [vmem:[%s6088_s1 + $0x6] ss:$0 sm:$0xff] }
  0xf7   : > { %3089 = vst.msk [vmem:[%s3567_s15 + $0x50] sm:$0xff] %vm3077_vm3, %v3027_v27  ;;  %v4204_v54 = vmul.f32 %v4097_v33, %v386_v1  ;;  %v2808_v57 = vrot.slane %v2682_v13, 2  ;;  %v1399_v8 = vmul.f32 %v4165_v7, %v386_v1  ;;  %v4209_v15 = vmul.f32 %v4171_v45, %v386_v1 }
  0xf8   : > { %v2465_v59 = vsel %vm786_vm0, %v2463_v9, %v2464_v6  ;;  %v570_v5 = vmul.f32 %v4120_v49, %v386_v1  ;;  %v6139_v2 = vrot.slane %v4201_v60, 1  ;;  %v4214_v22 = vmul.f32 %v4177_v32, %v386_v1 }
  0xf9   : > { %v2617_v55 = vadd.f32 %v2465_v59, %v2272_v12  ;;  %v2810_v61 = vsel %vm1132_vm1, %v2808_v57, %v2809_v28  ;;  %v1459_v53 = vadd.f32 %v1399_v8, %v4075_v62  ;;  %v6142_v6 = vrot.slane %v4209_v15, 1  ;;  %v4230_v28 = vld [vmem:[%s6088_s1 + $0x7] ss:$0 sm:$0xff] }
  0xfa   : > { %v2226_v51 = vmul.f32 %v4222_v43, %v386_v1  ;;  %v1790_v27 = vadd.f32 %v1640_v42, %v1445_v0  ;;  %v976_v12 = vadd.f32 %v6139_v2, %v570_v5  ;;  %v4233_v62 = vmul.f32 %v4230_v28, %v386_v1  ;;  %v336_v42 = vpop.permute.xlu1 %335 }
  0xfb   : > { %v2962_v19 = vadd.f32 %v2810_v61, %v2617_v55  ;;  %v6140_v9 = vrot.slane %v4204_v54, 2  ;;  %v6143_v13 = vrot.slane %v4214_v22, 2  ;;  %v4239_v0 = vmul.f32 %v4192_v24, %v386_v1 }
  0xfc   : > { %v2286_v59 = vadd.f32 %v2226_v51, %v4112_v46  ;;  %v1804_v8 = vadd.f32 %v6142_v6, %v1459_v53  ;;  %v6141_v55 = vrot.slane %v4233_v62, 1  ;;  %v6282_v5 = vrot.slane %v3669_v4, 2 }
  0xfd   : > { %v3026_v57 = vadd.f32 %v3538_v31, %v2962_v19  ;;  %v6283_v61 = vrot.slane %v4100_v56, 2  ;;  %v4252_v46 = vadd.f32 %v6140_v9, %v976_v12  ;;  %v6144_v1 = vrot.slane %v4239_v0, 2 }
  0xfe   : > { %v6284_v31 = vrot.slane %v3688_v48, 2  ;;  %v2631_v4 = vadd.f32 %v6141_v55, %v2286_v59  ;;  %v4267_v12 = vmul.f32 %v4097_v33, %v336_v42  ;;  %v4272_v48 = vmul.f32 %v4177_v32, %v336_v42 }
  0xff   : > { %v1162_v2 = vsel %vm1132_vm1, %v6283_v61, %v6282_v5  ;;  %3088 = vst.msk [vmem:[%s3567_s15 + $0x48] sm:$0xff] %vm3077_vm3, %v3026_v57  ;;  %v685_v5 = vmul.f32 %v4091_v40, %v336_v42  ;;  %v1389_v61 = vmul.f32 %v4165_v7, %v336_v42  ;;  %v4277_v57 = vadd.f32 %v6143_v13, %v1804_v8 }
 0x100   : > { %v1309_v51 = vadd.f32 %v1162_v2, %v4130_v52  ;;  %v1987_v53 = vsel %vm1132_vm1, %v6145_v29, %v6284_v31  ;;  %v1514_v52 = vmul.f32 %v4171_v45, %v336_v42  ;;  %v2216_v2 = vmul.f32 %v4222_v43, %v336_v42  ;;  %v331_v29 = vpop.permute.xlu0 %330 }
 0x101   : > { %v2136_v19 = vadd.f32 %v1987_v53, %v1791_v37  ;;  %v2976_v37 = vadd.f32 %v6144_v1, %v2631_v4  ;;  %v818_v59 = vrot.slane %v685_v5, 1  ;;  %v2341_v31 = vmul.f32 %v4230_v28, %v336_v42 }
 0x102   : > { %v560_v53 = vmul.f32 %v4120_v49, %v336_v42  ;;  %v1644_v55 = vrot.slane %v1514_v52, 1  ;;  %v6285_v13 = vrot.slane %v3777_v16, 1  ;;  %v2686_v1 = vmul.f32 %v4192_v24, %v336_v42 }
 0x103   : > { %v2276_v6 = vadd.f32 %v2216_v2, %v2136_v19  ;;  %v3040_v8 = vadd.f32 %v4287_v11, %v2976_v37  ;;  %v2469_v5 = vrot.slane %v2341_v31, 1  ;;  %v1449_v9 = vadd.f32 %v1389_v61, %v1309_v51 }
 0x104   : > { %v821_v4 = vsel %vm786_vm0, %v818_v59, %v6285_v13  ;;  %v6286_v19 = vrot.slane %v3785_v14, 1  ;;  %v6287_v37 = vrot.slane %v3800_v47, 1  ;;  %v2814_v13 = vrot.slane %v2686_v1, 2 }
 0x105   : > { %v4294_v3 = vadd.f32 %v821_v4, %v560_v53  ;;  %3102 = vst.msk [vmem:[%s3567_s15 + $0xb8] sm:$0xf] %vm3080_vm2, %v3040_v8  ;;  %v6288_v31 = vrot.slane %v4100_v56, 2  ;;  %v6289_v42 = vrot.slane %v4160_v38, 2  ;;  %v6290_v51 = vrot.slane %v4107_v26, 2 }
 0x106   : > { %v1647_v52 = vsel %vm786_vm0, %v1644_v55, %v6286_v19  ;;  %v2472_v16 = vsel %vm786_vm0, %v2469_v5, %v6287_v37  ;;  %v6291_v14 = vrot.slane %v4180_v63, 2  ;;  %v684_v47 = vmul.f32 %v4091_v40, %v331_v29 }
 0x107   : > { %v1160_v53 = vsel %vm1132_vm1, %v6289_v42, %v6288_v31  ;;  %v2621_v4 = vadd.f32 %v2472_v16, %v2276_v6  ;;  %v6292_v1 = vrot.slane %v3805_v18, 2  ;;  %v4321_v38 = vmul.f32 %v4097_v33, %v331_v29 }
 0x108   : > { %v1985_v61 = vsel %vm1132_vm1, %v6291_v14, %v6290_v51  ;;  %v1308_v8 = vadd.f32 %v1160_v53, %v4197_v25  ;;  %v1388_v37 = vmul.f32 %v4165_v7, %v331_v29  ;;  %v1513_v26 = vmul.f32 %v4171_v45, %v331_v29  ;;  %v401_v53 = vpop.permute.xlu2 %400 }
 0x109   : > { %v2135_v19 = vadd.f32 %v1985_v61, %v1790_v27  ;;  %v2817_v56 = vsel %vm1132_vm1, %v2814_v13, %v6292_v1  ;;  %v817_v31 = vrot.slane %v684_v47, 1  ;;  %v4326_v6 = vmul.f32 %v4177_v32, %v331_v29 }
 0x10a   : > { %v2966_v63 = vadd.f32 %v2817_v56, %v2621_v4  ;;  %v2215_v25 = vmul.f32 %v4222_v43, %v331_v29  ;;  %v1794_v27 = vadd.f32 %v1647_v52, %v1449_v9  ;;  %v559_v18 = vmul.f32 %v4120_v49, %v331_v29 }
 0x10b   : > { %v1643_v16 = vrot.slane %v1513_v26, 1  ;;  %v2340_v42 = vmul.f32 %v4230_v28, %v331_v29  ;;  %v819_v14 = vsel %vm786_vm0, %v817_v31, %v818_v59  ;;  %v1448_v47 = vadd.f32 %v1388_v37, %v1308_v8 }
 0x10c   : > { %v3030_v51 = vadd.f32 %v4287_v11, %v2966_v63  ;;  %v2275_v4 = vadd.f32 %v2215_v25, %v2135_v19  ;;  %v2685_v2 = vmul.f32 %v4192_v24, %v331_v29  ;;  %v4338_v9 = vadd.f32 %v819_v14, %v559_v18 }
 0x10d   : > { %v2468_v56 = vrot.slane %v2340_v42, 1  ;;  %v1645_v52 = vsel %vm786_vm0, %v1643_v16, %v1644_v55  ;;  %v4342_v26 = vmul.f32 %v4091_v40, %v401_v53  ;;  %v4345_v59 = vmul.f32 %v4097_v33, %v401_v53 }
 0x10e   : > { %3092 = vst.msk [vmem:[%s3567_s15 + $0x68] sm:$0xff] %vm3077_vm3, %v3030_v51  ;;  %v2813_v8 = vrot.slane %v2685_v2, 2  ;;  %v1402_v37 = vmul.f32 %v4165_v7, %v401_v53  ;;  %v4350_v63 = vmul.f32 %v4171_v45, %v401_v53  ;;  %v573_v31 = vmul.f32 %v4120_v49, %v401_v53 }
 0x10f   : > { %6293 = vst [vmem:[#allocation2_spill] sm:$0xff] %v4345_v59  ;;  %v2470_v19 = vsel %vm786_vm0, %v2468_v56, %v2469_v5  ;;  %v6149_v25 = vrot.slane %v4342_v26, 1  ;;  %v4355_v55 = vmul.f32 %v4177_v32, %v401_v53  ;;  %v2229_v2 = vmul.f32 %v4222_v43, %v401_v53 }
 0x110   : > { %v2620_v29 = vadd.f32 %v2470_v19, %v2275_v4  ;;  %v2815_v18 = vsel %vm1132_vm1, %v2813_v8, %v2814_v13  ;;  %v1462_v16 = vadd.f32 %v1402_v37, %v4252_v46  ;;  %v6146_v5 = vrot.slane %v4350_v63, 1  ;;  %v351_v8 = vpop.permute.xlu1 %350 }
 0x111   : > { %6294 = vst [vmem:[#allocation3_spill] sm:$0xff] %v4355_v55  ;;  %v1793_v42 = vadd.f32 %v1645_v52, %v1448_v47  ;;  %v979_v14 = vadd.f32 %v6149_v25, %v573_v31  ;;  %v4364_v4 = vmul.f32 %v4230_v28, %v401_v53  ;;  %v6147_v56 = vrot.slane %v4345_v59, 2 }
 0x112   : > { %v2965_v51 = vadd.f32 %v2815_v18, %v2620_v29  ;;  %v6150_v19 = vrot.slane %v4355_v55, 2  ;;  %v2289_v13 = vadd.f32 %v2229_v2, %v4277_v57  ;;  %v4370_v46 = vmul.f32 %v4192_v24, %v401_v53 }
 0x113   : > { %v1807_v52 = vadd.f32 %v6146_v5, %v1462_v16  ;;  %v6148_v37 = vrot.slane %v4364_v4, 1  ;;  %v6296_v29 = vrot.slane %v3781_v58, 2  ;;  %v6297_v31 = vrot.slane %v4267_v12, 2 }
 0x114   : > { %6295 = vst [vmem:[#allocation4_spill] sm:$0xff] %v4370_v46  ;;  %v3029_v47 = vadd.f32 %v4287_v11, %v2965_v51  ;;  %v4383_v57 = vadd.f32 %v6147_v56, %v979_v14  ;;  %v6152_v53 = vrot.slane %v4370_v46, 2  ;;  %v6298_v51 = vrot.slane %v3794_v36, 2 }
 0x115   : > { %v1167_v18 = vsel %vm1132_vm1, %v6297_v31, %v6296_v29  ;;  %v6299_v16 = vrot.slane %v4272_v48, 2  ;;  %v2634_v58 = vadd.f32 %v6148_v37, %v2289_v13  ;;  %v688_v31 = vmul.f32 %v4091_v40, %v351_v8 }
 0x116   : > { %v1312_v2 = vadd.f32 %v1167_v18, %v4294_v3  ;;  %3091 = vst.msk [vmem:[%s3567_s15 + $0x60] sm:$0xff] %vm3077_vm3, %v3029_v47  ;;  %v4398_v14 = vmul.f32 %v4097_v33, %v351_v8  ;;  %v1392_v56 = vmul.f32 %v4165_v7, %v351_v8  ;;  %v1517_v3 = vmul.f32 %v4171_v45, %v351_v8 }
 0x117   : > { %v1992_v5 = vsel %vm1132_vm1, %v6299_v16, %v6298_v51  ;;  %v4403_v36 = vmul.f32 %v4177_v32, %v351_v8  ;;  %v2219_v18 = vmul.f32 %v4222_v43, %v351_v8  ;;  %v4408_v47 = vadd.f32 %v6150_v19, %v1807_v52 }
 0x118   : > { %v2139_v29 = vadd.f32 %v1992_v5, %v1794_v27  ;;  %v2979_v27 = vadd.f32 %v6152_v53, %v2634_v58  ;;  %v823_v5 = vrot.slane %v688_v31, 1  ;;  %v2344_v13 = vmul.f32 %v4230_v28, %v351_v8  ;;  %v346_v58 = vpop.permute.xlu0 %345 }
 0x119   : > { %v563_v51 = vmul.f32 %v4120_v49, %v351_v8  ;;  %v6162_v16 = vrot.slane %v4398_v14, 2  ;;  %v1649_v37 = vrot.slane %v1517_v3, 1  ;;  %v6300_v61 = vrot.slane %v3905_v39, 1 }
 0x11a   : > { %v2279_v25 = vadd.f32 %v2219_v18, %v2139_v29  ;;  %v3043_v1 = vadd.f32 %v4287_v11, %v2979_v27  ;;  %v2474_v19 = vrot.slane %v2344_v13, 1  ;;  %v2689_v55 = vmul.f32 %v4192_v24, %v351_v8 }
 0x11b   : > { %v826_v52 = vsel %vm786_vm0, %v823_v5, %v6300_v61  ;;  %v1452_v31 = vadd.f32 %v1392_v56, %v1312_v2  ;;  %v6301_v59 = vrot.slane %v3913_v21, 1  ;;  %v6160_v3 = vrot.slane %v4403_v36, 2 }
 0x11c   : > { %v4420_v53 = vadd.f32 %v826_v52, %v563_v51  ;;  %3105 = vst.msk [vmem:[%s3567_s15 + $0xd0] sm:$0xf] %vm3080_vm2, %v3043_v1  ;;  %v6302_v29 = vrot.slane %v3927_v50, 1  ;;  %v2819_v61 = vrot.slane %v2689_v55, 2  ;;  %v6303_v18 = vrot.slane %v4267_v12, 2 }
 0x11d   : > { %v1652_v46 = vsel %vm786_vm0, %v1649_v37, %v6301_v59  ;;  %v6304_v8 = vrot.slane %v4321_v38, 2  ;;  %v6305_v56 = vrot.slane %v4272_v48, 2  ;;  %v6306_v21 = vrot.slane %v4326_v6, 2 }
 0x11e   : > { %v2477_v39 = vsel %vm786_vm0, %v2474_v19, %v6302_v29  ;;  %v687_v50 = vmul.f32 %v4091_v40, %v346_v58  ;;  %v6307_v55 = vrot.slane %v3932_v44, 2  ;;  %v4447_v38 = vmul.f32 %v4097_v33, %v346_v58 }
 0x11f   : > { %v1165_v27 = vsel %vm1132_vm1, %v6304_v8, %v6303_v18  ;;  %v1990_v59 = vsel %vm1132_vm1, %v6306_v21, %v6305_v56  ;;  %v2624_v2 = vadd.f32 %v2477_v39, %v2279_v25  ;;  %v1391_v51 = vmul.f32 %v4165_v7, %v346_v58  ;;  %v416_v18 = vpop.permute.xlu2 %415 }
 0x120   : > { %v1311_v1 = vadd.f32 %v1165_v27, %v4338_v9  ;;  %v2138_v13 = vadd.f32 %v1990_v59, %v1793_v42  ;;  %v2822_v12 = vsel %vm1132_vm1, %v2819_v61, %v6307_v55  ;;  %v1516_v48 = vmul.f32 %v4171_v45, %v346_v58 }
 0x121   : > { %v2969_v6 = vadd.f32 %v2822_v12, %v2624_v2  ;;  %v822_v52 = vrot.slane %v687_v50, 1  ;;  %v4452_v25 = vmul.f32 %v4177_v32, %v346_v58  ;;  %v2218_v9 = vmul.f32 %v4222_v43, %v346_v58 }
 0x122   : > { %v1797_v42 = vadd.f32 %v1652_v46, %v1452_v31  ;;  %v562_v44 = vmul.f32 %v4120_v49, %v346_v58  ;;  %v1648_v29 = vrot.slane %v1516_v48, 1  ;;  %v2343_v39 = vmul.f32 %v4230_v28, %v346_v58 }
 0x123   : > { %v3033_v8 = vadd.f32 %v4287_v11, %v2969_v6  ;;  %v824_v27 = vsel %vm786_vm0, %v822_v52, %v823_v5  ;;  %v2278_v21 = vadd.f32 %v2218_v9, %v2138_v13  ;;  %v1451_v59 = vadd.f32 %v1391_v51, %v1311_v1 }
 0x124   : > { %v2473_v50 = vrot.slane %v2343_v39, 1  ;;  %v2688_v55 = vmul.f32 %v4192_v24, %v346_v58  ;;  %v4464_v46 = vadd.f32 %v824_v27, %v562_v44  ;;  %v1650_v31 = vsel %vm786_vm0, %v1648_v29, %v1649_v37 }
 0x125   : > { %3095 = vst.msk [vmem:[%s3567_s15 + $0x80] sm:$0xff] %vm3077_vm3, %v3033_v8  ;;  %v4468_v12 = vmul.f32 %v4091_v40, %v416_v18  ;;  %v4471_v5 = vmul.f32 %v4097_v33, %v416_v18  ;;  %v1405_v51 = vmul.f32 %v4165_v7, %v416_v18  ;;  %v4476_v48 = vmul.f32 %v4171_v45, %v416_v18 }
 0x126   : > { %v2475_v13 = vsel %vm786_vm0, %v2473_v50, %v2474_v19  ;;  %v2818_v1 = vrot.slane %v2688_v55, 2  ;;  %v576_v6 = vmul.f32 %v4120_v49, %v416_v18  ;;  %v4481_v37 = vmul.f32 %v4177_v32, %v416_v18 }
 0x127   : > { %v2623_v58 = vadd.f32 %v2475_v13, %v2278_v21  ;;  %v6158_v52 = vrot.slane %v4468_v12, 1  ;;  %v1465_v44 = vadd.f32 %v1405_v51, %v4383_v57  ;;  %v6157_v19 = vrot.slane %v4476_v48, 1  ;;  %v366_v13 = vpop.permute.xlu1 %365 }
 0x128   : > { %v2820_v9 = vsel %vm1132_vm1, %v2818_v1, %v2819_v61  ;;  %v2232_v29 = vmul.f32 %v4222_v43, %v416_v18  ;;  %v1796_v39 = vadd.f32 %v1650_v31, %v1451_v59  ;;  %v4490_v21 = vmul.f32 %v4230_v28, %v416_v18 }
 0x129   : > { %v2968_v8 = vadd.f32 %v2820_v9, %v2623_v58  ;;  %v982_v27 = vadd.f32 %v6158_v52, %v576_v6  ;;  %v6155_v50 = vrot.slane %v4471_v5, 2  ;;  %v6159_v55 = vrot.slane %v4481_v37, 2 }
 0x12a   : > { %v2292_v61 = vadd.f32 %v2232_v29, %v4408_v47  ;;  %v4496_v57 = vmul.f32 %v4192_v24, %v416_v18  ;;  %v1810_v31 = vadd.f32 %v6157_v19, %v1465_v44  ;;  %v6156_v1 = vrot.slane %v4490_v21, 1 }
 0x12b   : > { %v3032_v59 = vadd.f32 %v4287_v11, %v2968_v8  ;;  %v6308_v51 = vrot.slane %v3908_v30, 2  ;;  %v4509_v47 = vadd.f32 %v6155_v50, %v982_v27  ;;  %v6309_v9 = vrot.slane %v3918_v17, 2 }
 0x12c   : > { %v6161_v18 = vrot.slane %v4496_v57, 2  ;;  %v2637_v30 = vadd.f32 %v6156_v1, %v2292_v61  ;;  %v691_v8 = vmul.f32 %v4091_v40, %v366_v13  ;;  %v4524_v27 = vmul.f32 %v4097_v33, %v366_v13 }
 0x12d   : > { %v1172_v58 = vsel %vm1132_vm1, %v6162_v16, %v6308_v51  ;;  %v1997_v44 = vsel %vm1132_vm1, %v6160_v3, %v6309_v9  ;;  %3094 = vst.msk [vmem:[%s3567_s15 + $0x78] sm:$0xff] %vm3077_vm3, %v3032_v59  ;;  %v1395_v51 = vmul.f32 %v4165_v7, %v366_v13  ;;  %v4529_v17 = vmul.f32 %v4177_v32, %v366_v13 }
 0x12e   : > { %v1315_v6 = vadd.f32 %v1172_v58, %v4420_v53  ;;  %v2142_v29 = vadd.f32 %v1997_v44, %v1797_v42  ;;  %v1520_v53 = vmul.f32 %v4171_v45, %v366_v13  ;;  %v2222_v58 = vmul.f32 %v4222_v43, %v366_v13 }
 0x12f   : > { %v4534_v59 = vadd.f32 %v6159_v55, %v1810_v31  ;;  %v2982_v42 = vadd.f32 %v6161_v18, %v2637_v30  ;;  %v828_v61 = vrot.slane %v691_v8, 1  ;;  %v2347_v9 = vmul.f32 %v4230_v28, %v366_v13  ;;  %v361_v30 = vpop.permute.xlu0 %360 }
 0x130   : > { %v566_v44 = vmul.f32 %v4120_v49, %v366_v13  ;;  %v6170_v50 = vrot.slane %v4524_v27, 2  ;;  %v1654_v1 = vrot.slane %v1520_v53, 1  ;;  %v2282_v19 = vadd.f32 %v2222_v58, %v2142_v29 }
 0x131   : > { %v3046_v52 = vadd.f32 %v4287_v11, %v2982_v42  ;;  %v6310_v2 = vrot.slane %v4034_v23, 1  ;;  %v2479_v55 = vrot.slane %v2347_v9, 1  ;;  %v2692_v3 = vmul.f32 %v4192_v24, %v366_v13 }
 0x132   : > { %v1455_v8 = vadd.f32 %v1395_v51, %v1315_v6  ;;  %v6311_v56 = vrot.slane %v4042_v20, 1  ;;  %v6168_v53 = vrot.slane %v4529_v17, 2  ;;  %v6312_v29 = vrot.slane %v4056_v41, 1 }
 0x133   : > { %v831_v31 = vsel %vm786_vm0, %v828_v61, %v6310_v2  ;;  %3108 = vst.msk [vmem:[%s3567_s15 + $0xe8] sm:$0xf] %vm3080_vm2, %v3046_v52  ;;  %v2824_v2 = vrot.slane %v2692_v3, 2  ;;  %v6313_v58 = vrot.slane %v4398_v14, 2  ;;  %v6314_v13 = vrot.slane %v4447_v38, 2 }
 0x134   : > { %v4546_v18 = vadd.f32 %v831_v31, %v566_v44  ;;  %v1657_v16 = vsel %vm786_vm0, %v1654_v1, %v6311_v56  ;;  %v2482_v23 = vsel %vm786_vm0, %v2479_v55, %v6312_v29  ;;  %v6315_v6 = vrot.slane %v4403_v36, 2 }
 0x135   : > { %v1170_v42 = vsel %vm1132_vm1, %v6314_v13, %v6313_v58  ;;  %v6316_v20 = vrot.slane %v4452_v25, 2  ;;  %v2627_v51 = vadd.f32 %v2482_v23, %v2282_v19  ;;  %v690_v41 = vmul.f32 %v4091_v40, %v361_v30  ;;  %v431_v58 = vpop.permute.xlu2 %430 }
 0x136   : > { %v1314_v52 = vadd.f32 %v1170_v42, %v4464_v46  ;;  %v6317_v3 = vrot.slane %v4062_v10, 2  ;;  %v4573_v38 = vmul.f32 %v4097_v33, %v361_v30  ;;  %v1394_v44 = vmul.f32 %v4165_v7, %v361_v30 }
 0x137   : > { %v1995_v56 = vsel %vm1132_vm1, %v6316_v20, %v6315_v6  ;;  %v1519_v36 = vmul.f32 %v4171_v45, %v361_v30  ;;  %v827_v31 = vrot.slane %v690_v41, 1  ;;  %v4578_v19 = vmul.f32 %v4177_v32, %v361_v30 }
 0x138   : > { %v2141_v9 = vadd.f32 %v1995_v56, %v1796_v39  ;;  %v2827_v14 = vsel %vm1132_vm1, %v2824_v2, %v6317_v3  ;;  %v2221_v46 = vmul.f32 %v4222_v43, %v361_v30  ;;  %v1800_v39 = vadd.f32 %v1657_v16, %v1455_v8 }
 0x139   : > { %v2972_v25 = vadd.f32 %v2827_v14, %v2627_v51  ;;  %v565_v10 = vmul.f32 %v4120_v49, %v361_v30  ;;  %v1653_v29 = vrot.slane %v1519_v36, 1  ;;  %v2346_v23 = vmul.f32 %v4230_v28, %v361_v30 }
 0x13a   : > { %v829_v42 = vsel %vm786_vm0, %v827_v31, %v828_v61  ;;  %v2281_v20 = vadd.f32 %v2221_v46, %v2141_v9  ;;  %v1454_v56 = vadd.f32 %v1394_v44, %v1314_v52  ;;  %v2691_v3 = vmul.f32 %v4192_v24, %v361_v30 }
 0x13b   : > { %v3036_v13 = vadd.f32 %v4287_v11, %v2972_v25  ;;  %v2478_v41 = vrot.slane %v2346_v23, 1  ;;  %v4590_v16 = vadd.f32 %v829_v42, %v565_v10  ;;  %v1655_v8 = vsel %vm786_vm0, %v1653_v29, %v1654_v1 }
 0x13c   : > { %v4594_v14 = vmul.f32 %v4091_v40, %v431_v58  ;;  %v4597_v61 = vmul.f32 %v4097_v33, %v431_v58  ;;  %v2823_v52 = vrot.slane %v2691_v3, 2  ;;  %v1408_v44 = vmul.f32 %v4165_v7, %v431_v58 }
 0x13d   : > { %3098 = vst.msk [vmem:[%s3567_s15 + $0x98] sm:$0xff] %vm3077_vm3, %v3036_v13  ;;  %v2480_v9 = vsel %vm786_vm0, %v2478_v41, %v2479_v55  ;;  %v4602_v36 = vmul.f32 %v4171_v45, %v431_v58  ;;  %v579_v25 = vmul.f32 %v4120_v49, %v431_v58  ;;  %v4607_v1 = vmul.f32 %v4177_v32, %v431_v58 }
 0x13e   : > { %v2626_v30 = vadd.f32 %v2480_v9, %v2281_v20  ;;  %v6166_v31 = vrot.slane %v4594_v14, 1  ;;  %v2825_v46 = vsel %vm1132_vm1, %v2823_v52, %v2824_v2  ;;  %v1468_v10 = vadd.f32 %v1408_v44, %v4509_v47  ;;  %v381_v9 = vpop.permute.xlu1 %380 }
 0x13f   : > { %v6165_v55 = vrot.slane %v4602_v36, 1  ;;  %v2235_v29 = vmul.f32 %v4222_v43, %v431_v58  ;;  %v1799_v23 = vadd.f32 %v1655_v8, %v1454_v56  ;;  %v4616_v20 = vmul.f32 %v4230_v28, %v431_v58 }
 0x140   : > { %v2971_v13 = vadd.f32 %v2825_v46, %v2626_v30  ;;  %v985_v42 = vadd.f32 %v6166_v31, %v579_v25  ;;  %v6163_v41 = vrot.slane %v4597_v61, 2  ;;  %v6167_v3 = vrot.slane %v4607_v1, 2 }
 0x141   : > { %v2295_v2 = vadd.f32 %v2235_v29, %v4534_v59  ;;  %v4622_v47 = vmul.f32 %v4192_v24, %v431_v58  ;;  %v1813_v8 = vadd.f32 %v6165_v55, %v1468_v10  ;;  %v6164_v52 = vrot.slane %v4616_v20, 1 }
 0x142   : > { %v3035_v56 = vadd.f32 %v4287_v11, %v2971_v13  ;;  %v6318_v44 = vrot.slane %v4037_v35, 2  ;;  %v4635_v59 = vadd.f32 %v6163_v41, %v985_v42  ;;  %v6319_v46 = vrot.slane %v4047_v34, 2 }
 0x143   : > { %v6169_v58 = vrot.slane %v4622_v47, 2  ;;  %v2640_v35 = vadd.f32 %v6164_v52, %v2295_v2  ;;  %v694_v13 = vmul.f32 %v4091_v40, %v381_v9  ;;  %v4650_v42 = vmul.f32 %v4097_v33, %v381_v9 }
 0x144   : > { %v1177_v30 = vsel %vm1132_vm1, %v6170_v50, %v6318_v44  ;;  %v2002_v10 = vsel %vm1132_vm1, %v6168_v53, %v6319_v46  ;;  %3097 = vst.msk [vmem:[%s3567_s15 + $0x90] sm:$0xff] %vm3077_vm3, %v3035_v56  ;;  %v1398_v44 = vmul.f32 %v4165_v7, %v381_v9  ;;  %v4655_v34 = vmul.f32 %v4177_v32, %v381_v9 }
 0x145   : > { %v1318_v25 = vadd.f32 %v1177_v30, %v4546_v18  ;;  %v2145_v29 = vadd.f32 %v2002_v10, %v1800_v39  ;;  %v1523_v18 = vmul.f32 %v4171_v45, %v381_v9  ;;  %v2225_v30 = vmul.f32 %v4222_v43, %v381_v9 }
 0x146   : > { %v4660_v56 = vadd.f32 %v6167_v3, %v1813_v8  ;;  %v2985_v39 = vadd.f32 %v6169_v58, %v2640_v35  ;;  %v833_v2 = vrot.slane %v694_v13, 1  ;;  %v2350_v46 = vmul.f32 %v4230_v28, %v381_v9  ;;  %v376_v35 = vpop.permute.xlu0 %375 }
 0x147   : > { %v569_v10 = vmul.f32 %v4120_v49, %v381_v9  ;;  %v6178_v41 = vrot.slane %v4650_v42, 2  ;;  %v1659_v52 = vrot.slane %v1523_v18, 1  ;;  %v2285_v55 = vadd.f32 %v2225_v30, %v2145_v29 }
 0x148   : > { %v3049_v31 = vadd.f32 %v4287_v11, %v2985_v39  ;;  %v6320_v51 = vrot.slane %v4201_v60, 1  ;;  %v2484_v3 = vrot.slane %v2350_v46, 1  ;;  %v2695_v53 = vmul.f32 %v4192_v24, %v381_v9 }
 0x149   : > { %v1458_v13 = vadd.f32 %v1398_v44, %v1318_v25  ;;  %v6321_v6 = vrot.slane %v4209_v15, 1  ;;  %v6176_v18 = vrot.slane %v4655_v34, 2  ;;  %v6322_v29 = vrot.slane %v4233_v62, 1 }
 0x14a   : > { %v836_v8 = vsel %vm786_vm0, %v833_v2, %v6320_v51  ;;  %3111 = vst.msk [vmem:[%s3567_s15 + $0x100] sm:$0xf] %vm3080_vm2, %v3049_v31  ;;  %v2829_v51 = vrot.slane %v2695_v53, 2  ;;  %v6323_v30 = vrot.slane %v4524_v27, 2  ;;  %v6324_v9 = vrot.slane %v4573_v38, 2 }
 0x14b   : > { %v4672_v58 = vadd.f32 %v836_v8, %v569_v10  ;;  %v1662_v50 = vsel %vm786_vm0, %v1659_v52, %v6321_v6  ;;  %v2487_v60 = vsel %vm786_vm0, %v2484_v3, %v6322_v29  ;;  %v6325_v25 = vrot.slane %v4529_v17, 2 }
 0x14c   : > { %v1175_v39 = vsel %vm1132_vm1, %v6324_v9, %v6323_v30  ;;  %v6326_v15 = vrot.slane %v4578_v19, 2  ;;  %v2630_v44 = vadd.f32 %v2487_v60, %v2285_v55  ;;  %v693_v62 = vmul.f32 %v4091_v40, %v376_v35  ;;  %v446_v30 = vpop.permute.xlu2 %445 }
 0x14d   : > { %v1317_v31 = vadd.f32 %v1175_v39, %v4590_v16  ;;  %v6327_v53 = vrot.slane %v4239_v0, 2  ;;  %v4699_v38 = vmul.f32 %v4097_v33, %v376_v35  ;;  %v1397_v10 = vmul.f32 %v4165_v7, %v376_v35 }
 0x14e   : > { %v2000_v6 = vsel %vm1132_vm1, %v6326_v15, %v6325_v25  ;;  %v1522_v17 = vmul.f32 %v4171_v45, %v376_v35  ;;  %v832_v8 = vrot.slane %v693_v62, 1  ;;  %v4704_v55 = vmul.f32 %v4177_v32, %v376_v35 }
 0x14f   : > { %v2144_v46 = vadd.f32 %v2000_v6, %v1799_v23  ;;  %v2832_v27 = vsel %vm1132_vm1, %v2829_v51, %v6327_v53  ;;  %v2224_v16 = vmul.f32 %v4222_v43, %v376_v35  ;;  %v1803_v23 = vadd.f32 %v1662_v50, %v1458_v13 }
 0x150   : > { %v2975_v19 = vadd.f32 %v2832_v27, %v2630_v44  ;;  %v568_v0 = vmul.f32 %v4120_v49, %v376_v35  ;;  %v1658_v29 = vrot.slane %v1522_v17, 1  ;;  %v2349_v60 = vmul.f32 %v4230_v28, %v376_v35 }
 0x151   : > { %v834_v39 = vsel %vm786_vm0, %v832_v8, %v833_v2  ;;  %v2284_v15 = vadd.f32 %v2224_v16, %v2144_v46  ;;  %v1457_v6 = vadd.f32 %v1397_v10, %v1317_v31  ;;  %v2694_v53 = vmul.f32 %v4192_v24, %v376_v35 }
 0x152   : > { %v3039_v9 = vadd.f32 %v4287_v11, %v2975_v19  ;;  %v2483_v62 = vrot.slane %v2349_v60, 1  ;;  %v4716_v50 = vadd.f32 %v834_v39, %v568_v0  ;;  %v1660_v13 = vsel %vm786_vm0, %v1658_v29, %v1659_v52 }
 0x153   : > { %v4720_v27 = vmul.f32 %v4091_v40, %v446_v30  ;;  %v4723_v2 = vmul.f32 %v4097_v33, %v446_v30  ;;  %v2828_v31 = vrot.slane %v2694_v53, 2  ;;  %v1411_v10 = vmul.f32 %v4165_v7, %v446_v30 }
 0x154   : > { %3101 = vst.msk [vmem:[%s3567_s15 + $0xb0] sm:$0xff] %vm3077_vm3, %v3039_v9  ;;  %v2485_v46 = vsel %vm786_vm0, %v2483_v62, %v2484_v3  ;;  %v4728_v17 = vmul.f32 %v4171_v45, %v446_v30  ;;  %v582_v19 = vmul.f32 %v4120_v49, %v446_v30  ;;  %v4733_v52 = vmul.f32 %v4177_v32, %v446_v30 }
 0x155   : > { %v2629_v35 = vadd.f32 %v2485_v46, %v2284_v15  ;;  %v6174_v8 = vrot.slane %v4720_v27, 1  ;;  %v2830_v16 = vsel %vm1132_vm1, %v2828_v31, %v2829_v51  ;;  %v1471_v0 = vadd.f32 %v1411_v10, %v4635_v59  ;;  %v396_v46 = vpop.permute.xlu1 %395 }
 0x156   : > { %v6173_v3 = vrot.slane %v4728_v17, 1  ;;  %v2238_v29 = vmul.f32 %v4222_v43, %v446_v30  ;;  %v1802_v60 = vadd.f32 %v1660_v13, %v1457_v6  ;;  %v4742_v15 = vmul.f32 %v4230_v28, %v446_v30 }
 0x157   : > { %v2974_v9 = vadd.f32 %v2830_v16, %v2629_v35  ;;  %v988_v39 = vadd.f32 %v6174_v8, %v582_v19  ;;  %v6171_v62 = vrot.slane %v4723_v2, 2  ;;  %v6175_v53 = vrot.slane %v4733_v52, 2 }
 0x158   : > { %v2298_v51 = vadd.f32 %v2238_v29, %v4660_v56  ;;  %v4748_v59 = vmul.f32 %v4192_v24, %v446_v30  ;;  %v1816_v13 = vadd.f32 %v6173_v3, %v1471_v0  ;;  %v6172_v31 = vrot.slane %v4742_v15, 1 }
 0x159   : > { %v3038_v6 = vadd.f32 %v4287_v11, %v2974_v9  ;;  %v6328_v10 = vrot.slane %v4204_v54, 2  ;;  %v4761_v56 = vadd.f32 %v6171_v62, %v988_v39  ;;  %v6329_v16 = vrot.slane %v4214_v22, 2 }
 0x15a   : > { %v6177_v30 = vrot.slane %v4748_v59, 2  ;;  %v2643_v54 = vadd.f32 %v6172_v31, %v2298_v51  ;;  %v697_v9 = vmul.f32 %v4091_v40, %v396_v46  ;;  %v4776_v39 = vmul.f32 %v4097_v33, %v396_v46 }
 0x15b   : > { %v1182_v35 = vsel %vm1132_vm1, %v6178_v41, %v6328_v10  ;;  %v2007_v0 = vsel %vm1132_vm1, %v6176_v18, %v6329_v16  ;;  %3100 = vst.msk [vmem:[%s3567_s15 + $0xa8] sm:$0xff] %vm3077_vm3, %v3038_v6  ;;  %v1401_v10 = vmul.f32 %v4165_v7, %v396_v46  ;;  %v4781_v22 = vmul.f32 %v4177_v32, %v396_v46 }
 0x15c   : > { %v1321_v19 = vadd.f32 %v1182_v35, %v4672_v58  ;;  %v2148_v29 = vadd.f32 %v2007_v0, %v1803_v23  ;;  %v1526_v58 = vmul.f32 %v4171_v45, %v396_v46  ;;  %v2228_v35 = vmul.f32 %v4222_v43, %v396_v46 }
 0x15d   : > { %v4786_v6 = vadd.f32 %v6175_v53, %v1816_v13  ;;  %v2988_v23 = vadd.f32 %v6177_v30, %v2643_v54  ;;  %v838_v51 = vrot.slane %v697_v9, 1  ;;  %v2353_v16 = vmul.f32 %v4230_v28, %v396_v46  ;;  %v391_v54 = vpop.permute.xlu0 %390 }
 0x15e   : > { %v572_v0 = vmul.f32 %v4120_v49, %v396_v46  ;;  %v6186_v62 = vrot.slane %v4776_v39, 2  ;;  %v1664_v31 = vrot.slane %v1526_v58, 1  ;;  %v2288_v3 = vadd.f32 %v2228_v35, %v2148_v29 }
 0x15f   : > { %v3052_v8 = vadd.f32 %v4287_v11, %v2988_v23  ;;  %v6330_v44 = vrot.slane %v4342_v26, 1  ;;  %v2489_v53 = vrot.slane %v2353_v16, 1  ;;  %v2698_v18 = vmul.f32 %v4192_v24, %v396_v46 }
 0x160   : > { %v1461_v9 = vadd.f32 %v1401_v10, %v1321_v19  ;;  %v6331_v25 = vrot.slane %v4350_v63, 1  ;;  %v6185_v58 = vrot.slane %v4781_v22, 2  ;;  %v6332_v29 = vrot.slane %v4364_v4, 1 }
 0x161   : > { %v841_v13 = vsel %vm786_vm0, %v838_v51, %v6330_v44  ;;  %3114 = vst.msk [vmem:[%s3567_s15 + $0x118] sm:$0xf] %vm3080_vm2, %v3052_v8  ;;  %v2834_v44 = vrot.slane %v2698_v18, 2  ;;  %v6333_v35 = vrot.slane %v4650_v42, 2  ;;  %v6334_v46 = vrot.slane %v4699_v38, 2 }
 0x162   : > { %v4798_v30 = vadd.f32 %v841_v13, %v572_v0  ;;  %v1667_v41 = vsel %vm786_vm0, %v1664_v31, %v6331_v25  ;;  %v2492_v26 = vsel %vm786_vm0, %v2489_v53, %v6332_v29  ;;  %v6335_v19 = vrot.slane %v4655_v34, 2  ;;  %v6337_v0 = vld [vmem:[#allocation4_spill] sm:$0xff] }
 0x163   : > { %v1180_v23 = vsel %vm1132_vm1, %v6334_v46, %v6333_v35  ;;  %v6336_v63 = vrot.slane %v4704_v55, 2  ;;  %v2633_v10 = vadd.f32 %v2492_v26, %v2288_v3  ;;  %v696_v4 = vmul.f32 %v4091_v40, %v391_v54 }
 0x164   : > { %v1320_v8 = vadd.f32 %v1180_v23, %v4716_v50  ;;  %v6338_v18 = vrot.slane %v6337_v0, 2  ;;  %v4825_v38 = vmul.f32 %v4097_v33, %v391_v54  ;;  %v1400_v13 = vmul.f32 %v4165_v7, %v391_v54  ;;  %v461_v33 = vpop.permute.xlu2 %460 }
 0x165   : > { %v2005_v25 = vsel %vm1132_vm1, %v6336_v63, %v6335_v19  ;;  %v1525_v34 = vmul.f32 %v4171_v45, %v391_v54  ;;  %v837_v29 = vrot.slane %v696_v4, 1  ;;  %v4830_v3 = vmul.f32 %v4177_v32, %v391_v54 }
 0x166   : > { %v2147_v16 = vadd.f32 %v2005_v25, %v1802_v60  ;;  %v2837_v42 = vsel %vm1132_vm1, %v2834_v44, %v6338_v18  ;;  %v2227_v50 = vmul.f32 %v4222_v43, %v391_v54  ;;  %v1806_v40 = vadd.f32 %v1667_v41, %v1461_v9  ;;  %v4848_v18 = vld [vmem:[%s6088_s1 + $0x1] ss:$0 sm:$0xff] }
 0x167   : > { %v2978_v55 = vadd.f32 %v2837_v42, %v2633_v10  ;;  %v571_v60 = vmul.f32 %v4120_v49, %v391_v54  ;;  %v1663_v26 = vrot.slane %v1525_v34, 1  ;;  %v2352_v35 = vmul.f32 %v4230_v28, %v391_v54 }
 0x168   : > { %v839_v23 = vsel %vm786_vm0, %v837_v29, %v838_v51  ;;  %v2287_v63 = vadd.f32 %v2227_v50, %v2147_v16  ;;  %v1460_v25 = vadd.f32 %v1400_v13, %v1320_v8  ;;  %v2697_v0 = vmul.f32 %v4192_v24, %v391_v54  ;;  %v4856_v8 = vld [vmem:[%s6088_s1 + $0x2] ss:$0 sm:$0xff] }
 0x169   : > { %v3042_v46 = vadd.f32 %v4287_v11, %v2978_v55  ;;  %v2488_v4 = vrot.slane %v2352_v35, 1  ;;  %v4842_v41 = vadd.f32 %v839_v23, %v571_v60  ;;  %v1665_v9 = vsel %vm786_vm0, %v1663_v26, %v1664_v31 }
 0x16a   : > { %v4851_v51 = vmul.f32 %v4848_v18, %v461_v33  ;;  %v4859_v54 = vmul.f32 %v4856_v8, %v461_v33  ;;  %v2833_v42 = vrot.slane %v2697_v0, 2  ;;  %v1414_v31 = vmul.f32 %v4165_v7, %v461_v33 }
 0x16b   : > { %3104 = vst.msk [vmem:[%s3567_s15 + $0xc8] sm:$0xff] %vm3077_vm3, %v3042_v46  ;;  %v2490_v16 = vsel %vm786_vm0, %v2488_v4, %v2489_v53  ;;  %v4864_v13 = vmul.f32 %v4171_v45, %v461_v33  ;;  %v585_v55 = vmul.f32 %v4120_v49, %v461_v33  ;;  %v4869_v50 = vmul.f32 %v4177_v32, %v461_v33 }
 0x16c   : > { %v2632_v34 = vadd.f32 %v2490_v16, %v2287_v63  ;;  %v6184_v29 = vrot.slane %v4851_v51, 1  ;;  %v2835_v60 = vsel %vm1132_vm1, %v2833_v42, %v2834_v44  ;;  %v1474_v26 = vadd.f32 %v1414_v31, %v4761_v56  ;;  %v411_v16 = vpop.permute.xlu1 %410  ;;  %v6339_v31 = vld [vmem:[#allocation2_spill] sm:$0xff] }
 0x16d   : > { %v6179_v53 = vrot.slane %v4864_v13, 1  ;;  %v2241_v35 = vmul.f32 %v4222_v43, %v461_v33  ;;  %v1805_v46 = vadd.f32 %v1665_v9, %v1460_v25  ;;  %v4878_v49 = vmul.f32 %v4230_v28, %v461_v33 }
 0x16e   : > { %v2977_v23 = vadd.f32 %v2835_v60, %v2632_v34  ;;  %v991_v63 = vadd.f32 %v6184_v29, %v585_v55  ;;  %v6180_v4 = vrot.slane %v4859_v54, 2  ;;  %v6182_v0 = vrot.slane %v4869_v50, 2  ;;  %v406_v29 = vpop.permute.xlu0 %405 }
 0x16f   : > { %v2301_v44 = vadd.f32 %v2241_v35, %v4786_v6  ;;  %v4884_v56 = vmul.f32 %v4192_v24, %v461_v33  ;;  %v1819_v9 = vadd.f32 %v6179_v53, %v1474_v26  ;;  %v6181_v42 = vrot.slane %v4878_v49, 1  ;;  %v6341_v35 = vld [vmem:[#allocation3_spill] sm:$0xff] }
 0x170   : > { %v3041_v25 = vadd.f32 %v4287_v11, %v2977_v23  ;;  %v6340_v34 = vrot.slane %v6339_v31, 2  ;;  %v4897_v6 = vadd.f32 %v6180_v4, %v991_v63  ;;  %v6342_v23 = vrot.slane %v6341_v35, 2 }
 0x171   : > { %v6183_v33 = vrot.slane %v4884_v56, 2  ;;  %v2646_v31 = vadd.f32 %v6181_v42, %v2301_v44  ;;  %v700_v53 = vmul.f32 %v4848_v18, %v411_v16  ;;  %v4912_v63 = vmul.f32 %v4856_v8, %v411_v16 }
 0x172   : > { %v1187_v55 = vsel %vm1132_vm1, %v6186_v62, %v6340_v34  ;;  %v2012_v26 = vsel %vm1132_vm1, %v6185_v58, %v6342_v23  ;;  %3103 = vst.msk [vmem:[%s3567_s15 + $0xc0] sm:$0xff] %vm3077_vm3, %v3041_v25  ;;  %v1404_v4 = vmul.f32 %v4165_v7, %v411_v16  ;;  %v2231_v35 = vmul.f32 %v4222_v43, %v411_v16  ;;  %v4930_v7 = vld [vmem:[%s6088_s1] ss:$0 sm:$0xff] }
 0x173   : > { %v1324_v60 = vadd.f32 %v1187_v55, %v4798_v30  ;;  %v2151_v34 = vadd.f32 %v2012_v26, %v1806_v40  ;;  %v1529_v30 = vmul.f32 %v4171_v45, %v411_v16  ;;  %v4917_v55 = vmul.f32 %v4177_v32, %v411_v16 }
 0x174   : > { %v4922_v25 = vadd.f32 %v6182_v0, %v1819_v9  ;;  %v2991_v40 = vadd.f32 %v6183_v33, %v2646_v31  ;;  %v843_v44 = vrot.slane %v700_v53, 1  ;;  %v2356_v23 = vmul.f32 %v4230_v28, %v411_v16 }
 0x175   : > { %v575_v45 = vmul.f32 %v4930_v7, %v411_v16  ;;  %v6192_v32 = vrot.slane %v4912_v63, 2  ;;  %v1669_v26 = vrot.slane %v1529_v30, 1  ;;  %v2291_v42 = vadd.f32 %v2231_v35, %v2151_v34 }
 0x176   : > { %v3055_v9 = vadd.f32 %v4287_v11, %v2991_v40  ;;  %v6343_v0 = vrot.slane %v4468_v12, 1  ;;  %v2494_v31 = vrot.slane %v2356_v23, 1  ;;  %v2701_v33 = vmul.f32 %v4192_v24, %v411_v16 }
 0x177   : > { %v1464_v58 = vadd.f32 %v1404_v4, %v1324_v60  ;;  %v6344_v19 = vrot.slane %v4476_v48, 1  ;;  %v6191_v30 = vrot.slane %v4917_v55, 2  ;;  %v6345_v34 = vrot.slane %v4490_v21, 1 }
 0x178   : > { %v846_v53 = vsel %vm786_vm0, %v843_v44, %v6343_v0  ;;  %3117 = vst.msk [vmem:[%s3567_s15 + $0x130] sm:$0xf] %vm3080_vm2, %v3055_v9  ;;  %v2839_v0 = vrot.slane %v2701_v33, 2  ;;  %v6346_v35 = vrot.slane %v4776_v39, 2  ;;  %v6347_v24 = vrot.slane %v4825_v38, 2 }
 0x179   : > { %v4939_v10 = vadd.f32 %v846_v53, %v575_v45  ;;  %v1672_v62 = vsel %vm786_vm0, %v1669_v26, %v6344_v19  ;;  %v2497_v12 = vsel %vm786_vm0, %v2494_v31, %v6345_v34  ;;  %v6348_v4 = vrot.slane %v4781_v22, 2  ;;  %v4971_v22 = vld [vmem:[%s6088_s1 + $0x3] ss:$0 sm:$0xff]  ;;  %v4983_v45 = vld [vmem:[%s6088_s1 + $0x5] ss:$0 sm:$0xff] }
 0x17a   : > { %v1185_v16 = vsel %vm1132_vm1, %v6347_v24, %v6346_v35  ;;  %v6349_v48 = vrot.slane %v4830_v3, 2  ;;  %v2636_v60 = vadd.f32 %v2497_v12, %v2291_v42  ;;  %v699_v21 = vmul.f32 %v4848_v18, %v406_v29 }
 0x17b   : > { %v1323_v40 = vadd.f32 %v1185_v16, %v4842_v41  ;;  %v6350_v33 = vrot.slane %v4496_v57, 2  ;;  %v4966_v38 = vmul.f32 %v4856_v8, %v406_v29  ;;  %v1403_v3 = vmul.f32 %v4971_v22, %v406_v29  ;;  %v4977_v41 = vld [vmem:[%s6088_s1 + $0x4] ss:$0 sm:$0xff]  ;;  %v476_v16 = vpop.permute.xlu2 %475 }
 0x17c   : > { %v2010_v19 = vsel %vm1132_vm1, %v6349_v48, %v6348_v4  ;;  %v842_v42 = vrot.slane %v699_v21, 1  ;;  %v4986_v9 = vmul.f32 %v4983_v45, %v406_v29  ;;  %v2230_v53 = vmul.f32 %v4222_v43, %v406_v29  ;;  %v4998_v43 = vld [vmem:[%s6088_s1 + $0x8] ss:$0 sm:$0xff] }
 0x17d   : > { %v2150_v23 = vadd.f32 %v2010_v19, %v1805_v46  ;;  %v2842_v39 = vsel %vm1132_vm1, %v2839_v0, %v6350_v33  ;;  %v1528_v46 = vmul.f32 %v4977_v41, %v406_v29  ;;  %v1809_v34 = vadd.f32 %v1672_v62, %v1464_v58 }
 0x17e   : > { %v2981_v57 = vadd.f32 %v2842_v39, %v2636_v60  ;;  %v574_v12 = vmul.f32 %v4930_v7, %v406_v29  ;;  %v2355_v24 = vmul.f32 %v4230_v28, %v406_v29  ;;  %v844_v48 = vsel %vm786_vm0, %v842_v42, %v843_v44 }
 0x17f   : > { %v1668_v35 = vrot.slane %v1528_v46, 1  ;;  %v2290_v60 = vadd.f32 %v2230_v53, %v2150_v23  ;;  %v1463_v21 = vadd.f32 %v1403_v3, %v1323_v40  ;;  %v2700_v62 = vmul.f32 %v4998_v43, %v406_v29 }
 0x180   : > { %v3045_v4 = vadd.f32 %v4287_v11, %v2981_v57  ;;  %v2493_v39 = vrot.slane %v2355_v24, 1  ;;  %v5003_v28 = vadd.f32 %v844_v48, %v574_v12  ;;  %v5007_v58 = vmul.f32 %v4848_v18, %v476_v16 }
 0x181   : > { %v1670_v11 = vsel %vm786_vm0, %v1668_v35, %v1669_v26  ;;  %v5010_v44 = vmul.f32 %v4856_v8, %v476_v16  ;;  %v2838_v23 = vrot.slane %v2700_v62, 2  ;;  %v1417_v3 = vmul.f32 %v4971_v22, %v476_v16  ;;  %v5028_v35 = vld [vmem:[%s6088_s1 + $0x6] ss:$0 sm:$0xff] }
 0x182   : > { %3107 = vst.msk [vmem:[%s3567_s15 + $0xe0] sm:$0xff] %vm3077_vm3, %v3045_v4  ;;  %v2495_v40 = vsel %vm786_vm0, %v2493_v39, %v2494_v31  ;;  %v5015_v46 = vmul.f32 %v4977_v41, %v476_v16  ;;  %v588_v57 = vmul.f32 %v4930_v7, %v476_v16  ;;  %v6187_v42 = vrot.slane %v5007_v58, 1 }
 0x183   : > { %6351 = vst [vmem:[#allocation4_spill] sm:$0xff] %v5010_v44  ;;  %v2635_v29 = vadd.f32 %v2495_v40, %v2290_v60  ;;  %v5020_v26 = vmul.f32 %v4983_v45, %v476_v16  ;;  %v2840_v53 = vsel %vm1132_vm1, %v2838_v23, %v2839_v0  ;;  %v1477_v12 = vadd.f32 %v1417_v3, %v4897_v6  ;;  %v5036_v0 = vld [vmem:[%s6088_s1 + $0x7] ss:$0 sm:$0xff]  ;;  %v5050_v23 = vld [vmem:[%s6089_s2] ss:$0 sm:$0xff] }
 0x184   : > { %v6188_v31 = vrot.slane %v5015_v46, 1  ;;  %v2244_v24 = vmul.f32 %v5028_v35, %v476_v16  ;;  %v1808_v4 = vadd.f32 %v1670_v11, %v1463_v21  ;;  %v994_v60 = vadd.f32 %v6187_v42, %v588_v57  ;;  %v426_v11 = vpop.permute.xlu1 %425 }
 0x185   : > { %6352 = vst [vmem:[#allocation2_spill] sm:$0xff] %v5020_v26  ;;  %v2980_v48 = vadd.f32 %v2840_v53, %v2635_v29  ;;  %v5039_v6 = vmul.f32 %v5036_v0, %v476_v16  ;;  %v6189_v39 = vrot.slane %v5010_v44, 2  ;;  %v6193_v62 = vrot.slane %v5020_v26, 2 }
 0x186   : > { %v2304_v40 = vadd.f32 %v2244_v24, %v4922_v25  ;;  %v5045_v21 = vmul.f32 %v4998_v43, %v476_v16  ;;  %v1822_v29 = vadd.f32 %v6188_v31, %v1477_v12  ;;  %v6354_v53 = vrot.slane %v4471_v5, 2 }
 0x187   : > { %v3044_v3 = vadd.f32 %v5050_v23, %v2980_v48  ;;  %v6190_v57 = vrot.slane %v5039_v6, 1  ;;  %v5063_v16 = vadd.f32 %v6189_v39, %v994_v60  ;;  %v6355_v48 = vrot.slane %v4481_v37, 2 }
 0x188   : > { %6353 = vst [vmem:[#allocation3_spill] sm:$0xff] %v5045_v21  ;;  %v1192_v25 = vsel %vm1132_vm1, %v6192_v32, %v6354_v53  ;;  %v6195_v24 = vrot.slane %v5045_v21, 2  ;;  %v703_v31 = vmul.f32 %v4848_v18, %v426_v11  ;;  %v5078_v60 = vmul.f32 %v4856_v8, %v426_v11 }
 0x189   : > { %v1327_v42 = vadd.f32 %v1192_v25, %v4939_v10  ;;  %v2017_v12 = vsel %vm1132_vm1, %v6191_v30, %v6355_v48  ;;  %3106 = vst.msk [vmem:[%s3567_s15 + $0xd8] sm:$0xff] %vm3077_vm3, %v3044_v3  ;;  %v2649_v5 = vadd.f32 %v6190_v57, %v2304_v40  ;;  %v1407_v39 = vmul.f32 %v4971_v22, %v426_v11 }
 0x18a   : > { %v2154_v53 = vadd.f32 %v2017_v12, %v1809_v34  ;;  %v1532_v10 = vmul.f32 %v4977_v41, %v426_v11  ;;  %v5083_v37 = vmul.f32 %v4983_v45, %v426_v11  ;;  %v2234_v25 = vmul.f32 %v5028_v35, %v426_v11 }
 0x18b   : > { %v5088_v3 = vadd.f32 %v6193_v62, %v1822_v29  ;;  %v2994_v34 = vadd.f32 %v6195_v24, %v2649_v5  ;;  %v848_v40 = vrot.slane %v703_v31, 1  ;;  %v2359_v48 = vmul.f32 %v5036_v0, %v426_v11  ;;  %v421_v5 = vpop.permute.xlu0 %420 }
 0x18c   : > { %v578_v12 = vmul.f32 %v4930_v7, %v426_v11  ;;  %v6205_v57 = vrot.slane %v5078_v60, 2  ;;  %v1674_v33 = vrot.slane %v1532_v10, 1  ;;  %v2294_v30 = vadd.f32 %v2234_v25, %v2154_v53 }
 0x18d   : > { %v3058_v19 = vadd.f32 %v5050_v23, %v2994_v34  ;;  %v6356_v32 = vrot.slane %v4594_v14, 1  ;;  %v2499_v62 = vrot.slane %v2359_v48, 1  ;;  %v2704_v26 = vmul.f32 %v4998_v43, %v426_v11 }
 0x18e   : > { %v1467_v31 = vadd.f32 %v1407_v39, %v1327_v42  ;;  %v6357_v44 = vrot.slane %v4602_v36, 1  ;;  %v6203_v10 = vrot.slane %v5083_v37, 2  ;;  %v6358_v53 = vrot.slane %v4616_v20, 1 }
 0x18f   : > { %v851_v29 = vsel %vm786_vm0, %v848_v40, %v6356_v32  ;;  %3120 = vst.msk [vmem:[%s3567_s15 + $0x148] sm:$0xf] %vm3080_vm2, %v3058_v19  ;;  %v2844_v32 = vrot.slane %v2704_v26, 2  ;;  %v6359_v25 = vrot.slane %v4912_v63, 2  ;;  %v6360_v11 = vrot.slane %v4966_v38, 2 }
 0x190   : > { %v5100_v24 = vadd.f32 %v851_v29, %v578_v12  ;;  %v1677_v21 = vsel %vm786_vm0, %v1674_v33, %v6357_v44  ;;  %v2502_v14 = vsel %vm786_vm0, %v2499_v62, %v6358_v53  ;;  %v6361_v42 = vrot.slane %v4917_v55, 2 }
 0x191   : > { %v1190_v34 = vsel %vm1132_vm1, %v6360_v11, %v6359_v25  ;;  %v6362_v36 = vrot.slane %v4986_v9, 2  ;;  %v2639_v39 = vadd.f32 %v2502_v14, %v2294_v30  ;;  %v702_v20 = vmul.f32 %v4848_v18, %v421_v5  ;;  %v491_v25 = vpop.permute.xlu2 %490 }
 0x192   : > { %v1326_v19 = vadd.f32 %v1190_v34, %v5003_v28  ;;  %v6363_v26 = vrot.slane %v4622_v47, 2  ;;  %v5127_v38 = vmul.f32 %v4856_v8, %v421_v5  ;;  %v1406_v12 = vmul.f32 %v4971_v22, %v421_v5 }
 0x193   : > { %v2015_v44 = vsel %vm1132_vm1, %v6362_v36, %v6361_v42  ;;  %v1531_v55 = vmul.f32 %v4977_v41, %v421_v5  ;;  %v847_v29 = vrot.slane %v702_v20, 1  ;;  %v5132_v30 = vmul.f32 %v4983_v45, %v421_v5 }
 0x194   : > { %v2153_v48 = vadd.f32 %v2015_v44, %v1808_v4  ;;  %v2847_v63 = vsel %vm1132_vm1, %v2844_v32, %v6363_v26  ;;  %v2233_v28 = vmul.f32 %v5028_v35, %v421_v5  ;;  %v1812_v4 = vadd.f32 %v1677_v21, %v1467_v31 }
 0x195   : > { %v2984_v9 = vadd.f32 %v2847_v63, %v2639_v39  ;;  %v577_v47 = vmul.f32 %v4930_v7, %v421_v5  ;;  %v1673_v53 = vrot.slane %v1531_v55, 1  ;;  %v2358_v14 = vmul.f32 %v5036_v0, %v421_v5 }
 0x196   : > { %v849_v34 = vsel %vm786_vm0, %v847_v29, %v848_v40  ;;  %v2293_v36 = vadd.f32 %v2233_v28, %v2153_v48  ;;  %v1466_v44 = vadd.f32 %v1406_v12, %v1326_v19  ;;  %v2703_v26 = vmul.f32 %v4998_v43, %v421_v5 }
 0x197   : > { %v3048_v11 = vadd.f32 %v5050_v23, %v2984_v9  ;;  %v2498_v20 = vrot.slane %v2358_v14, 1  ;;  %v5144_v21 = vadd.f32 %v849_v34, %v577_v47  ;;  %v1675_v31 = vsel %vm786_vm0, %v1673_v53, %v1674_v33 }
 0x198   : > { %v5148_v63 = vmul.f32 %v4848_v18, %v491_v25  ;;  %v5151_v40 = vmul.f32 %v4856_v8, %v491_v25  ;;  %v2843_v19 = vrot.slane %v2703_v26, 2  ;;  %v1420_v12 = vmul.f32 %v4971_v22, %v491_v25 }
 0x199   : > { %3110 = vst.msk [vmem:[%s3567_s15 + $0xf8] sm:$0xff] %vm3077_vm3, %v3048_v11  ;;  %v2500_v48 = vsel %vm786_vm0, %v2498_v20, %v2499_v62  ;;  %v5156_v55 = vmul.f32 %v4977_v41, %v491_v25  ;;  %v591_v9 = vmul.f32 %v4930_v7, %v491_v25  ;;  %v5161_v33 = vmul.f32 %v4983_v45, %v491_v25 }
 0x19a   : > { %v2638_v5 = vadd.f32 %v2500_v48, %v2293_v36  ;;  %v6201_v29 = vrot.slane %v5148_v63, 1  ;;  %v2845_v28 = vsel %vm1132_vm1, %v2843_v19, %v2844_v32  ;;  %v1480_v47 = vadd.f32 %v1420_v12, %v5063_v16  ;;  %v441_v48 = vpop.permute.xlu1 %440 }
 0x19b   : > { %v6200_v62 = vrot.slane %v5156_v55, 1  ;;  %v2247_v53 = vmul.f32 %v5028_v35, %v491_v25  ;;  %v1811_v14 = vadd.f32 %v1675_v31, %v1466_v44  ;;  %v5170_v36 = vmul.f32 %v5036_v0, %v491_v25 }
 0x19c   : > { %v2983_v11 = vadd.f32 %v2845_v28, %v2638_v5  ;;  %v997_v34 = vadd.f32 %v6201_v29, %v591_v9  ;;  %v6198_v20 = vrot.slane %v5151_v40, 2  ;;  %v6202_v26 = vrot.slane %v5161_v33, 2 }
 0x19d   : > { %v2307_v32 = vadd.f32 %v2247_v53, %v5088_v3  ;;  %v5176_v16 = vmul.f32 %v4998_v43, %v491_v25  ;;  %v1825_v31 = vadd.f32 %v6200_v62, %v1480_v47  ;;  %v6199_v19 = vrot.slane %v5170_v36, 1 }
 0x19e   : > { %v3047_v44 = vadd.f32 %v5050_v23, %v2983_v11  ;;  %v6364_v12 = vrot.slane %v4597_v61, 2  ;;  %v5189_v3 = vadd.f32 %v6198_v20, %v997_v34  ;;  %v6365_v28 = vrot.slane %v4607_v1, 2 }
 0x19f   : > { %v6204_v25 = vrot.slane %v5176_v16, 2  ;;  %v2652_v61 = vadd.f32 %v6199_v19, %v2307_v32  ;;  %v706_v11 = vmul.f32 %v4848_v18, %v441_v48  ;;  %v5204_v34 = vmul.f32 %v4856_v8, %v441_v48 }
 0x1a0   : > { %v1197_v5 = vsel %vm1132_vm1, %v6205_v57, %v6364_v12  ;;  %v2022_v47 = vsel %vm1132_vm1, %v6203_v10, %v6365_v28  ;;  %3109 = vst.msk [vmem:[%s3567_s15 + $0xf0] sm:$0xff] %vm3077_vm3, %v3047_v44  ;;  %v1410_v12 = vmul.f32 %v4971_v22, %v441_v48  ;;  %v5209_v1 = vmul.f32 %v4983_v45, %v441_v48 }
 0x1a1   : > { %v1330_v9 = vadd.f32 %v1197_v5, %v5100_v24  ;;  %v2157_v53 = vadd.f32 %v2022_v47, %v1812_v4  ;;  %v1535_v24 = vmul.f32 %v4977_v41, %v441_v48  ;;  %v2237_v5 = vmul.f32 %v5028_v35, %v441_v48 }
 0x1a2   : > { %v5214_v44 = vadd.f32 %v6202_v26, %v1825_v31  ;;  %v2997_v4 = vadd.f32 %v6204_v25, %v2652_v61  ;;  %v853_v32 = vrot.slane %v706_v11, 1  ;;  %v2362_v28 = vmul.f32 %v5036_v0, %v441_v48  ;;  %v436_v61 = vpop.permute.xlu0 %435 }
 0x1a3   : > { %v581_v47 = vmul.f32 %v4930_v7, %v441_v48  ;;  %v6213_v20 = vrot.slane %v5204_v34, 2  ;;  %v1679_v19 = vrot.slane %v1535_v24, 1  ;;  %v2297_v62 = vadd.f32 %v2237_v5, %v2157_v53 }
 0x1a4   : > { %v3061_v29 = vadd.f32 %v5050_v23, %v2997_v4  ;;  %v6366_v39 = vrot.slane %v4720_v27, 1  ;;  %v2504_v26 = vrot.slane %v2362_v28, 1  ;;  %v2707_v10 = vmul.f32 %v4998_v43, %v441_v48 }
 0x1a5   : > { %v1470_v11 = vadd.f32 %v1410_v12, %v1330_v9  ;;  %v6367_v42 = vrot.slane %v4728_v17, 1  ;;  %v6211_v24 = vrot.slane %v5209_v1, 2  ;;  %v6368_v53 = vrot.slane %v4742_v15, 1 }
 0x1a6   : > { %v856_v31 = vsel %vm786_vm0, %v853_v32, %v6366_v39  ;;  %3123 = vst.msk [vmem:[%s3567_s15 + $0x160] sm:$0xf] %vm3080_vm2, %v3061_v29  ;;  %v2849_v39 = vrot.slane %v2707_v10, 2  ;;  %v6369_v5 = vrot.slane %v5078_v60, 2  ;;  %v6370_v48 = vrot.slane %v5127_v38, 2 }
 0x1a7   : > { %v5226_v25 = vadd.f32 %v856_v31, %v581_v47  ;;  %v1682_v57 = vsel %vm786_vm0, %v1679_v19, %v6367_v42  ;;  %v2507_v27 = vsel %vm786_vm0, %v2504_v26, %v6368_v53  ;;  %v6371_v9 = vrot.slane %v5083_v37, 2 }
 0x1a8   : > { %v1195_v4 = vsel %vm1132_vm1, %v6370_v48, %v6369_v5  ;;  %v6372_v17 = vrot.slane %v5132_v30, 2  ;;  %v2642_v12 = vadd.f32 %v2507_v27, %v2297_v62  ;;  %v705_v15 = vmul.f32 %v4848_v18, %v436_v61  ;;  %v506_v5 = vpop.permute.xlu2 %505 }
 0x1a9   : > { %v1329_v29 = vadd.f32 %v1195_v4, %v5144_v21  ;;  %v6373_v10 = vrot.slane %v4748_v59, 2  ;;  %v5253_v38 = vmul.f32 %v4856_v8, %v436_v61  ;;  %v1409_v47 = vmul.f32 %v4971_v22, %v436_v61 }
 0x1aa   : > { %v2020_v42 = vsel %vm1132_vm1, %v6372_v17, %v6371_v9  ;;  %v1534_v37 = vmul.f32 %v4977_v41, %v436_v61  ;;  %v852_v31 = vrot.slane %v705_v15, 1  ;;  %v5258_v62 = vmul.f32 %v4983_v45, %v436_v61 }
 0x1ab   : > { %v2156_v28 = vadd.f32 %v2020_v42, %v1811_v14  ;;  %v2852_v60 = vsel %vm1132_vm1, %v2849_v39, %v6373_v10  ;;  %v2236_v21 = vmul.f32 %v5028_v35, %v436_v61  ;;  %v1815_v14 = vadd.f32 %v1682_v57, %v1470_v11 }
 0x1ac   : > { %v2987_v30 = vadd.f32 %v2852_v60, %v2642_v12  ;;  %v580_v59 = vmul.f32 %v4930_v7, %v436_v61  ;;  %v1678_v53 = vrot.slane %v1534_v37, 1  ;;  %v2361_v27 = vmul.f32 %v5036_v0, %v436_v61 }
 0x1ad   : > { %v854_v4 = vsel %vm786_vm0, %v852_v31, %v853_v32  ;;  %v2296_v17 = vadd.f32 %v2236_v21, %v2156_v28  ;;  %v1469_v42 = vadd.f32 %v1409_v47, %v1329_v29  ;;  %v2706_v10 = vmul.f32 %v4998_v43, %v436_v61 }
 0x1ae   : > { %v3051_v48 = vadd.f32 %v5050_v23, %v2987_v30  ;;  %v2503_v15 = vrot.slane %v2361_v27, 1  ;;  %v5270_v57 = vadd.f32 %v854_v4, %v580_v59  ;;  %v1680_v11 = vsel %vm786_vm0, %v1678_v53, %v1679_v19 }
 0x1af   : > { %v5274_v60 = vmul.f32 %v4848_v18, %v506_v5  ;;  %v5277_v32 = vmul.f32 %v4856_v8, %v506_v5  ;;  %v2848_v29 = vrot.slane %v2706_v10, 2  ;;  %v1423_v47 = vmul.f32 %v4971_v22, %v506_v5 }
 0x1b0   : > { %3113 = vst.msk [vmem:[%s3567_s15 + $0x110] sm:$0xff] %vm3077_vm3, %v3051_v48  ;;  %v2505_v28 = vsel %vm786_vm0, %v2503_v15, %v2504_v26  ;;  %v5282_v37 = vmul.f32 %v4977_v41, %v506_v5  ;;  %v594_v30 = vmul.f32 %v4930_v7, %v506_v5  ;;  %v5287_v19 = vmul.f32 %v4983_v45, %v506_v5 }
 0x1b1   : > { %v2641_v61 = vadd.f32 %v2505_v28, %v2296_v17  ;;  %v6209_v31 = vrot.slane %v5274_v60, 1  ;;  %v2850_v21 = vsel %vm1132_vm1, %v2848_v29, %v2849_v39  ;;  %v1483_v59 = vadd.f32 %v1423_v47, %v5189_v3  ;;  %v456_v28 = vpop.permute.xlu1 %455 }
 0x1b2   : > { %v6208_v26 = vrot.slane %v5282_v37, 1  ;;  %v2250_v53 = vmul.f32 %v5028_v35, %v506_v5  ;;  %v1814_v27 = vadd.f32 %v1680_v11, %v1469_v42  ;;  %v5296_v17 = vmul.f32 %v5036_v0, %v506_v5 }
 0x1b3   : > { %v2986_v48 = vadd.f32 %v2850_v21, %v2641_v61  ;;  %v1000_v4 = vadd.f32 %v6209_v31, %v594_v30  ;;  %v6206_v15 = vrot.slane %v5277_v32, 2  ;;  %v6210_v10 = vrot.slane %v5287_v19, 2 }
 0x1b4   : > { %v2310_v39 = vadd.f32 %v2250_v53, %v5214_v44  ;;  %v5302_v3 = vmul.f32 %v4998_v43, %v506_v5  ;;  %v1828_v11 = vadd.f32 %v6208_v26, %v1483_v59  ;;  %v6207_v29 = vrot.slane %v5296_v17, 1 }
 0x1b5   : > { %v3050_v42 = vadd.f32 %v5050_v23, %v2986_v48  ;;  %v6374_v47 = vrot.slane %v4723_v2, 2  ;;  %v5315_v44 = vadd.f32 %v6206_v15, %v1000_v4  ;;  %v6375_v21 = vrot.slane %v4733_v52, 2 }
 0x1b6   : > { %v6212_v5 = vrot.slane %v5302_v3, 2  ;;  %v2655_v2 = vadd.f32 %v6207_v29, %v2310_v39  ;;  %v709_v48 = vmul.f32 %v4848_v18, %v456_v28  ;;  %v5330_v4 = vmul.f32 %v4856_v8, %v456_v28 }
 0x1b7   : > { %v1202_v61 = vsel %vm1132_vm1, %v6213_v20, %v6374_v47  ;;  %v2027_v59 = vsel %vm1132_vm1, %v6211_v24, %v6375_v21  ;;  %3112 = vst.msk [vmem:[%s3567_s15 + $0x108] sm:$0xff] %vm3077_vm3, %v3050_v42  ;;  %v1413_v47 = vmul.f32 %v4971_v22, %v456_v28  ;;  %v5335_v52 = vmul.f32 %v4983_v45, %v456_v28 }
 0x1b8   : > { %v1333_v30 = vadd.f32 %v1202_v61, %v5226_v25  ;;  %v2160_v53 = vadd.f32 %v2027_v59, %v1815_v14  ;;  %v1538_v25 = vmul.f32 %v4977_v41, %v456_v28  ;;  %v2240_v61 = vmul.f32 %v5028_v35, %v456_v28 }
 0x1b9   : > { %v5340_v42 = vadd.f32 %v6210_v10, %v1828_v11  ;;  %v3000_v14 = vadd.f32 %v6212_v5, %v2655_v2  ;;  %v858_v39 = vrot.slane %v709_v48, 1  ;;  %v2365_v21 = vmul.f32 %v5036_v0, %v456_v28  ;;  %v451_v2 = vpop.permute.xlu0 %450 }
 0x1ba   : > { %v584_v59 = vmul.f32 %v4930_v7, %v456_v28  ;;  %v1684_v29 = vrot.slane %v1538_v25, 1  ;;  %v2300_v26 = vadd.f32 %v2240_v61, %v2160_v53  ;;  %v6376_v12 = vrot.slane %v4851_v51, 1 }
 0x1bb   : > { %v3064_v31 = vadd.f32 %v5050_v23, %v3000_v14  ;;  %v2509_v10 = vrot.slane %v2365_v21, 1  ;;  %v2710_v24 = vmul.f32 %v4998_v43, %v456_v28  ;;  %v1473_v48 = vadd.f32 %v1413_v47, %v1333_v30 }
 0x1bc   : > { %v861_v11 = vsel %vm786_vm0, %v858_v39, %v6376_v12  ;;  %v6377_v9 = vrot.slane %v4864_v13, 1  ;;  %v6217_v15 = vrot.slane %v5335_v52, 2  ;;  %v6378_v53 = vrot.slane %v4878_v49, 1 }
 0x1bd   : > { %v990_v5 = vadd.f32 %v861_v11, %v584_v59  ;;  %3126 = vst.msk [vmem:[%s3567_s15 + $0x178] sm:$0xf] %vm3080_vm2, %v3064_v31  ;;  %v2854_v25 = vrot.slane %v2710_v24, 2  ;;  %v6379_v12 = vrot.slane %v5204_v34, 2  ;;  %v6380_v28 = vrot.slane %v5253_v38, 2 }
 0x1be   : > { %v1687_v20 = vsel %vm786_vm0, %v1684_v29, %v6377_v9  ;;  %v2512_v51 = vsel %vm786_vm0, %v2509_v10, %v6378_v53  ;;  %v6381_v30 = vrot.slane %v5209_v1, 2  ;;  %v6382_v13 = vrot.slane %v5258_v62, 2 }
 0x1bf   : > { %v1200_v61 = vsel %vm1132_vm1, %v6380_v28, %v6379_v12  ;;  %v2645_v47 = vadd.f32 %v2512_v51, %v2300_v26  ;;  %v708_v49 = vmul.f32 %v4848_v18, %v451_v2  ;;  %v6383_v24 = vrot.slane %v4884_v56, 2  ;;  %v5387_v51 = vpop.permute.xlu2 %520 }
 0x1c0   : > { %v2025_v9 = vsel %vm1132_vm1, %v6382_v13, %v6381_v30  ;;  %v1332_v31 = vadd.f32 %v1200_v61, %v5270_v57  ;;  %v5377_v38 = vmul.f32 %v4856_v8, %v451_v2  ;;  %v1412_v21 = vmul.f32 %v4971_v22, %v451_v2 }
 0x1c1   : > { %v2159_v14 = vadd.f32 %v2025_v9, %v1814_v27  ;;  %v2857_v34 = vsel %vm1132_vm1, %v2854_v25, %v6383_v24  ;;  %v1537_v1 = vmul.f32 %v4977_v41, %v451_v2  ;;  %v857_v59 = vrot.slane %v708_v49, 1 }
 0x1c2   : > { %v2990_v62 = vadd.f32 %v2857_v34, %v2645_v47  ;;  %v5382_v26 = vmul.f32 %v4983_v45, %v451_v2  ;;  %v2239_v57 = vmul.f32 %v5028_v35, %v451_v2  ;;  %v1818_v27 = vadd.f32 %v1687_v20, %v1473_v48 }
 0x1c3   : > { %v583_v56 = vmul.f32 %v4930_v7, %v451_v2  ;;  %v1683_v11 = vrot.slane %v1537_v1, 1  ;;  %v2364_v53 = vmul.f32 %v5036_v0, %v451_v2  ;;  %v859_v28 = vsel %vm786_vm0, %v857_v59, %v858_v39 }
 0x1c4   : > { %v3054_v12 = vadd.f32 %v5050_v23, %v2990_v62  ;;  %v1472_v61 = vadd.f32 %v1412_v21, %v1332_v31  ;;  %v2299_v30 = vadd.f32 %v2239_v57, %v2159_v14  ;;  %v2709_v20 = vmul.f32 %v4998_v43, %v451_v2 }
 0x1c5   : > { %v1685_v9 = vsel %vm786_vm0, %v1683_v11, %v1684_v29  ;;  %v2508_v47 = vrot.slane %v2364_v53, 1  ;;  %v989_v48 = vadd.f32 %v859_v28, %v583_v56  ;;  %v2028_v49 = vrot.slane %v5382_v26, 2 }
 0x1c6   : > { %3116 = vst.msk [vmem:[%s3567_s15 + $0x128] sm:$0xff] %vm3077_vm3, %v3054_v12  ;;  %v5399_v24 = vmul.f32 %v4848_v18, %v5387_v51  ;;  %v1426_v39 = vmul.f32 %v4971_v22, %v5387_v51  ;;  %v2853_v14 = vrot.slane %v2709_v20, 2  ;;  %v5406_v29 = vmul.f32 %v4977_v41, %v5387_v51 }
 0x1c7   : > { %v2510_v31 = vsel %vm786_vm0, %v2508_v47, %v2509_v10  ;;  %v5410_v2 = vmul.f32 %v4983_v45, %v5387_v51  ;;  %v1817_v34 = vadd.f32 %v1685_v9, %v1472_v61  ;;  %v2253_v62 = vmul.f32 %v5028_v35, %v5387_v51 }
 0x1c8   : > { %v2644_v21 = vadd.f32 %v2510_v31, %v2299_v30  ;;  %v1486_v1 = vadd.f32 %v1426_v39, %v5315_v44  ;;  %v2855_v59 = vsel %vm1132_vm1, %v2853_v14, %v2854_v25  ;;  %v5418_v10 = vmul.f32 %v4930_v7, %v5387_v51  ;;  %v471_v25 = vpop.permute.xlu1 %470 }
 0x1c9   : > { %v6215_v26 = vrot.slane %v5406_v29, 1  ;;  %v5423_v57 = vmul.f32 %v5036_v0, %v5387_v51  ;;  %v2313_v44 = vadd.f32 %v2253_v62, %v5340_v42  ;;  %v5429_v53 = vmul.f32 %v4998_v43, %v5387_v51 }
 0x1ca   : > { %v2989_v56 = vadd.f32 %v2855_v59, %v2644_v21  ;;  %v6219_v12 = vrot.slane %v5410_v2, 2  ;;  %v6385_v61 = vrot.slane %v4859_v54, 2  ;;  %v6386_v30 = vrot.slane %v5330_v4, 2 }
 0x1cb   : > { %6384 = vst [vmem:[#allocation5_spill] sm:$0xff] %v5429_v53  ;;  %v6214_v28 = vrot.slane %v5423_v57, 1  ;;  %v6387_v47 = vrot.slane %v4869_v50, 2  ;;  %v1831_v39 = vadd.f32 %v6215_v26, %v1486_v1  ;;  %v6216_v21 = vrot.slane %v5429_v53, 2 }
 0x1cc   : > { %v1207_v9 = vsel %vm1132_vm1, %v6386_v30, %v6385_v61  ;;  %v3053_v20 = vadd.f32 %v5050_v23, %v2989_v56  ;;  %v712_v62 = vmul.f32 %v4848_v18, %v471_v25  ;;  %v5451_v50 = vmul.f32 %v4856_v8, %v471_v25 }
 0x1cd   : > { %v2032_v42 = vsel %vm1132_vm1, %v6217_v15, %v6387_v47  ;;  %v1336_v31 = vadd.f32 %v1207_v9, %v990_v5  ;;  %v2658_v54 = vadd.f32 %v6214_v28, %v2313_v44  ;;  %v1416_v59 = vmul.f32 %v4971_v22, %v471_v25  ;;  %v466_v15 = vpop.permute.xlu0 %465 }
 0x1ce   : > { %v2163_v14 = vadd.f32 %v2032_v42, %v1818_v27  ;;  %3115 = vst.msk [vmem:[%s3567_s15 + $0x120] sm:$0xff] %vm3077_vm3, %v3053_v20  ;;  %v1541_v56 = vmul.f32 %v4977_v41, %v471_v25  ;;  %v5458_v1 = vmul.f32 %v4983_v45, %v471_v25  ;;  %v2243_v5 = vmul.f32 %v5028_v35, %v471_v25 }
 0x1cf   : > { %v3003_v27 = vadd.f32 %v6216_v21, %v2658_v54  ;;  %v587_v44 = vmul.f32 %v4930_v7, %v471_v25  ;;  %v863_v61 = vrot.slane %v712_v62, 1  ;;  %v2368_v30 = vmul.f32 %v5036_v0, %v471_v25 }
 0x1d0   : > { %v2176_v9 = vadd.f32 %v6219_v12, %v1831_v39  ;;  %v1209_v47 = vrot.slane %v5451_v50, 2  ;;  %v1689_v42 = vrot.slane %v1541_v56, 1  ;;  %v2303_v20 = vadd.f32 %v2243_v5, %v2163_v14 }
 0x1d1   : > { %v3067_v28 = vadd.f32 %v5050_v23, %v3003_v27  ;;  %v6388_v26 = vrot.slane %v5007_v58, 1  ;;  %v2514_v54 = vrot.slane %v2368_v30, 1  ;;  %v2713_v21 = vmul.f32 %v4998_v43, %v471_v25  ;;  %v6394_v27 = vld [vmem:[#allocation3_spill] sm:$0xff] }
 0x1d2   : > { %v1476_v13 = vadd.f32 %v1416_v59, %v1336_v31  ;;  %v6389_v53 = vrot.slane %v5015_v46, 1  ;;  %v2034_v12 = vrot.slane %v5458_v1, 2  ;;  %v6390_v14 = vrot.slane %v5039_v6, 1 }
 0x1d3   : > { %v866_v11 = vsel %vm786_vm0, %v863_v61, %v6388_v26  ;;  %3129 = vst.msk [vmem:[%s3567_s15 + $0x190] sm:$0xf] %vm3080_vm2, %v3067_v28  ;;  %v2859_v56 = vrot.slane %v2713_v21, 2  ;;  %v6391_v26 = vrot.slane %v5330_v4, 2  ;;  %v6392_v25 = vrot.slane %v5377_v38, 2 }
 0x1d4   : > { %v993_v62 = vadd.f32 %v866_v11, %v587_v44  ;;  %v1692_v39 = vsel %vm786_vm0, %v1689_v42, %v6389_v53  ;;  %v2517_v58 = vsel %vm786_vm0, %v2514_v54, %v6390_v14  ;;  %v6393_v31 = vrot.slane %v5335_v52, 2 }
 0x1d5   : > { %v1205_v11 = vsel %vm1132_vm1, %v6392_v25, %v6391_v26  ;;  %v2648_v53 = vadd.f32 %v2517_v58, %v2303_v20  ;;  %v711_v28 = vmul.f32 %v4848_v18, %v466_v15  ;;  %v6395_v6 = vrot.slane %v6394_v27, 2  ;;  %v5505_v26 = vpop.permute.xlu2 %535 }
 0x1d6   : > { %v2030_v46 = vsel %vm1132_vm1, %v2028_v49, %v6393_v31  ;;  %v1335_v59 = vadd.f32 %v1205_v11, %v989_v48  ;;  %v5495_v21 = vmul.f32 %v4856_v8, %v466_v15  ;;  %v1415_v4 = vmul.f32 %v4971_v22, %v466_v15 }
 0x1d7   : > { %v2162_v5 = vadd.f32 %v2030_v46, %v1817_v34  ;;  %v2862_v44 = vsel %vm1132_vm1, %v2859_v56, %v6395_v6  ;;  %v1540_v38 = vmul.f32 %v4977_v41, %v466_v15  ;;  %v862_v52 = vrot.slane %v711_v28, 1 }
 0x1d8   : > { %v2993_v30 = vadd.f32 %v2862_v44, %v2648_v53  ;;  %v5500_v49 = vmul.f32 %v4983_v45, %v466_v15  ;;  %v2242_v48 = vmul.f32 %v5028_v35, %v466_v15  ;;  %v1821_v34 = vadd.f32 %v1692_v39, %v1476_v13 }
 0x1d9   : > { %v586_v20 = vmul.f32 %v4930_v7, %v466_v15  ;;  %v1688_v14 = vrot.slane %v1540_v38, 1  ;;  %v2367_v58 = vmul.f32 %v5036_v0, %v466_v15  ;;  %v864_v11 = vsel %vm786_vm0, %v862_v52, %v863_v61 }
 0x1da   : > { %v3057_v25 = vadd.f32 %v5050_v23, %v2993_v30  ;;  %v1208_v31 = vrot.slane %v5495_v21, 2  ;;  %v2302_v46 = vadd.f32 %v2242_v48, %v2162_v5  ;;  %v1475_v53 = vadd.f32 %v1415_v4, %v1335_v59  ;;  %v486_v30 = vpop.permute.xlu1 %485 }
 0x1db   : > { %v2033_v28 = vrot.slane %v5500_v49, 2  ;;  %v2513_v27 = vrot.slane %v2367_v58, 1  ;;  %v2712_v13 = vmul.f32 %v4998_v43, %v466_v15  ;;  %v992_v39 = vadd.f32 %v864_v11, %v586_v20  ;;  %v6396_v15 = vld [vmem:[#allocation4_spill] sm:$0xff]  ;;  %v6398_v20 = vld [vmem:[#allocation2_spill] sm:$0xff] }
 0x1dc   : > { %3119 = vst.msk [vmem:[%s3567_s15 + $0x140] sm:$0xff] %vm3077_vm3, %v3057_v25  ;;  %v2256_v6 = vmul.f32 %v5028_v35, %v5505_v26  ;;  %v5518_v44 = vmul.f32 %v5036_v0, %v5505_v26  ;;  %v5522_v61 = vmul.f32 %v4998_v43, %v5505_v26  ;;  %v1690_v59 = vsel %vm786_vm0, %v1688_v14, %v1689_v42 }
 0x1dd   : > { %v2515_v5 = vsel %vm786_vm0, %v2513_v27, %v2514_v54  ;;  %v2858_v21 = vrot.slane %v2712_v13, 2  ;;  %v6397_v4 = vrot.slane %v6396_v15, 2  ;;  %v6399_v58 = vrot.slane %v6398_v20, 2 }
 0x1de   : > { %v2647_v52 = vadd.f32 %v2515_v5, %v2302_v46  ;;  %v2316_v49 = vadd.f32 %v2256_v6, %v2176_v9  ;;  %v6228_v48 = vrot.slane %v5518_v44, 1  ;;  %v6220_v14 = vrot.slane %v5522_v61, 2 }
 0x1df   : > { %v1212_v38 = vsel %vm1132_vm1, %v1209_v47, %v6397_v4  ;;  %v2037_v42 = vsel %vm1132_vm1, %v2034_v12, %v6399_v58  ;;  %v2860_v54 = vsel %vm1132_vm1, %v2858_v21, %v2859_v56  ;;  %v715_v9 = vmul.f32 %v4848_v18, %v486_v30 }
 0x1e0   : > { %v1339_v25 = vadd.f32 %v1212_v38, %v993_v62  ;;  %v2166_v11 = vadd.f32 %v2037_v42, %v1821_v34  ;;  %v2992_v27 = vadd.f32 %v2860_v54, %v2647_v52  ;;  %v2661_v46 = vadd.f32 %v6228_v48, %v2316_v49 }
 0x1e1   : > { %v5543_v13 = vmul.f32 %v4856_v8, %v486_v30  ;;  %v1419_v6 = vmul.f32 %v4971_v22, %v486_v30  ;;  %v1544_v5 = vmul.f32 %v4977_v41, %v486_v30  ;;  %v5548_v56 = vmul.f32 %v4983_v45, %v486_v30 }
 0x1e2   : > { %v2246_v62 = vmul.f32 %v5028_v35, %v486_v30  ;;  %v1820_v34 = vadd.f32 %v1690_v59, %v1475_v53  ;;  %v3056_v21 = vadd.f32 %v5050_v23, %v2992_v27  ;;  %v3006_v15 = vadd.f32 %v6220_v14, %v2661_v46  ;;  %v481_v27 = vpop.permute.xlu0 %480 }
 0x1e3   : > { %v868_v4 = vrot.slane %v715_v9, 1  ;;  %v590_v38 = vmul.f32 %v4930_v7, %v486_v30  ;;  %v1214_v52 = vrot.slane %v5543_v13, 2  ;;  %v1479_v49 = vadd.f32 %v1419_v6, %v1339_v25 }
 0x1e4   : > { %v1694_v20 = vrot.slane %v1544_v5, 1  ;;  %3118 = vst.msk [vmem:[%s3567_s15 + $0x138] sm:$0xff] %vm3077_vm3, %v3056_v21  ;;  %v3070_v58 = vadd.f32 %v5050_v23, %v3006_v15  ;;  %v6400_v42 = vrot.slane %v5148_v63, 1  ;;  %v2371_v59 = vmul.f32 %v5036_v0, %v486_v30 }
 0x1e5   : > { %v2716_v54 = vmul.f32 %v4998_v43, %v486_v30  ;;  %v6401_v46 = vrot.slane %v5156_v55, 1  ;;  %v2039_v25 = vrot.slane %v5548_v56, 2  ;;  %v2306_v6 = vadd.f32 %v2246_v62, %v2166_v11 }
 0x1e6   : > { %v871_v53 = vsel %vm786_vm0, %v868_v4, %v6400_v42  ;;  %v1210_v5 = vsel %vm1132_vm1, %v1208_v31, %v1209_v47  ;;  %3132 = vst.msk [vmem:[%s3567_s15 + $0x1a8] sm:$0xf] %vm3080_vm2, %v3070_v58  ;;  %v2519_v21 = vrot.slane %v2371_v59, 1  ;;  %v2035_v30 = vsel %vm1132_vm1, %v2033_v28, %v2034_v12 }
 0x1e7   : > { %v1697_v9 = vsel %vm786_vm0, %v1694_v20, %v6401_v46  ;;  %v2864_v15 = vrot.slane %v2716_v54, 2  ;;  %v996_v42 = vadd.f32 %v871_v53, %v590_v38  ;;  %v1338_v55 = vadd.f32 %v1210_v5, %v992_v39 }
 0x1e8   : > { %v1824_v63 = vadd.f32 %v1697_v9, %v1479_v49  ;;  %v2165_v14 = vadd.f32 %v2035_v30, %v1820_v34  ;;  %v714_v46 = vmul.f32 %v4848_v18, %v481_v27  ;;  %v6402_v11 = vrot.slane %v5170_v36, 1 }
 0x1e9   : > { %v5581_v47 = vmul.f32 %v4856_v8, %v481_v27  ;;  %v1418_v31 = vmul.f32 %v4971_v22, %v481_v27  ;;  %v1543_v62 = vmul.f32 %v4977_v41, %v481_v27  ;;  %v589_v1 = vmul.f32 %v4930_v7, %v481_v27 }
 0x1ea   : > { %v2522_v50 = vsel %vm786_vm0, %v2519_v21, %v6402_v11  ;;  %v867_v12 = vrot.slane %v714_v46, 1  ;;  %v5587_v28 = vmul.f32 %v4983_v45, %v481_v27  ;;  %v6403_v18 = vrot.slane %v5176_v16, 2  ;;  %v5600_v11 = vpop.permute.xlu2 %1367 }
 0x1eb   : > { %v2651_v49 = vadd.f32 %v2522_v50, %v2306_v6  ;;  %v1693_v39 = vrot.slane %v1543_v62, 1  ;;  %v2245_v34 = vmul.f32 %v5028_v35, %v481_v27  ;;  %v2370_v8 = vmul.f32 %v5036_v0, %v481_v27 }
 0x1ec   : > { %v2867_v36 = vsel %vm1132_vm1, %v2864_v15, %v6403_v18  ;;  %v869_v58 = vsel %vm786_vm0, %v867_v12, %v868_v4  ;;  %v1478_v53 = vadd.f32 %v1418_v31, %v1338_v55  ;;  %v2715_v7 = vmul.f32 %v4998_v43, %v481_v27 }
 0x1ed   : > { %v2996_v38 = vadd.f32 %v2867_v36, %v2651_v49  ;;  %v1213_v59 = vrot.slane %v5581_v47, 2  ;;  %v1695_v54 = vsel %vm786_vm0, %v1693_v39, %v1694_v20  ;;  %v2305_v9 = vadd.f32 %v2245_v34, %v2165_v14  ;;  %v5609_v20 = vld [vmem:[%s6088_s1 + $0x2] ss:$0 sm:$0xff] }
 0x1ee   : > { %v2518_v16 = vrot.slane %v2370_v8, 1  ;;  %v995_v5 = vadd.f32 %v869_v58, %v589_v1  ;;  %v2038_v30 = vrot.slane %v5587_v28, 2  ;;  %v2863_v46 = vrot.slane %v2715_v7, 2  ;;  %v501_v28 = vpop.permute.xlu1 %500 }
 0x1ef   : > { %v3060_v6 = vadd.f32 %v5050_v23, %v2996_v38  ;;  %v6404_v55 = vrot.slane %v5399_v24, 1  ;;  %v5613_v14 = vmul.f32 %v5609_v20, %v5387_v51  ;;  %v5617_v50 = vmul.f32 %v4977_v41, %v5505_v26 }
 0x1f0   : > { %v2520_v4 = vsel %vm786_vm0, %v2518_v16, %v2519_v21  ;;  %v1823_v21 = vadd.f32 %v1695_v54, %v1478_v53  ;;  %v5625_v62 = vmul.f32 %v4983_v45, %v5505_v26  ;;  %v2865_v49 = vsel %vm1132_vm1, %v2863_v46, %v2864_v15  ;;  %v5658_v16 = vld [vmem:[%s6088_s1 + $0x1] ss:$0 sm:$0xff] }
 0x1f1   : > { %v1003_v27 = vadd.f32 %v6404_v55, %v5418_v10  ;;  %3122 = vst.msk [vmem:[%s3567_s15 + $0x158] sm:$0xff] %vm3077_vm3, %v3060_v6  ;;  %v2650_v31 = vadd.f32 %v2520_v4, %v2305_v9  ;;  %v1429_v10 = vmul.f32 %v4971_v22, %v5505_v26  ;;  %v6227_v51 = vrot.slane %v5613_v14, 2 }
 0x1f2   : > { %v2259_v1 = vmul.f32 %v5028_v35, %v5600_v11  ;;  %v5633_v12 = vmul.f32 %v5036_v0, %v5600_v11  ;;  %v6221_v36 = vrot.slane %v5617_v50, 1  ;;  %v5638_v39 = vmul.f32 %v4998_v43, %v5600_v11 }
 0x1f3   : > { %v2995_v18 = vadd.f32 %v2865_v49, %v2650_v31  ;;  %v6405_v15 = vrot.slane %v5151_v40, 2  ;;  %v1349_v8 = vadd.f32 %v6227_v51, %v1003_v27  ;;  %v6226_v38 = vrot.slane %v5625_v62, 2  ;;  %v5678_v49 = vld [vmem:[%s6088_s1] ss:$0 sm:$0xff] }
 0x1f4   : > { %v6406_v53 = vrot.slane %v5161_v33, 2  ;;  %v6225_v40 = vrot.slane %v5633_v12, 1  ;;  %v718_v6 = vmul.f32 %v5658_v16, %v501_v28  ;;  %v1422_v33 = vmul.f32 %v4971_v22, %v501_v28 }
 0x1f5   : > { %v1217_v34 = vsel %vm1132_vm1, %v1214_v52, %v6405_v15  ;;  %v3059_v54 = vadd.f32 %v5050_v23, %v2995_v18  ;;  %v1489_v46 = vadd.f32 %v1429_v10, %v1349_v8  ;;  %v1547_v4 = vmul.f32 %v4977_v41, %v501_v28 }
 0x1f6   : > { %v1342_v58 = vadd.f32 %v1217_v34, %v996_v42  ;;  %v2042_v7 = vsel %vm1132_vm1, %v2039_v25, %v6406_v53  ;;  %v5662_v42 = vmul.f32 %v5609_v20, %v501_v28  ;;  %v6224_v55 = vrot.slane %v5638_v39, 2 }
 0x1f7   : > { %v2169_v9 = vadd.f32 %v2042_v7, %v1824_v63  ;;  %3121 = vst.msk [vmem:[%s3567_s15 + $0x150] sm:$0xff] %vm3077_vm3, %v3059_v54  ;;  %v873_v63 = vrot.slane %v718_v6, 1  ;;  %v2249_v27 = vmul.f32 %v5028_v35, %v501_v28  ;;  %v5671_v31 = vmul.f32 %v5036_v0, %v501_v28 }
 0x1f8   : > { %v1834_v10 = vadd.f32 %v6221_v36, %v1489_v46  ;;  %v593_v22 = vmul.f32 %v5678_v49, %v501_v28  ;;  %v1482_v41 = vadd.f32 %v1422_v33, %v1342_v58  ;;  %v1699_v18 = vrot.slane %v1547_v4, 1  ;;  %v496_v4 = vpop.permute.xlu0 %495 }
 0x1f9   : > { %v1219_v15 = vrot.slane %v5662_v42, 2  ;;  %v5683_v34 = vmul.f32 %v4983_v45, %v501_v28  ;;  %v2309_v8 = vadd.f32 %v2249_v27, %v2169_v9  ;;  %v2524_v53 = vrot.slane %v5671_v31, 1 }
 0x1fa   : > { %v2179_v7 = vadd.f32 %v6226_v38, %v1834_v10  ;;  %v6407_v54 = vrot.slane %v5274_v60, 1  ;;  %v6408_v46 = vrot.slane %v5282_v37, 1  ;;  %v2719_v33 = vmul.f32 %v4998_v43, %v501_v28 }
 0x1fb   : > { %v6409_v45 = vrot.slane %v5296_v17, 1  ;;  %v1215_v60 = vsel %vm1132_vm1, %v1213_v59, %v1214_v52  ;;  %v2040_v37 = vsel %vm1132_vm1, %v2038_v30, %v2039_v25  ;;  %v2044_v10 = vrot.slane %v5683_v34, 2  ;;  %v5721_v25 = vld [vmem:[%s6088_s1 + $0x3] ss:$0 sm:$0xff]  ;;  %v5727_v59 = vld [vmem:[%s6088_s1 + $0x4] ss:$0 sm:$0xff] }
 0x1fc   : > { %v876_v6 = vsel %vm786_vm0, %v873_v63, %v6407_v54  ;;  %v1702_v58 = vsel %vm786_vm0, %v1699_v18, %v6408_v46  ;;  %v2319_v27 = vadd.f32 %v2259_v1, %v2179_v7  ;;  %v2869_v43 = vrot.slane %v2719_v33, 2  ;;  %v5733_v1 = vld [vmem:[%s6088_s1 + $0x5] ss:$0 sm:$0xff] }
 0x1fd   : > { %v5695_v36 = vadd.f32 %v1702_v58, %v1482_v41  ;;  %v2527_v9 = vsel %vm786_vm0, %v2524_v53, %v6409_v45  ;;  %v1341_v28 = vadd.f32 %v1215_v60, %v995_v5  ;;  %v2168_v41 = vadd.f32 %v2040_v37, %v1823_v21 }
 0x1fe   : > { %v2654_v31 = vadd.f32 %v2527_v9, %v2309_v8  ;;  %v717_v17 = vmul.f32 %v5658_v16, %v496_v4  ;;  %v5711_v54 = vmul.f32 %v5609_v20, %v496_v4  ;;  %v2664_v13 = vadd.f32 %v6225_v40, %v2319_v27 }
 0x1ff   : > { %v6410_v52 = vrot.slane %v5302_v3, 2  ;;  %v1421_v47 = vmul.f32 %v5721_v25, %v496_v4  ;;  %v1546_v5 = vmul.f32 %v5727_v59, %v496_v4  ;;  %v999_v30 = vadd.f32 %v876_v6, %v593_v22 }
 0x200   : > { %v872_v3 = vrot.slane %v717_v17, 1  ;;  %v5736_v8 = vmul.f32 %v5733_v1, %v496_v4  ;;  %v3009_v7 = vadd.f32 %v6224_v55, %v2664_v13  ;;  %v2248_v33 = vmul.f32 %v5028_v35, %v496_v4 }
 0x201   : > { %v2872_v56 = vsel %vm1132_vm1, %v2869_v43, %v6410_v52  ;;  %v1481_v46 = vadd.f32 %v1421_v47, %v1341_v28  ;;  %v1698_v58 = vrot.slane %v1546_v5, 1  ;;  %v592_v6 = vmul.f32 %v5678_v49, %v496_v4 }
 0x202   : > { %v2999_v21 = vadd.f32 %v2872_v56, %v2654_v31  ;;  %v874_v45 = vsel %vm786_vm0, %v872_v3, %v873_v63  ;;  %v2373_v9 = vmul.f32 %v5036_v0, %v496_v4  ;;  %v3073_v60 = vadd.f32 %v5050_v23, %v3009_v7  ;;  %v5756_v63 = vld [vmem:[%s6088_s1 + $0x8] ss:$0 sm:$0xff] }
 0x203   : > { %v1218_v37 = vrot.slane %v5711_v54, 2  ;;  %v1700_v27 = vsel %vm786_vm0, %v1698_v58, %v1699_v18  ;;  %v2308_v31 = vadd.f32 %v2248_v33, %v2168_v41  ;;  %v5750_v28 = vadd.f32 %v874_v45, %v592_v6  ;;  %v5796_v33 = vld [vmem:[%s6088_s1 + $0x7] ss:$0 sm:$0xff]  ;;  %v516_v6 = vpop.permute.xlu1 %515 }
 0x204   : > { %v3063_v22 = vadd.f32 %v5050_v23, %v2999_v21  ;;  %v2043_v35 = vrot.slane %v5736_v8, 2  ;;  %v2523_v17 = vrot.slane %v2373_v9, 1  ;;  %v2718_v0 = vmul.f32 %v5756_v63, %v496_v4  ;;  %v2198_v23 = vpop.permute.xlu2 %2197  ;;  %3135 = vst.msk [vmem:[%s3567_s15 + $0x1c0] sm:$0xf] %vm3080_vm2, %v3073_v60 }
 0x205   : > { %v5761_v13 = vadd.f32 %v1700_v27, %v1481_v46  ;;  %v600_v18 = vmul.f32 %v5678_v49, %v5505_v26  ;;  %v5767_v41 = vmul.f32 %v5658_v16, %v5505_v26  ;;  %v5771_v52 = vmul.f32 %v5609_v20, %v5505_v26  ;;  %v5788_v26 = vld [vmem:[%s6088_s1 + $0x6] ss:$0 sm:$0xff] }
 0x206   : > { %3125 = vst.msk [vmem:[%s3567_s15 + $0x170] sm:$0xff] %vm3077_vm3, %v3063_v22  ;;  %v2525_v56 = vsel %vm786_vm0, %v2523_v17, %v2524_v53  ;;  %v2868_v47 = vrot.slane %v2718_v0, 2  ;;  %v5776_v4 = vmul.f32 %v5727_v59, %v5600_v11  ;;  %v5780_v5 = vmul.f32 %v5733_v1, %v5600_v11 }
 0x207   : > { %v2653_v21 = vadd.f32 %v2525_v56, %v2308_v31  ;;  %v6223_v3 = vrot.slane %v5767_v41, 1  ;;  %v1432_v7 = vmul.f32 %v5721_v25, %v5600_v11  ;;  %v2262_v53 = vmul.f32 %v5788_v26, %v2198_v23 }
 0x208   : > { %v2870_v46 = vsel %vm1132_vm1, %v2868_v47, %v2869_v43  ;;  %v6222_v58 = vrot.slane %v5771_v52, 2  ;;  %v5799_v22 = vmul.f32 %v5796_v33, %v2198_v23  ;;  %v5802_v11 = vmul.f32 %v5756_v63, %v2198_v23 }
 0x209   : > { %v2998_v45 = vadd.f32 %v2870_v46, %v2653_v21  ;;  %v1006_v9 = vadd.f32 %v6223_v3, %v600_v18  ;;  %v6411_v43 = vrot.slane %v5277_v32, 2  ;;  %v6412_v27 = vrot.slane %v5287_v19, 2  ;;  %v5822_v32 = vld [vmem:[%s6089_s2] ss:$0 sm:$0xff] }
 0x20a   : > { %v1716_v17 = vrot.slane %v5776_v4, 1  ;;  %v2061_v0 = vrot.slane %v5780_v5, 2  ;;  %v5829_v21 = vmul.f32 %v5658_v16, %v516_v6  ;;  %v5832_v46 = vmul.f32 %v5609_v20, %v516_v6 }
 0x20b   : > { %v1222_v60 = vsel %vm1132_vm1, %v1219_v15, %v6411_v43  ;;  %v2047_v31 = vsel %vm1132_vm1, %v2044_v10, %v6412_v27  ;;  %v3062_v56 = vadd.f32 %v5822_v32, %v2998_v45  ;;  %v1352_v19 = vadd.f32 %v6222_v58, %v1006_v9 }
 0x20c   : > { %v1345_v23 = vadd.f32 %v1222_v60, %v999_v30  ;;  %v2172_v18 = vadd.f32 %v2047_v31, %v5695_v36  ;;  %v1425_v36 = vmul.f32 %v5721_v25, %v516_v6  ;;  %v1550_v30 = vmul.f32 %v5727_v59, %v516_v6 }
 0x20d   : > { %v5837_v43 = vmul.f32 %v5733_v1, %v516_v6  ;;  %3124 = vst.msk [vmem:[%s3567_s15 + $0x168] sm:$0xff] %vm3077_vm3, %v3062_v56  ;;  %v1492_v45 = vadd.f32 %v1432_v7, %v1352_v19  ;;  %v2252_v60 = vmul.f32 %v5788_v26, %v516_v6  ;;  %v2377_v27 = vmul.f32 %v5796_v33, %v516_v6  ;;  %v5851_v56 = vpop.permute.xlu0 %510 }
 0x20e   : > { %v5845_v31 = vmul.f32 %v5678_v49, %v516_v6  ;;  %v878_v58 = vrot.slane %v5829_v21, 1  ;;  %v1485_v3 = vadd.f32 %v1425_v36, %v1345_v23  ;;  %v1704_v55 = vrot.slane %v1550_v30, 1 }
 0x20f   : > { %v1837_v40 = vadd.f32 %v1716_v17, %v1492_v45  ;;  %v2312_v38 = vadd.f32 %v2252_v60, %v2172_v18  ;;  %v2529_v51 = vrot.slane %v2377_v27, 1  ;;  %v2722_v7 = vmul.f32 %v5756_v63, %v516_v6  ;;  %v5897_v60 = vpop.permute.xlu1 %530 }
 0x210   : > { %v1224_v19 = vrot.slane %v5832_v46, 2  ;;  %v6413_v48 = vrot.slane %v5406_v29, 1  ;;  %v2049_v47 = vrot.slane %v5837_v43, 2  ;;  %v1220_v23 = vsel %vm1132_vm1, %v1218_v37, %v1219_v15  ;;  %v6415_v37 = vld [vmem:[#allocation5_spill] sm:$0xff] }
 0x211   : > { %v2182_v18 = vadd.f32 %v2061_v0, %v1837_v40  ;;  %v6414_v6 = vrot.slane %v5423_v57, 1  ;;  %v2874_v30 = vrot.slane %v2722_v7, 2  ;;  %v2045_v29 = vsel %vm1132_vm1, %v2043_v35, %v2044_v10 }
 0x212   : > { %v1707_v9 = vsel %vm786_vm0, %v1704_v55, %v6413_v48  ;;  %v1344_v54 = vadd.f32 %v1220_v23, %v5750_v28  ;;  %v5876_v15 = vmul.f32 %v5658_v16, %v5851_v56  ;;  %v6416_v57 = vrot.slane %v6415_v37, 2 }
 0x213   : > { %v2532_v36 = vsel %vm786_vm0, %v2529_v51, %v6414_v6  ;;  %v1830_v48 = vadd.f32 %v1707_v9, %v1485_v3  ;;  %v2322_v40 = vadd.f32 %v2262_v53, %v2182_v18  ;;  %v2171_v45 = vadd.f32 %v2045_v29, %v5761_v13 }
 0x214   : > { %v2657_v42 = vadd.f32 %v2532_v36, %v2312_v38  ;;  %v2877_v43 = vsel %vm1132_vm1, %v2874_v30, %v6416_v57  ;;  %v1424_v34 = vmul.f32 %v5721_v25, %v5851_v56  ;;  %v5886_v38 = vmul.f32 %v5609_v20, %v5851_v56 }
 0x215   : > { %v1549_v10 = vmul.f32 %v5727_v59, %v5851_v56  ;;  %v1894_v28 = vmul.f32 %v5733_v1, %v5851_v56  ;;  %v6417_v35 = vrot.slane %v5799_v22, 1  ;;  %v877_v13 = vrot.slane %v5876_v15, 1 }
 0x216   : > { %v3002_v8 = vadd.f32 %v2877_v43, %v2657_v42  ;;  %v1484_v53 = vadd.f32 %v1424_v34, %v1344_v54  ;;  %v2251_v9 = vmul.f32 %v5788_v26, %v5851_v56  ;;  %v2376_v18 = vmul.f32 %v5796_v33, %v5851_v56 }
 0x217   : > { %v2667_v3 = vadd.f32 %v6417_v35, %v2322_v40  ;;  %v1703_v7 = vrot.slane %v1549_v10, 1  ;;  %v2048_v23 = vrot.slane %v1894_v28, 2  ;;  %v6418_v6 = vrot.slane %v5802_v11, 2 }
 0x218   : > { %v3066_v27 = vadd.f32 %v5822_v32, %v3002_v8  ;;  %v2311_v29 = vadd.f32 %v2251_v9, %v2171_v45  ;;  %v2721_v42 = vmul.f32 %v5756_v63, %v5851_v56  ;;  %v6419_v54 = vrot.slane %v5410_v2, 2  ;;  %v5917_v2 = vpop.permute.xlu0 %525 }
 0x219   : > { %v3012_v36 = vadd.f32 %v6418_v6, %v2667_v3  ;;  %v1705_v37 = vsel %vm786_vm0, %v1703_v7, %v1704_v55  ;;  %v2528_v57 = vrot.slane %v2376_v18, 1  ;;  %v2255_v34 = vmul.f32 %v5788_v26, %v5897_v60 }
 0x21a   : > { %v2052_v40 = vsel %vm1132_vm1, %v2049_v47, %v6419_v54  ;;  %3128 = vst.msk [vmem:[%s3567_s15 + $0x188] sm:$0xff] %vm3077_vm3, %v3066_v27  ;;  %v1829_v45 = vadd.f32 %v1705_v37, %v1484_v53  ;;  %v2873_v10 = vrot.slane %v2721_v42, 2  ;;  %v2380_v28 = vmul.f32 %v5796_v33, %v5897_v60 }
 0x21b   : > { %v2175_v43 = vadd.f32 %v2052_v40, %v1830_v48  ;;  %v3076_v8 = vadd.f32 %v5822_v32, %v3012_v36  ;;  %v2530_v35 = vsel %vm786_vm0, %v2528_v57, %v2529_v51  ;;  %v2725_v55 = vmul.f32 %v5756_v63, %v5897_v60 }
 0x21c   : > { %v2050_v48 = vsel %vm1132_vm1, %v2048_v23, %v2049_v47  ;;  %v2656_v9 = vadd.f32 %v2530_v35, %v2311_v29  ;;  %v2875_v27 = vsel %vm1132_vm1, %v2873_v10, %v2874_v30  ;;  %v2534_v53 = vrot.slane %v2380_v28, 1 }
 0x21d   : > { %v2315_v3 = vadd.f32 %v2255_v34, %v2175_v43  ;;  %3138 = vst.msk [vmem:[%s3567_s15 + $0x1d8] sm:$0xf] %vm3080_vm2, %v3076_v8  ;;  %v2174_v7 = vadd.f32 %v2050_v48, %v1829_v45  ;;  %v2879_v18 = vrot.slane %v2725_v55, 2  ;;  %v2254_v6 = vmul.f32 %v5788_v26, %v5917_v2 }
 0x21e   : > { %v2379_v51 = vmul.f32 %v5796_v33, %v5917_v2  ;;  %v2724_v36 = vmul.f32 %v5756_v63, %v5917_v2  ;;  %v3001_v42 = vadd.f32 %v2875_v27, %v2656_v9  ;;  %v6420_v47 = vrot.slane %v5518_v44, 1 }
 0x21f   : > { %v6421_v29 = vrot.slane %v5399_v24, 1  ;;  %v6422_v54 = vrot.slane %v5613_v14, 2  ;;  %v6423_v57 = vrot.slane %v5522_v61, 2  ;;  %v2314_v43 = vadd.f32 %v2254_v6, %v2174_v7 }
 0x220   : > { %v2537_v23 = vsel %vm786_vm0, %v2534_v53, %v6420_v47  ;;  %v2533_v34 = vrot.slane %v2379_v51, 1  ;;  %v3065_v24 = vadd.f32 %v5822_v32, %v3001_v42  ;;  %v2878_v8 = vrot.slane %v2724_v36, 2 }
 0x221   : > { %v881_v30 = vsel %vm786_vm0, %v878_v58, %v6421_v29  ;;  %v1227_v40 = vsel %vm1132_vm1, %v1224_v19, %v6422_v54  ;;  %v2660_v37 = vadd.f32 %v2537_v23, %v2315_v3  ;;  %v2882_v44 = vsel %vm1132_vm1, %v2879_v18, %v6423_v57  ;;  %v5957_v3 = vpop.permute.xlu1 %1362 }
 0x222   : > { %v1002_v45 = vadd.f32 %v881_v30, %v5845_v31  ;;  %v1428_v14 = vmul.f32 %v5721_v25, %v5897_v60  ;;  %v2535_v28 = vsel %vm786_vm0, %v2533_v34, %v2534_v53  ;;  %v1553_v35 = vmul.f32 %v5727_v59, %v5897_v60  ;;  %3127 = vst.msk [vmem:[%s3567_s15 + $0x180] sm:$0xff] %vm3077_vm3, %v3065_v24 }
 0x223   : > { %v3005_v10 = vadd.f32 %v2882_v44, %v2660_v37  ;;  %v1898_v61 = vmul.f32 %v5733_v1, %v5897_v60  ;;  %v1223_v55 = vrot.slane %v5886_v38, 2  ;;  %v2659_v31 = vadd.f32 %v2535_v28, %v2314_v43 }
 0x224   : > { %v1348_v48 = vadd.f32 %v1227_v40, %v1002_v45  ;;  %v2880_v27 = vsel %vm1132_vm1, %v2878_v8, %v2879_v18  ;;  %v1709_v53 = vrot.slane %v1553_v35, 1  ;;  %v595_v6 = vmul.f32 %v5678_v49, %v5851_v56 }
 0x225   : > { %v3069_v9 = vadd.f32 %v5822_v32, %v3005_v10  ;;  %v2054_v7 = vrot.slane %v1898_v61, 2  ;;  %v3004_v51 = vadd.f32 %v2880_v27, %v2659_v31  ;;  %v2383_v42 = vmul.f32 %v5796_v33, %v5957_v3 }
 0x226   : > { %v1488_v36 = vadd.f32 %v1428_v14, %v1348_v48  ;;  %v6424_v38 = vrot.slane %v5617_v50, 1  ;;  %v2258_v18 = vmul.f32 %v5788_v26, %v5957_v3  ;;  %v2728_v23 = vmul.f32 %v5756_v63, %v5957_v3 }
 0x227   : > { %3131 = vst.msk [vmem:[%s3567_s15 + $0x1a0] sm:$0xff] %vm3077_vm3, %v3069_v9  ;;  %v879_v56 = vsel %vm786_vm0, %v877_v13, %v878_v58  ;;  %v3068_v29 = vadd.f32 %v5822_v32, %v3004_v51  ;;  %v2539_v54 = vrot.slane %v2383_v42, 1  ;;  %v6425_v50 = vrot.slane %v5625_v62, 2  ;;  %v5993_v58 = vpop.permute.xlu0 %1357 }
 0x228   : > { %v1712_v47 = vsel %vm786_vm0, %v1709_v53, %v6424_v38  ;;  %v1001_v40 = vadd.f32 %v879_v56, %v595_v6  ;;  %v1225_v57 = vsel %vm1132_vm1, %v1223_v55, %v1224_v19  ;;  %v1427_v21 = vmul.f32 %v5721_v25, %v5917_v2 }
 0x229   : > { %v1833_v30 = vadd.f32 %v1712_v47, %v1488_v36  ;;  %v2057_v37 = vsel %vm1132_vm1, %v2054_v7, %v6425_v50  ;;  %v1552_v15 = vmul.f32 %v5727_v59, %v5917_v2  ;;  %3130 = vst.msk [vmem:[%s3567_s15 + $0x198] sm:$0xff] %vm3077_vm3, %v3068_v29  ;;  %v1897_v62 = vmul.f32 %v5733_v1, %v5917_v2  ;;  %v2193_v56 = vpop.permute.xlu1 %2192 }
 0x22a   : > { %v1347_v44 = vadd.f32 %v1225_v57, %v1001_v40  ;;  %v6426_v43 = vrot.slane %v5633_v12, 1  ;;  %v2884_v19 = vrot.slane %v2728_v23, 2  ;;  %v2382_v14 = vmul.f32 %v5796_v33, %v5993_v58 }
 0x22b   : > { %v2178_v13 = vadd.f32 %v2057_v37, %v1833_v30  ;;  %v1708_v34 = vrot.slane %v1552_v15, 1  ;;  %v2053_v45 = vrot.slane %v1897_v62, 2  ;;  %v6006_v10 = vmul.f32 %v5727_v59, %v5957_v3 }
 0x22c   : > { %v2542_v46 = vsel %vm786_vm0, %v2539_v54, %v6426_v43  ;;  %v1487_v8 = vadd.f32 %v1427_v21, %v1347_v44  ;;  %v2727_v35 = vmul.f32 %v5756_v63, %v5993_v58  ;;  %v2257_v55 = vmul.f32 %v5788_v26, %v5993_v58 }
 0x22d   : > { %v2318_v24 = vadd.f32 %v2258_v18, %v2178_v13  ;;  %v1710_v28 = vsel %vm786_vm0, %v1708_v34, %v1709_v53  ;;  %v2538_v31 = vrot.slane %v2382_v14, 1  ;;  %v6427_v48 = vrot.slane %v5638_v39, 2 }
 0x22e   : > { %v1832_v61 = vadd.f32 %v1710_v28, %v1487_v8  ;;  %v2055_v27 = vsel %vm1132_vm1, %v2053_v45, %v2054_v7  ;;  %v724_v6 = vmul.f32 %v5658_v16, %v5897_v60  ;;  %v1070_v53 = vmul.f32 %v5609_v20, %v5897_v60 }
 0x22f   : > { %v2663_v12 = vadd.f32 %v2542_v46, %v2318_v24  ;;  %v2887_v9 = vsel %vm1132_vm1, %v2884_v19, %v6427_v48  ;;  %v2883_v42 = vrot.slane %v2727_v35, 2  ;;  %v2540_v38 = vsel %vm786_vm0, %v2538_v31, %v2539_v54  ;;  %v2188_v45 = vpop.permute.xlu0 %2187 }
 0x230   : > { %v2177_v36 = vadd.f32 %v2055_v27, %v1832_v61  ;;  %v883_v47 = vrot.slane %v724_v6, 1  ;;  %v1229_v18 = vrot.slane %v1070_v53, 2  ;;  %v599_v7 = vmul.f32 %v5678_v49, %v5897_v60 }
 0x231   : > { %v3008_v51 = vadd.f32 %v2887_v9, %v2663_v12  ;;  %v1714_v29 = vrot.slane %v6006_v10, 1  ;;  %v1555_v30 = vmul.f32 %v5727_v59, %v5993_v58  ;;  %v6428_v40 = vrot.slane %v5767_v41, 1 }
 0x232   : > { %v2317_v23 = vadd.f32 %v2257_v55, %v2177_v36  ;;  %v1901_v54 = vmul.f32 %v5733_v1, %v5957_v3  ;;  %v2885_v57 = vsel %vm1132_vm1, %v2883_v42, %v2884_v19  ;;  %v1431_v60 = vmul.f32 %v5721_v25, %v5957_v3 }
 0x233   : > { %v3072_v39 = vadd.f32 %v5822_v32, %v3008_v51  ;;  %v886_v50 = vsel %vm786_vm0, %v883_v47, %v6428_v40  ;;  %v6429_v15 = vrot.slane %v5771_v52, 2  ;;  %v2386_v41 = vmul.f32 %v5796_v33, %v2193_v56 }
 0x234   : > { %v2662_v37 = vadd.f32 %v2540_v38, %v2317_v23  ;;  %v1005_v21 = vadd.f32 %v886_v50, %v599_v7  ;;  %v723_v13 = vmul.f32 %v5658_v16, %v5917_v2  ;;  %v1069_v44 = vmul.f32 %v5609_v20, %v5917_v2 }
 0x235   : > { %3134 = vst.msk [vmem:[%s3567_s15 + $0x1b8] sm:$0xff] %vm3077_vm3, %v3072_v39  ;;  %v1232_v59 = vsel %vm1132_vm1, %v1229_v18, %v6429_v15  ;;  %v1717_v46 = vsel %vm786_vm0, %v1714_v29, %v1716_v17  ;;  %v2059_v3 = vrot.slane %v1901_v54, 2  ;;  %v1713_v34 = vrot.slane %v1555_v30, 1 }
 0x236   : > { %v3007_v62 = vadd.f32 %v2885_v57, %v2662_v37  ;;  %v1351_v43 = vadd.f32 %v1232_v59, %v1005_v21  ;;  %v882_v19 = vrot.slane %v723_v13, 1  ;;  %v1228_v52 = vrot.slane %v1069_v44, 2 }
 0x237   : > { %v598_v16 = vmul.f32 %v5678_v49, %v5917_v2  ;;  %v2544_v14 = vrot.slane %v2386_v41, 1  ;;  %v2731_v20 = vmul.f32 %v5756_v63, %v2193_v56  ;;  %v1900_v4 = vmul.f32 %v5733_v1, %v5993_v58 }
 0x238   : > { %v3071_v24 = vadd.f32 %v5822_v32, %v3007_v62  ;;  %v1491_v8 = vadd.f32 %v1431_v60, %v1351_v43  ;;  %v884_v10 = vsel %vm786_vm0, %v882_v19, %v883_v47  ;;  %v2261_v28 = vmul.f32 %v5788_v26, %v2193_v56 }
 0x239   : > { %v1004_v35 = vadd.f32 %v884_v10, %v598_v16  ;;  %v1430_v12 = vmul.f32 %v5721_v25, %v5993_v58  ;;  %v2062_v49 = vsel %vm1132_vm1, %v2059_v3, %v2061_v0  ;;  %v1230_v2 = vsel %vm1132_vm1, %v1228_v52, %v1229_v18 }
 0x23a   : > { %3133 = vst.msk [vmem:[%s3567_s15 + $0x1b0] sm:$0xff] %vm3077_vm3, %v3071_v24  ;;  %v1836_v17 = vadd.f32 %v1717_v46, %v1491_v8  ;;  %v2385_v61 = vmul.f32 %v5796_v33, %v2188_v45  ;;  %v6430_v1 = vrot.slane %v5799_v22, 1  ;;  %v2889_v9 = vrot.slane %v2731_v20, 2 }
 0x23b   : > { %v1350_v31 = vadd.f32 %v1230_v2, %v1004_v35  ;;  %v1715_v27 = vsel %vm786_vm0, %v1713_v34, %v1714_v29  ;;  %v2058_v6 = vrot.slane %v1900_v4, 2  ;;  %v2730_v0 = vmul.f32 %v5756_v63, %v2188_v45 }
 0x23c   : > { %v2181_v55 = vadd.f32 %v2062_v49, %v1836_v17  ;;  %v2547_v48 = vsel %vm786_vm0, %v2544_v14, %v6430_v1  ;;  %v2543_v5 = vrot.slane %v2385_v61, 1  ;;  %v2260_v33 = vmul.f32 %v5788_v26, %v2188_v45 }
 0x23d   : > { %v1490_v58 = vadd.f32 %v1430_v12, %v1350_v31  ;;  %v6431_v36 = vrot.slane %v5802_v11, 2  ;;  %v2060_v42 = vsel %vm1132_vm1, %v2058_v6, %v2059_v3  ;;  %v2888_v39 = vrot.slane %v2730_v0, 2 }
 0x23e   : > { %v2321_v25 = vadd.f32 %v2261_v28, %v2181_v55  ;;  %v2545_v18 = vsel %vm786_vm0, %v2543_v5, %v2544_v14 }
 0x23f   : > { %v1835_v51 = vadd.f32 %v1715_v27, %v1490_v58  ;;  %v2892_v22 = vsel %vm1132_vm1, %v2889_v9, %v6431_v36  ;;  %v2890_v56 = vsel %vm1132_vm1, %v2888_v39, %v2889_v9 }
 0x240   : > { %v2666_v53 = vadd.f32 %v2547_v48, %v2321_v25 }
 0x241   : > { %v2180_v47 = vadd.f32 %v2060_v42, %v1835_v51 }
 0x242   : > { %v3011_v38 = vadd.f32 %v2892_v22, %v2666_v53 }
 0x243   : > { %v2320_v7 = vadd.f32 %v2260_v33, %v2180_v47 }
 0x244   : > { %v3075_v23 = vadd.f32 %v5822_v32, %v3011_v38 }
 0x245   : > { %v2665_v63 = vadd.f32 %v2545_v18, %v2320_v7 }
 0x246   : > { %3137 = vst.msk [vmem:[%s3567_s15 + $0x1d0] sm:$0xff] %vm3077_vm3, %v3075_v23 }
 0x247   : > { %v3010_v26 = vadd.f32 %v2890_v56, %v2665_v63 }
 0x249   : > { %v3074_v11 = vadd.f32 %v5822_v32, %v3010_v26 }
 0x24b   : > { %3136 = vst.msk [vmem:[%s3567_s15 + $0x1c8] sm:$0xff] %vm3077_vm3, %v3074_v11 }
 0x24c PF: > { %s13_s12 = sadd.s32 1, %s3271_s12  }
 0x24d   : > { %p10_p4 = scmp.ge.s32.totalorder %s13_s12, 4  }
 0x24f   :  { %12 = sbr.rel (!%p10_p4) target bundleno = 1 (0x1), region = 70 }

</bundles_post_ra>
